<compile_context>
chip_gen: v5e
topology: v5e:2x2
jax: 0.10.0
libtpu: 0.0.40
codegen_flags: <defaults>
</compile_context>

<pallas_src>
import jax
import jax.numpy as jnp
from jax import lax
from jax.experimental import pallas as pl
from jax.experimental.pallas import tpu as pltpu

HIDDEN = 128
NUM_LAYERS = 2
BATCH_PAD = 8          # one sublane tile
VMEM_CHUNK_BUDGET = 10 * 1024 * 1024   # chunk-dependent VMEM budget (bytes)


def _make_kernel(t_block, bp):
    """Build the chunked GRU+critic kernel for static (t_block, padded batch)."""
    H = HIDDEN
    B = bp

    if t_block <= 32:
        unroll = True
    else:
        unroll = 1
        for u in (8, 4, 2):
            if t_block % u == 0:
                unroll = u
                break

    def kernel(state_ref, hidden_ref,
               wih0_ref, bih0_ref, whh0rz_ref, whh0n_ref, bhh0rz_ref, bhh0n_ref,
               wih1_ref, bih1_ref, whh1rz_ref, whh1n_ref, bhh1rz_ref, bhh1n_ref,
               wc_ref, bc_ref,
               value_ref,
               gi_sc, h0hist_sc, h1hist_sc, h0_sc, h1_sc):
        c = pl.program_id(0)

        # Initialize recurrent state from the provided initial hidden on chunk 0.
        @pl.when(c == 0)
        def _():
            h0_sc[...] = hidden_ref[0]
            h1_sc[...] = hidden_ref[1]

        def make_step(hist_ref, whh_rz, whh_n, bhh_rz, bhh_n):
            def step(t, h):
                row = pl.multiple_of(t * B, 8)
                gi = gi_sc[pl.ds(row, B), :]
                # split recurrent matmul: r/z columns first, n columns second,
                # so the EUP sigmoids overlap the second MXU push.
                gh_rz = jnp.dot(h, whh_rz,
                                preferred_element_type=jnp.float32) + bhh_rz
                r = jax.nn.sigmoid(gi[:, 0:H] + gh_rz[:, 0:H])
                z = jax.nn.sigmoid(gi[:, H:2 * H] + gh_rz[:, H:2 * H])
                gh_n = jnp.dot(h, whh_n,
                               preferred_element_type=jnp.float32) + bhh_n
                n = jnp.tanh(gi[:, 2 * H:3 * H] + r * gh_n)
                hn = (1.0 - z) * n + z * h
                hist_ref[pl.ds(row, B), :] = hn
                return hn
            return step

        # ---- layer 0: hoisted whole-chunk input matmul ----
        gi_sc[...] = (jnp.dot(state_ref[...], wih0_ref[...],
                              preferred_element_type=jnp.float32)
                      + bih0_ref[...])

        step0 = make_step(h0hist_sc, whh0rz_ref[...], whh0n_ref[...],
                          bhh0rz_ref[...], bhh0n_ref[...])
        h0_sc[...] = lax.fori_loop(0, t_block, step0, h0_sc[...], unroll=unroll)

        # ---- layer 1: whole-chunk input matmul on layer-0 outputs ----
        gi_sc[...] = (jnp.dot(h0hist_sc[...], wih1_ref[...],
                              preferred_element_type=jnp.float32)
                      + bih1_ref[...])

        step1 = make_step(h1hist_sc, whh1rz_ref[...], whh1n_ref[...],
                          bhh1rz_ref[...], bhh1n_ref[...])
        h1_sc[...] = lax.fori_loop(0, t_block, step1, h1_sc[...], unroll=unroll)

        # ---- critic: VPU multiply + lane reduction, single store per chunk ----
        value_ref[...] = (jnp.sum(h1hist_sc[...] * wc_ref[...],
                                  axis=-1, keepdims=True)
                          + bc_ref[...])

    return kernel


def _pick_t_block(T, bp, D):
    """Largest chunk whose chunk-dependent VMEM fits the budget."""
    H = HIDDEN
    # per-row bytes: gi (3H) + two hist buffers (2H) scratch, plus
    # double-buffered state-in (D) and value-out (1) blocks, all f32.
    bytes_per_row = 4 * (3 * H + 2 * H) + 2 * 4 * D + 2 * 4
    t_max = max(1, (VMEM_CHUNK_BUDGET // bytes_per_row) // bp)
    return min(T, t_max)


@jax.jit
def gru_critic_forward(state, hidden, params):
    """state: (T, B, D) f32; hidden: (2, B, 128) f32; returns value (T, B, 1) f32."""
    (wih0, whh0, bih0, bhh0, wih1, whh1, bih1, bhh1, wc, bc) = params
    T, B, D = state.shape
    H = HIDDEN
    Bp = max(BATCH_PAD, B)
    if Bp % 8:
        Bp += 8 - (Bp % 8)

    t_block = _pick_t_block(T, Bp, D)
    num_chunks = -(-T // t_block)          # ceil
    T_pad = num_chunks * t_block
    rows = t_block * Bp

    # Wrapper-side layout plumbing only (no compute):
    #   * pad batch to one sublane tile and time to a whole number of chunks,
    #   * present a dense (T_pad*Bp, D) input slab,
    #   * transposed / split weights and 2-D biases.
    state_p = jnp.pad(state, ((0, T_pad - T), (0, Bp - B), (0, 0)))
    hidden_p = jnp.pad(hidden, ((0, 0), (0, Bp - B), (0, 0)))
    state2d = state_p.reshape(T_pad * Bp, D)

    wih0_T = wih0.T                         # (D, 3H)
    wih1_T = wih1.T                         # (H, 3H)
    whh0_rz = whh0[:2 * H, :].T             # (H, 2H)
    whh0_n = whh0[2 * H:, :].T              # (H, H)
    whh1_rz = whh1[:2 * H, :].T
    whh1_n = whh1[2 * H:, :].T
    bih0_2d = bih0.reshape(1, 3 * H)
    bih1_2d = bih1.reshape(1, 3 * H)
    bhh0_rz = bhh0[:2 * H].reshape(1, 2 * H)
    bhh0_n = bhh0[2 * H:].reshape(1, H)
    bhh1_rz = bhh1[:2 * H].reshape(1, 2 * H)
    bhh1_n = bhh1[2 * H:].reshape(1, H)
    wc_row = wc.reshape(1, H)               # critic weight as a lane row
    bc_2d = bc.reshape(1, 1)

    const2d = lambda c: (0, 0)

    grid_spec = pltpu.PrefetchScalarGridSpec(
        num_scalar_prefetch=0,
        grid=(num_chunks,),
        in_specs=[
            pl.BlockSpec((rows, D), lambda c: (c, 0)),               # state chunk
            pl.BlockSpec((NUM_LAYERS, Bp, H), lambda c: (0, 0, 0)),  # initial hidden
            pl.BlockSpec((D, 3 * H), const2d),                       # W_ih_l0^T
            pl.BlockSpec((1, 3 * H), const2d),                       # b_ih_l0
            pl.BlockSpec((H, 2 * H), const2d),                       # W_hh_l0^T[:, :2H]
            pl.BlockSpec((H, H), const2d),                           # W_hh_l0^T[:, 2H:]
            pl.BlockSpec((1, 2 * H), const2d),                       # b_hh_l0[:2H]
            pl.BlockSpec((1, H), const2d),                           # b_hh_l0[2H:]
            pl.BlockSpec((H, 3 * H), const2d),                       # W_ih_l1^T
            pl.BlockSpec((1, 3 * H), const2d),                       # b_ih_l1
            pl.BlockSpec((H, 2 * H), const2d),                       # W_hh_l1^T[:, :2H]
            pl.BlockSpec((H, H), const2d),                           # W_hh_l1^T[:, 2H:]
            pl.BlockSpec((1, 2 * H), const2d),                       # b_hh_l1[:2H]
            pl.BlockSpec((1, H), const2d),                           # b_hh_l1[2H:]
            pl.BlockSpec((1, H), const2d),                           # W_critic row
            pl.BlockSpec((1, 1), const2d),                           # b_critic
        ],
        out_specs=pl.BlockSpec((rows, 1), lambda c: (c, 0)),
        scratch_shapes=[
            pltpu.VMEM((rows, 3 * H), jnp.float32),   # gi (shared by both layers)
            pltpu.VMEM((rows, H), jnp.float32),       # layer-0 h history (chunk)
            pltpu.VMEM((rows, H), jnp.float32),       # layer-1 h history (chunk)
            pltpu.VMEM((Bp, H), jnp.float32),         # h carry, layer 0
            pltpu.VMEM((Bp, H), jnp.float32),         # h carry, layer 1
        ],
    )

    value2d = pl.pallas_call(
        _make_kernel(t_block, Bp),
        out_shape=jax.ShapeDtypeStruct((T_pad * Bp, 1), jnp.float32),
        grid_spec=grid_spec,
        compiler_params=pltpu.CompilerParams(
            dimension_semantics=("arbitrary",)),   # recurrence carried across chunks
    )(state2d, hidden_p,
      wih0_T, bih0_2d, whh0_rz, whh0_n, bhh0_rz, bhh0_n,
      wih1_T, bih1_2d, whh1_rz, whh1_n, bhh1_rz, bhh1_n,
      wc_row, bc_2d)

    return value2d.reshape(T_pad, Bp, 1)[:T, :B, :]


def init_params(key, state_dim):
    """Deterministic synthetic params mirroring the PyTorch module's shapes/init."""
    H = HIDDEN
    k = 1.0 / jnp.sqrt(H)
    keys = jax.random.split(key, 10)
    # nn.GRU default init: U(-1/sqrt(H), 1/sqrt(H))
    wih0 = jax.random.uniform(keys[0], (3 * H, state_dim), jnp.float32, -k, k)
    whh0 = jax.random.uniform(keys[1], (3 * H, H), jnp.float32, -k, k)
    bih0 = jax.random.uniform(keys[2], (3 * H,), jnp.float32, -k, k)
    bhh0 = jax.random.uniform(keys[3], (3 * H,), jnp.float32, -k, k)
    wih1 = jax.random.uniform(keys[4], (3 * H, H), jnp.float32, -k, k)
    whh1 = jax.random.uniform(keys[5], (3 * H, H), jnp.float32, -k, k)
    bih1 = jax.random.uniform(keys[6], (3 * H,), jnp.float32, -k, k)
    bhh1 = jax.random.uniform(keys[7], (3 * H,), jnp.float32, -k, k)
    # critic: init_weights -> N(0, 0.1) weight, bias = 0.1
    wc = 0.1 * jax.random.normal(keys[8], (1, H), jnp.float32)
    bc = jnp.full((1,), 0.1, jnp.float32)
    return (wih0, whh0, bih0, bhh0, wih1, whh1, bih1, bhh1, wc, bc)


def gru_critic_ref(state, hidden, params):
    """Pure-JAX reference implementing PyTorch GRU + Linear semantics."""
    (wih0, whh0, bih0, bhh0, wih1, whh1, bih1, bhh1, wc, bc) = params
    H = HIDDEN

    def cell(x, h, wih, whh, bi, bh):
        gi = x @ wih.T + bi
        gh = h @ whh.T + bh
        r = jax.nn.sigmoid(gi[:, :H] + gh[:, :H])
        z = jax.nn.sigmoid(gi[:, H:2 * H] + gh[:, H:2 * H])
        n = jnp.tanh(gi[:, 2 * H:] + r * gh[:, 2 * H:])
        return (1.0 - z) * n + z * h

    def step(carry, x_t):
        h0, h1 = carry
        h0 = cell(x_t, h0, wih0, whh0, bih0, bhh0)
        h1 = cell(h0, h1, wih1, whh1, bih1, bhh1)
        return (h0, h1), h1

    _, p = jax.lax.scan(step, (hidden[0], hidden[1]), state)
    return p @ wc.T + bc  # (T, B, 1)


if __name__ == "__main__":
    key = jax.random.PRNGKey(0)
    k_state, k_hidden, k_params = jax.random.split(key, 3)

    seq_len, batch, state_dim = 8, 2, 12
    state = jax.random.normal(k_state, (seq_len, batch, state_dim), jnp.float32)
    hidden = jax.random.normal(k_hidden, (NUM_LAYERS, batch, HIDDEN), jnp.float32)
    params = init_params(k_params, state_dim)

    value = gru_critic_forward(state, hidden, params)
    value = jax.block_until_ready(value)

    ref = jax.block_until_ready(gru_critic_ref(state, hidden, params))
    assert value.shape == (seq_len, batch, 1)
    assert jnp.allclose(value, ref, atol=1e-4, rtol=1e-4), (
        f"max err {jnp.max(jnp.abs(value - ref))}")

    print("KERNEL_OK")
</pallas_src>

<mosaic_0001>
module attributes {stable_mosaic.version = 11 : i64} {
  func.func @kernel(%arg0: i32, %arg1: memref<64x12xf32, #tpu.memory_space<vmem>>, %arg2: memref<2x8x128xf32, #tpu.memory_space<vmem>>, %arg3: memref<12x384xf32, #tpu.memory_space<vmem>>, %arg4: memref<1x384xf32, #tpu.memory_space<vmem>>, %arg5: memref<128x256xf32, #tpu.memory_space<vmem>>, %arg6: memref<128x128xf32, #tpu.memory_space<vmem>>, %arg7: memref<1x256xf32, #tpu.memory_space<vmem>>, %arg8: memref<1x128xf32, #tpu.memory_space<vmem>>, %arg9: memref<128x384xf32, #tpu.memory_space<vmem>>, %arg10: memref<1x384xf32, #tpu.memory_space<vmem>>, %arg11: memref<128x256xf32, #tpu.memory_space<vmem>>, %arg12: memref<128x128xf32, #tpu.memory_space<vmem>>, %arg13: memref<1x256xf32, #tpu.memory_space<vmem>>, %arg14: memref<1x128xf32, #tpu.memory_space<vmem>>, %arg15: memref<1x128xf32, #tpu.memory_space<vmem>>, %arg16: memref<1x1xf32, #tpu.memory_space<vmem>>, %arg17: memref<64x1xf32, #tpu.memory_space<vmem>>, %arg18: memref<64x384xf32, #tpu.memory_space<vmem>>, %arg19: memref<64x128xf32, #tpu.memory_space<vmem>>, %arg20: memref<64x128xf32, #tpu.memory_space<vmem>>, %arg21: memref<8x128xf32, #tpu.memory_space<vmem>>, %arg22: memref<8x128xf32, #tpu.memory_space<vmem>>) attributes {dimension_semantics = [#tpu.dimension_semantics<arbitrary>], iteration_bounds = array<i64: 1>, scalar_prefetch = 0 : i64, scratch_operands = 5 : i64, tpu.core_type = #tpu.core_type<tc>, window_params = [{transform_indices = @transform_0, window_bounds = array<i64: 64, 12>}, {pipeline_mode = #tpu.pipeline_mode<synchronous>, transform_indices = @transform_1, window_bounds = array<i64: 2, 8, 128>}, {pipeline_mode = #tpu.pipeline_mode<synchronous>, transform_indices = @transform_2, window_bounds = array<i64: 12, 384>}, {pipeline_mode = #tpu.pipeline_mode<synchronous>, transform_indices = @transform_3, window_bounds = array<i64: 1, 384>}, {pipeline_mode = #tpu.pipeline_mode<synchronous>, transform_indices = @transform_4, window_bounds = array<i64: 128, 256>}, {pipeline_mode = #tpu.pipeline_mode<synchronous>, transform_indices = @transform_5, window_bounds = array<i64: 128, 128>}, {pipeline_mode = #tpu.pipeline_mode<synchronous>, transform_indices = @transform_6, window_bounds = array<i64: 1, 256>}, {pipeline_mode = #tpu.pipeline_mode<synchronous>, transform_indices = @transform_7, window_bounds = array<i64: 1, 128>}, {pipeline_mode = #tpu.pipeline_mode<synchronous>, transform_indices = @transform_8, window_bounds = array<i64: 128, 384>}, {pipeline_mode = #tpu.pipeline_mode<synchronous>, transform_indices = @transform_9, window_bounds = array<i64: 1, 384>}, {pipeline_mode = #tpu.pipeline_mode<synchronous>, transform_indices = @transform_10, window_bounds = array<i64: 128, 256>}, {pipeline_mode = #tpu.pipeline_mode<synchronous>, transform_indices = @transform_11, window_bounds = array<i64: 128, 128>}, {pipeline_mode = #tpu.pipeline_mode<synchronous>, transform_indices = @transform_12, window_bounds = array<i64: 1, 256>}, {pipeline_mode = #tpu.pipeline_mode<synchronous>, transform_indices = @transform_13, window_bounds = array<i64: 1, 128>}, {pipeline_mode = #tpu.pipeline_mode<synchronous>, transform_indices = @transform_14, window_bounds = array<i64: 1, 128>}, {pipeline_mode = #tpu.pipeline_mode<synchronous>, transform_indices = @transform_15, window_bounds = array<i64: 1, 1>}, {transform_indices = @transform_16, window_bounds = array<i64: 64, 1>}]} {
    %c0_i32 = arith.constant 0 : i32
    %0 = arith.cmpi eq, %arg0, %c0_i32 : i32
    %1 = arith.extui %0 : i1 to i32
    %c0_i32_0 = arith.constant 0 : i32
    %2 = arith.cmpi ne, %1, %c0_i32_0 : i32
    scf.if %2 {
      %c0_188 = arith.constant 0 : index
      %c0_189 = arith.constant 0 : index
      %c0_190 = arith.constant 0 : index
      %631 = vector.load %arg2[%c0_188, %c0_189, %c0_190] : memref<2x8x128xf32, #tpu.memory_space<vmem>>, vector<1x8x128xf32>
      %632 = vector.shape_cast %631 : vector<1x8x128xf32> to vector<8x128xf32>
      %c0_191 = arith.constant 0 : index
      %c0_192 = arith.constant 0 : index
      %633 = vector.load %arg21[%c0_191, %c0_192] : memref<8x128xf32, #tpu.memory_space<vmem>>, vector<8x128xf32>
      tpu.vector_store %arg21[%c0_191, %c0_192], %632 {strides = array<i32>} : memref<8x128xf32, #tpu.memory_space<vmem>>, vector<8x128xf32>,
      %c1 = arith.constant 1 : index
      %c0_193 = arith.constant 0 : index
      %c0_194 = arith.constant 0 : index
      %634 = vector.load %arg2[%c1, %c0_193, %c0_194] : memref<2x8x128xf32, #tpu.memory_space<vmem>>, vector<1x8x128xf32>
      %635 = vector.shape_cast %634 : vector<1x8x128xf32> to vector<8x128xf32>
      %c0_195 = arith.constant 0 : index
      %c0_196 = arith.constant 0 : index
      %636 = vector.load %arg22[%c0_195, %c0_196] : memref<8x128xf32, #tpu.memory_space<vmem>>, vector<8x128xf32>
      tpu.vector_store %arg22[%c0_195, %c0_196], %635 {strides = array<i32>} : memref<8x128xf32, #tpu.memory_space<vmem>>, vector<8x128xf32>,
    } else {
    }
    %c0 = arith.constant 0 : index
    %c0_1 = arith.constant 0 : index
    %3 = vector.load %arg1[%c0, %c0_1] : memref<64x12xf32, #tpu.memory_space<vmem>>, vector<64x12xf32>
    %c0_2 = arith.constant 0 : index
    %c0_3 = arith.constant 0 : index
    %4 = vector.load %arg3[%c0_2, %c0_3] : memref<12x384xf32, #tpu.memory_space<vmem>>, vector<12x384xf32>
    %cst = arith.constant dense<0.000000e+00> : vector<64x384xf32>
    %5 = tpu.matmul %3, %4, %cst {dimension_numbers = #tpu.dot_dimension_numbers<[1], [0], [0], [1], [0, 0, 1, 1], [], []>} : vector<64x12xf32>, vector<12x384xf32>, vector<64x384xf32> -> vector<64x384xf32>
    %c0_4 = arith.constant 0 : index
    %c0_5 = arith.constant 0 : index
    %6 = vector.load %arg4[%c0_4, %c0_5] : memref<1x384xf32, #tpu.memory_space<vmem>>, vector<1x384xf32>
    %7 = vector.broadcast %6 : vector<1x384xf32> to vector<64x384xf32>
    %8 = arith.addf %5, %7 : vector<64x384xf32>
    %c0_6 = arith.constant 0 : index
    %c0_7 = arith.constant 0 : index
    %9 = vector.load %arg18[%c0_6, %c0_7] : memref<64x384xf32, #tpu.memory_space<vmem>>, vector<64x384xf32>
    tpu.vector_store %arg18[%c0_6, %c0_7], %8 {strides = array<i32>} : memref<64x384xf32, #tpu.memory_space<vmem>>, vector<64x384xf32>,
    %c0_8 = arith.constant 0 : index
    %c0_9 = arith.constant 0 : index
    %10 = vector.load %arg5[%c0_8, %c0_9] : memref<128x256xf32, #tpu.memory_space<vmem>>, vector<128x256xf32>
    %c0_10 = arith.constant 0 : index
    %c0_11 = arith.constant 0 : index
    %11 = vector.load %arg6[%c0_10, %c0_11] : memref<128x128xf32, #tpu.memory_space<vmem>>, vector<128x128xf32>
    %c0_12 = arith.constant 0 : index
    %c0_13 = arith.constant 0 : index
    %12 = vector.load %arg7[%c0_12, %c0_13] : memref<1x256xf32, #tpu.memory_space<vmem>>, vector<1x256xf32>
    %c0_14 = arith.constant 0 : index
    %c0_15 = arith.constant 0 : index
    %13 = vector.load %arg8[%c0_14, %c0_15] : memref<1x128xf32, #tpu.memory_space<vmem>>, vector<1x128xf32>
    %c0_16 = arith.constant 0 : index
    %c0_17 = arith.constant 0 : index
    %14 = vector.load %arg21[%c0_16, %c0_17] : memref<8x128xf32, #tpu.memory_space<vmem>>, vector<8x128xf32>
    %c0_i32_18 = arith.constant 0 : i32
    %c8_i32 = arith.constant 8 : i32
    %15 = arith.muli %c0_i32_18, %c8_i32 : i32
    %16 = tpu.assume_multiple %15, 8 : i32
    %17 = arith.index_cast %16 : i32 to index
    %c0_19 = arith.constant 0 : index
    %18 = vector.load %arg18[%17, %c0_19] : memref<64x384xf32, #tpu.memory_space<vmem>>, vector<8x384xf32>
    %cst_20 = arith.constant dense<0.000000e+00> : vector<8x256xf32>
    %19 = tpu.matmul %14, %10, %cst_20 {dimension_numbers = #tpu.dot_dimension_numbers<[1], [0], [0], [1], [0, 0, 1, 1], [], []>} : vector<8x128xf32>, vector<128x256xf32>, vector<8x256xf32> -> vector<8x256xf32>
    %20 = vector.broadcast %12 : vector<1x256xf32> to vector<8x256xf32>
    %21 = arith.addf %19, %20 : vector<8x256xf32>
    %22 = vector.extract_strided_slice %18 {offsets = [0, 0], sizes = [8, 128], strides = [1, 1]} : vector<8x384xf32> to vector<8x128xf32>
    %23 = vector.extract_strided_slice %21 {offsets = [0, 0], sizes = [8, 128], strides = [1, 1]} : vector<8x256xf32> to vector<8x128xf32>
    %24 = arith.addf %22, %23 : vector<8x128xf32>
    %25 = arith.negf %24 : vector<8x128xf32>
    %26 = math.exp %25 : vector<8x128xf32>
    %cst_21 = arith.constant 1.000000e+00 : f32
    %27 = vector.broadcast %cst_21 : f32 to vector<8x128xf32>
    %28 = arith.addf %27, %26 : vector<8x128xf32>
    %29 = arith.divf %27, %28 : vector<8x128xf32>
    %30 = vector.extract_strided_slice %18 {offsets = [0, 128], sizes = [8, 128], strides = [1, 1]} : vector<8x384xf32> to vector<8x128xf32>
    %31 = vector.extract_strided_slice %21 {offsets = [0, 128], sizes = [8, 128], strides = [1, 1]} : vector<8x256xf32> to vector<8x128xf32>
    %32 = arith.addf %30, %31 : vector<8x128xf32>
    %33 = arith.negf %32 : vector<8x128xf32>
    %34 = math.exp %33 : vector<8x128xf32>
    %cst_22 = arith.constant 1.000000e+00 : f32
    %35 = vector.broadcast %cst_22 : f32 to vector<8x128xf32>
    %36 = arith.addf %35, %34 : vector<8x128xf32>
    %37 = arith.divf %35, %36 : vector<8x128xf32>
    %cst_23 = arith.constant dense<0.000000e+00> : vector<8x128xf32>
    %38 = tpu.matmul %14, %11, %cst_23 {dimension_numbers = #tpu.dot_dimension_numbers<[1], [0], [0], [1], [0, 0, 1, 1], [], []>} : vector<8x128xf32>, vector<128x128xf32>, vector<8x128xf32> -> vector<8x128xf32>
    %39 = vector.broadcast %13 : vector<1x128xf32> to vector<8x128xf32>
    %40 = arith.addf %38, %39 : vector<8x128xf32>
    %41 = vector.extract_strided_slice %18 {offsets = [0, 256], sizes = [8, 128], strides = [1, 1]} : vector<8x384xf32> to vector<8x128xf32>
    %42 = arith.mulf %29, %40 : vector<8x128xf32>
    %43 = arith.addf %41, %42 : vector<8x128xf32>
    %44 = math.tanh %43 : vector<8x128xf32>
    %cst_24 = arith.constant 1.000000e+00 : f32
    %45 = vector.broadcast %cst_24 : f32 to vector<8x128xf32>
    %46 = arith.subf %45, %37 : vector<8x128xf32>
    %47 = arith.mulf %46, %44 : vector<8x128xf32>
    %48 = arith.mulf %37, %14 : vector<8x128xf32>
    %49 = arith.addf %47, %48 : vector<8x128xf32>
    %50 = arith.index_cast %16 : i32 to index
    %c0_25 = arith.constant 0 : index
    %51 = vector.load %arg19[%50, %c0_25] : memref<64x128xf32, #tpu.memory_space<vmem>>, vector<8x128xf32>
    tpu.vector_store %arg19[%50, %c0_25], %49 {strides = array<i32>} : memref<64x128xf32, #tpu.memory_space<vmem>>, vector<8x128xf32>,
    %c1_i32 = arith.constant 1 : i32
    %c8_i32_26 = arith.constant 8 : i32
    %52 = arith.muli %c1_i32, %c8_i32_26 : i32
    %53 = tpu.assume_multiple %52, 8 : i32
    %54 = arith.index_cast %53 : i32 to index
    %c0_27 = arith.constant 0 : index
    %55 = vector.load %arg18[%54, %c0_27] : memref<64x384xf32, #tpu.memory_space<vmem>>, vector<8x384xf32>
    %cst_28 = arith.constant dense<0.000000e+00> : vector<8x256xf32>
    %56 = tpu.matmul %49, %10, %cst_28 {dimension_numbers = #tpu.dot_dimension_numbers<[1], [0], [0], [1], [0, 0, 1, 1], [], []>} : vector<8x128xf32>, vector<128x256xf32>, vector<8x256xf32> -> vector<8x256xf32>
    %57 = vector.broadcast %12 : vector<1x256xf32> to vector<8x256xf32>
    %58 = arith.addf %56, %57 : vector<8x256xf32>
    %59 = vector.extract_strided_slice %55 {offsets = [0, 0], sizes = [8, 128], strides = [1, 1]} : vector<8x384xf32> to vector<8x128xf32>
    %60 = vector.extract_strided_slice %58 {offsets = [0, 0], sizes = [8, 128], strides = [1, 1]} : vector<8x256xf32> to vector<8x128xf32>
    %61 = arith.addf %59, %60 : vector<8x128xf32>
    %62 = arith.negf %61 : vector<8x128xf32>
    %63 = math.exp %62 : vector<8x128xf32>
    %cst_29 = arith.constant 1.000000e+00 : f32
    %64 = vector.broadcast %cst_29 : f32 to vector<8x128xf32>
    %65 = arith.addf %64, %63 : vector<8x128xf32>
    %66 = arith.divf %64, %65 : vector<8x128xf32>
    %67 = vector.extract_strided_slice %55 {offsets = [0, 128], sizes = [8, 128], strides = [1, 1]} : vector<8x384xf32> to vector<8x128xf32>
    %68 = vector.extract_strided_slice %58 {offsets = [0, 128], sizes = [8, 128], strides = [1, 1]} : vector<8x256xf32> to vector<8x128xf32>
    %69 = arith.addf %67, %68 : vector<8x128xf32>
    %70 = arith.negf %69 : vector<8x128xf32>
    %71 = math.exp %70 : vector<8x128xf32>
    %cst_30 = arith.constant 1.000000e+00 : f32
    %72 = vector.broadcast %cst_30 : f32 to vector<8x128xf32>
    %73 = arith.addf %72, %71 : vector<8x128xf32>
    %74 = arith.divf %72, %73 : vector<8x128xf32>
    %cst_31 = arith.constant dense<0.000000e+00> : vector<8x128xf32>
    %75 = tpu.matmul %49, %11, %cst_31 {dimension_numbers = #tpu.dot_dimension_numbers<[1], [0], [0], [1], [0, 0, 1, 1], [], []>} : vector<8x128xf32>, vector<128x128xf32>, vector<8x128xf32> -> vector<8x128xf32>
    %76 = vector.broadcast %13 : vector<1x128xf32> to vector<8x128xf32>
    %77 = arith.addf %75, %76 : vector<8x128xf32>
    %78 = vector.extract_strided_slice %55 {offsets = [0, 256], sizes = [8, 128], strides = [1, 1]} : vector<8x384xf32> to vector<8x128xf32>
    %79 = arith.mulf %66, %77 : vector<8x128xf32>
    %80 = arith.addf %78, %79 : vector<8x128xf32>
    %81 = math.tanh %80 : vector<8x128xf32>
    %cst_32 = arith.constant 1.000000e+00 : f32
    %82 = vector.broadcast %cst_32 : f32 to vector<8x128xf32>
    %83 = arith.subf %82, %74 : vector<8x128xf32>
    %84 = arith.mulf %83, %81 : vector<8x128xf32>
    %85 = arith.mulf %74, %49 : vector<8x128xf32>
    %86 = arith.addf %84, %85 : vector<8x128xf32>
    %87 = arith.index_cast %53 : i32 to index
    %c0_33 = arith.constant 0 : index
    %88 = vector.load %arg19[%87, %c0_33] : memref<64x128xf32, #tpu.memory_space<vmem>>, vector<8x128xf32>
    tpu.vector_store %arg19[%87, %c0_33], %86 {strides = array<i32>} : memref<64x128xf32, #tpu.memory_space<vmem>>, vector<8x128xf32>,
    %c2_i32 = arith.constant 2 : i32
    %c8_i32_34 = arith.constant 8 : i32
    %89 = arith.muli %c2_i32, %c8_i32_34 : i32
    %90 = tpu.assume_multiple %89, 8 : i32
    %91 = arith.index_cast %90 : i32 to index
    %c0_35 = arith.constant 0 : index
    %92 = vector.load %arg18[%91, %c0_35] : memref<64x384xf32, #tpu.memory_space<vmem>>, vector<8x384xf32>
    %cst_36 = arith.constant dense<0.000000e+00> : vector<8x256xf32>
    %93 = tpu.matmul %86, %10, %cst_36 {dimension_numbers = #tpu.dot_dimension_numbers<[1], [0], [0], [1], [0, 0, 1, 1], [], []>} : vector<8x128xf32>, vector<128x256xf32>, vector<8x256xf32> -> vector<8x256xf32>
    %94 = vector.broadcast %12 : vector<1x256xf32> to vector<8x256xf32>
    %95 = arith.addf %93, %94 : vector<8x256xf32>
    %96 = vector.extract_strided_slice %92 {offsets = [0, 0], sizes = [8, 128], strides = [1, 1]} : vector<8x384xf32> to vector<8x128xf32>
    %97 = vector.extract_strided_slice %95 {offsets = [0, 0], sizes = [8, 128], strides = [1, 1]} : vector<8x256xf32> to vector<8x128xf32>
    %98 = arith.addf %96, %97 : vector<8x128xf32>
    %99 = arith.negf %98 : vector<8x128xf32>
    %100 = math.exp %99 : vector<8x128xf32>
    %cst_37 = arith.constant 1.000000e+00 : f32
    %101 = vector.broadcast %cst_37 : f32 to vector<8x128xf32>
    %102 = arith.addf %101, %100 : vector<8x128xf32>
    %103 = arith.divf %101, %102 : vector<8x128xf32>
    %104 = vector.extract_strided_slice %92 {offsets = [0, 128], sizes = [8, 128], strides = [1, 1]} : vector<8x384xf32> to vector<8x128xf32>
    %105 = vector.extract_strided_slice %95 {offsets = [0, 128], sizes = [8, 128], strides = [1, 1]} : vector<8x256xf32> to vector<8x128xf32>
    %106 = arith.addf %104, %105 : vector<8x128xf32>
    %107 = arith.negf %106 : vector<8x128xf32>
    %108 = math.exp %107 : vector<8x128xf32>
    %cst_38 = arith.constant 1.000000e+00 : f32
    %109 = vector.broadcast %cst_38 : f32 to vector<8x128xf32>
    %110 = arith.addf %109, %108 : vector<8x128xf32>
    %111 = arith.divf %109, %110 : vector<8x128xf32>
    %cst_39 = arith.constant dense<0.000000e+00> : vector<8x128xf32>
    %112 = tpu.matmul %86, %11, %cst_39 {dimension_numbers = #tpu.dot_dimension_numbers<[1], [0], [0], [1], [0, 0, 1, 1], [], []>} : vector<8x128xf32>, vector<128x128xf32>, vector<8x128xf32> -> vector<8x128xf32>
    %113 = vector.broadcast %13 : vector<1x128xf32> to vector<8x128xf32>
    %114 = arith.addf %112, %113 : vector<8x128xf32>
    %115 = vector.extract_strided_slice %92 {offsets = [0, 256], sizes = [8, 128], strides = [1, 1]} : vector<8x384xf32> to vector<8x128xf32>
    %116 = arith.mulf %103, %114 : vector<8x128xf32>
    %117 = arith.addf %115, %116 : vector<8x128xf32>
    %118 = math.tanh %117 : vector<8x128xf32>
    %cst_40 = arith.constant 1.000000e+00 : f32
    %119 = vector.broadcast %cst_40 : f32 to vector<8x128xf32>
    %120 = arith.subf %119, %111 : vector<8x128xf32>
    %121 = arith.mulf %120, %118 : vector<8x128xf32>
    %122 = arith.mulf %111, %86 : vector<8x128xf32>
    %123 = arith.addf %121, %122 : vector<8x128xf32>
    %124 = arith.index_cast %90 : i32 to index
    %c0_41 = arith.constant 0 : index
    %125 = vector.load %arg19[%124, %c0_41] : memref<64x128xf32, #tpu.memory_space<vmem>>, vector<8x128xf32>
    tpu.vector_store %arg19[%124, %c0_41], %123 {strides = array<i32>} : memref<64x128xf32, #tpu.memory_space<vmem>>, vector<8x128xf32>,
    %c3_i32 = arith.constant 3 : i32
    %c8_i32_42 = arith.constant 8 : i32
    %126 = arith.muli %c3_i32, %c8_i32_42 : i32
    %127 = tpu.assume_multiple %126, 8 : i32
    %128 = arith.index_cast %127 : i32 to index
    %c0_43 = arith.constant 0 : index
    %129 = vector.load %arg18[%128, %c0_43] : memref<64x384xf32, #tpu.memory_space<vmem>>, vector<8x384xf32>
    %cst_44 = arith.constant dense<0.000000e+00> : vector<8x256xf32>
    %130 = tpu.matmul %123, %10, %cst_44 {dimension_numbers = #tpu.dot_dimension_numbers<[1], [0], [0], [1], [0, 0, 1, 1], [], []>} : vector<8x128xf32>, vector<128x256xf32>, vector<8x256xf32> -> vector<8x256xf32>
    %131 = vector.broadcast %12 : vector<1x256xf32> to vector<8x256xf32>
    %132 = arith.addf %130, %131 : vector<8x256xf32>
    %133 = vector.extract_strided_slice %129 {offsets = [0, 0], sizes = [8, 128], strides = [1, 1]} : vector<8x384xf32> to vector<8x128xf32>
    %134 = vector.extract_strided_slice %132 {offsets = [0, 0], sizes = [8, 128], strides = [1, 1]} : vector<8x256xf32> to vector<8x128xf32>
    %135 = arith.addf %133, %134 : vector<8x128xf32>
    %136 = arith.negf %135 : vector<8x128xf32>
    %137 = math.exp %136 : vector<8x128xf32>
    %cst_45 = arith.constant 1.000000e+00 : f32
    %138 = vector.broadcast %cst_45 : f32 to vector<8x128xf32>
    %139 = arith.addf %138, %137 : vector<8x128xf32>
    %140 = arith.divf %138, %139 : vector<8x128xf32>
    %141 = vector.extract_strided_slice %129 {offsets = [0, 128], sizes = [8, 128], strides = [1, 1]} : vector<8x384xf32> to vector<8x128xf32>
    %142 = vector.extract_strided_slice %132 {offsets = [0, 128], sizes = [8, 128], strides = [1, 1]} : vector<8x256xf32> to vector<8x128xf32>
    %143 = arith.addf %141, %142 : vector<8x128xf32>
    %144 = arith.negf %143 : vector<8x128xf32>
    %145 = math.exp %144 : vector<8x128xf32>
    %cst_46 = arith.constant 1.000000e+00 : f32
    %146 = vector.broadcast %cst_46 : f32 to vector<8x128xf32>
    %147 = arith.addf %146, %145 : vector<8x128xf32>
    %148 = arith.divf %146, %147 : vector<8x128xf32>
    %cst_47 = arith.constant dense<0.000000e+00> : vector<8x128xf32>
    %149 = tpu.matmul %123, %11, %cst_47 {dimension_numbers = #tpu.dot_dimension_numbers<[1], [0], [0], [1], [0, 0, 1, 1], [], []>} : vector<8x128xf32>, vector<128x128xf32>, vector<8x128xf32> -> vector<8x128xf32>
    %150 = vector.broadcast %13 : vector<1x128xf32> to vector<8x128xf32>
    %151 = arith.addf %149, %150 : vector<8x128xf32>
    %152 = vector.extract_strided_slice %129 {offsets = [0, 256], sizes = [8, 128], strides = [1, 1]} : vector<8x384xf32> to vector<8x128xf32>
    %153 = arith.mulf %140, %151 : vector<8x128xf32>
    %154 = arith.addf %152, %153 : vector<8x128xf32>
    %155 = math.tanh %154 : vector<8x128xf32>
    %cst_48 = arith.constant 1.000000e+00 : f32
    %156 = vector.broadcast %cst_48 : f32 to vector<8x128xf32>
    %157 = arith.subf %156, %148 : vector<8x128xf32>
    %158 = arith.mulf %157, %155 : vector<8x128xf32>
    %159 = arith.mulf %148, %123 : vector<8x128xf32>
    %160 = arith.addf %158, %159 : vector<8x128xf32>
    %161 = arith.index_cast %127 : i32 to index
    %c0_49 = arith.constant 0 : index
    %162 = vector.load %arg19[%161, %c0_49] : memref<64x128xf32, #tpu.memory_space<vmem>>, vector<8x128xf32>
    tpu.vector_store %arg19[%161, %c0_49], %160 {strides = array<i32>} : memref<64x128xf32, #tpu.memory_space<vmem>>, vector<8x128xf32>,
    %c4_i32 = arith.constant 4 : i32
    %c8_i32_50 = arith.constant 8 : i32
    %163 = arith.muli %c4_i32, %c8_i32_50 : i32
    %164 = tpu.assume_multiple %163, 8 : i32
    %165 = arith.index_cast %164 : i32 to index
    %c0_51 = arith.constant 0 : index
    %166 = vector.load %arg18[%165, %c0_51] : memref<64x384xf32, #tpu.memory_space<vmem>>, vector<8x384xf32>
    %cst_52 = arith.constant dense<0.000000e+00> : vector<8x256xf32>
    %167 = tpu.matmul %160, %10, %cst_52 {dimension_numbers = #tpu.dot_dimension_numbers<[1], [0], [0], [1], [0, 0, 1, 1], [], []>} : vector<8x128xf32>, vector<128x256xf32>, vector<8x256xf32> -> vector<8x256xf32>
    %168 = vector.broadcast %12 : vector<1x256xf32> to vector<8x256xf32>
    %169 = arith.addf %167, %168 : vector<8x256xf32>
    %170 = vector.extract_strided_slice %166 {offsets = [0, 0], sizes = [8, 128], strides = [1, 1]} : vector<8x384xf32> to vector<8x128xf32>
    %171 = vector.extract_strided_slice %169 {offsets = [0, 0], sizes = [8, 128], strides = [1, 1]} : vector<8x256xf32> to vector<8x128xf32>
    %172 = arith.addf %170, %171 : vector<8x128xf32>
    %173 = arith.negf %172 : vector<8x128xf32>
    %174 = math.exp %173 : vector<8x128xf32>
    %cst_53 = arith.constant 1.000000e+00 : f32
    %175 = vector.broadcast %cst_53 : f32 to vector<8x128xf32>
    %176 = arith.addf %175, %174 : vector<8x128xf32>
    %177 = arith.divf %175, %176 : vector<8x128xf32>
    %178 = vector.extract_strided_slice %166 {offsets = [0, 128], sizes = [8, 128], strides = [1, 1]} : vector<8x384xf32> to vector<8x128xf32>
    %179 = vector.extract_strided_slice %169 {offsets = [0, 128], sizes = [8, 128], strides = [1, 1]} : vector<8x256xf32> to vector<8x128xf32>
    %180 = arith.addf %178, %179 : vector<8x128xf32>
    %181 = arith.negf %180 : vector<8x128xf32>
    %182 = math.exp %181 : vector<8x128xf32>
    %cst_54 = arith.constant 1.000000e+00 : f32
    %183 = vector.broadcast %cst_54 : f32 to vector<8x128xf32>
    %184 = arith.addf %183, %182 : vector<8x128xf32>
    %185 = arith.divf %183, %184 : vector<8x128xf32>
    %cst_55 = arith.constant dense<0.000000e+00> : vector<8x128xf32>
    %186 = tpu.matmul %160, %11, %cst_55 {dimension_numbers = #tpu.dot_dimension_numbers<[1], [0], [0], [1], [0, 0, 1, 1], [], []>} : vector<8x128xf32>, vector<128x128xf32>, vector<8x128xf32> -> vector<8x128xf32>
    %187 = vector.broadcast %13 : vector<1x128xf32> to vector<8x128xf32>
    %188 = arith.addf %186, %187 : vector<8x128xf32>
    %189 = vector.extract_strided_slice %166 {offsets = [0, 256], sizes = [8, 128], strides = [1, 1]} : vector<8x384xf32> to vector<8x128xf32>
    %190 = arith.mulf %177, %188 : vector<8x128xf32>
    %191 = arith.addf %189, %190 : vector<8x128xf32>
    %192 = math.tanh %191 : vector<8x128xf32>
    %cst_56 = arith.constant 1.000000e+00 : f32
    %193 = vector.broadcast %cst_56 : f32 to vector<8x128xf32>
    %194 = arith.subf %193, %185 : vector<8x128xf32>
    %195 = arith.mulf %194, %192 : vector<8x128xf32>
    %196 = arith.mulf %185, %160 : vector<8x128xf32>
    %197 = arith.addf %195, %196 : vector<8x128xf32>
    %198 = arith.index_cast %164 : i32 to index
    %c0_57 = arith.constant 0 : index
    %199 = vector.load %arg19[%198, %c0_57] : memref<64x128xf32, #tpu.memory_space<vmem>>, vector<8x128xf32>
    tpu.vector_store %arg19[%198, %c0_57], %197 {strides = array<i32>} : memref<64x128xf32, #tpu.memory_space<vmem>>, vector<8x128xf32>,
    %c5_i32 = arith.constant 5 : i32
    %c8_i32_58 = arith.constant 8 : i32
    %200 = arith.muli %c5_i32, %c8_i32_58 : i32
    %201 = tpu.assume_multiple %200, 8 : i32
    %202 = arith.index_cast %201 : i32 to index
    %c0_59 = arith.constant 0 : index
    %203 = vector.load %arg18[%202, %c0_59] : memref<64x384xf32, #tpu.memory_space<vmem>>, vector<8x384xf32>
    %cst_60 = arith.constant dense<0.000000e+00> : vector<8x256xf32>
    %204 = tpu.matmul %197, %10, %cst_60 {dimension_numbers = #tpu.dot_dimension_numbers<[1], [0], [0], [1], [0, 0, 1, 1], [], []>} : vector<8x128xf32>, vector<128x256xf32>, vector<8x256xf32> -> vector<8x256xf32>
    %205 = vector.broadcast %12 : vector<1x256xf32> to vector<8x256xf32>
    %206 = arith.addf %204, %205 : vector<8x256xf32>
    %207 = vector.extract_strided_slice %203 {offsets = [0, 0], sizes = [8, 128], strides = [1, 1]} : vector<8x384xf32> to vector<8x128xf32>
    %208 = vector.extract_strided_slice %206 {offsets = [0, 0], sizes = [8, 128], strides = [1, 1]} : vector<8x256xf32> to vector<8x128xf32>
    %209 = arith.addf %207, %208 : vector<8x128xf32>
    %210 = arith.negf %209 : vector<8x128xf32>
    %211 = math.exp %210 : vector<8x128xf32>
    %cst_61 = arith.constant 1.000000e+00 : f32
    %212 = vector.broadcast %cst_61 : f32 to vector<8x128xf32>
    %213 = arith.addf %212, %211 : vector<8x128xf32>
    %214 = arith.divf %212, %213 : vector<8x128xf32>
    %215 = vector.extract_strided_slice %203 {offsets = [0, 128], sizes = [8, 128], strides = [1, 1]} : vector<8x384xf32> to vector<8x128xf32>
    %216 = vector.extract_strided_slice %206 {offsets = [0, 128], sizes = [8, 128], strides = [1, 1]} : vector<8x256xf32> to vector<8x128xf32>
    %217 = arith.addf %215, %216 : vector<8x128xf32>
    %218 = arith.negf %217 : vector<8x128xf32>
    %219 = math.exp %218 : vector<8x128xf32>
    %cst_62 = arith.constant 1.000000e+00 : f32
    %220 = vector.broadcast %cst_62 : f32 to vector<8x128xf32>
    %221 = arith.addf %220, %219 : vector<8x128xf32>
    %222 = arith.divf %220, %221 : vector<8x128xf32>
    %cst_63 = arith.constant dense<0.000000e+00> : vector<8x128xf32>
    %223 = tpu.matmul %197, %11, %cst_63 {dimension_numbers = #tpu.dot_dimension_numbers<[1], [0], [0], [1], [0, 0, 1, 1], [], []>} : vector<8x128xf32>, vector<128x128xf32>, vector<8x128xf32> -> vector<8x128xf32>
    %224 = vector.broadcast %13 : vector<1x128xf32> to vector<8x128xf32>
    %225 = arith.addf %223, %224 : vector<8x128xf32>
    %226 = vector.extract_strided_slice %203 {offsets = [0, 256], sizes = [8, 128], strides = [1, 1]} : vector<8x384xf32> to vector<8x128xf32>
    %227 = arith.mulf %214, %225 : vector<8x128xf32>
    %228 = arith.addf %226, %227 : vector<8x128xf32>
    %229 = math.tanh %228 : vector<8x128xf32>
    %cst_64 = arith.constant 1.000000e+00 : f32
    %230 = vector.broadcast %cst_64 : f32 to vector<8x128xf32>
    %231 = arith.subf %230, %222 : vector<8x128xf32>
    %232 = arith.mulf %231, %229 : vector<8x128xf32>
    %233 = arith.mulf %222, %197 : vector<8x128xf32>
    %234 = arith.addf %232, %233 : vector<8x128xf32>
    %235 = arith.index_cast %201 : i32 to index
    %c0_65 = arith.constant 0 : index
    %236 = vector.load %arg19[%235, %c0_65] : memref<64x128xf32, #tpu.memory_space<vmem>>, vector<8x128xf32>
    tpu.vector_store %arg19[%235, %c0_65], %234 {strides = array<i32>} : memref<64x128xf32, #tpu.memory_space<vmem>>, vector<8x128xf32>,
    %c6_i32 = arith.constant 6 : i32
    %c8_i32_66 = arith.constant 8 : i32
    %237 = arith.muli %c6_i32, %c8_i32_66 : i32
    %238 = tpu.assume_multiple %237, 8 : i32
    %239 = arith.index_cast %238 : i32 to index
    %c0_67 = arith.constant 0 : index
    %240 = vector.load %arg18[%239, %c0_67] : memref<64x384xf32, #tpu.memory_space<vmem>>, vector<8x384xf32>
    %cst_68 = arith.constant dense<0.000000e+00> : vector<8x256xf32>
    %241 = tpu.matmul %234, %10, %cst_68 {dimension_numbers = #tpu.dot_dimension_numbers<[1], [0], [0], [1], [0, 0, 1, 1], [], []>} : vector<8x128xf32>, vector<128x256xf32>, vector<8x256xf32> -> vector<8x256xf32>
    %242 = vector.broadcast %12 : vector<1x256xf32> to vector<8x256xf32>
    %243 = arith.addf %241, %242 : vector<8x256xf32>
    %244 = vector.extract_strided_slice %240 {offsets = [0, 0], sizes = [8, 128], strides = [1, 1]} : vector<8x384xf32> to vector<8x128xf32>
    %245 = vector.extract_strided_slice %243 {offsets = [0, 0], sizes = [8, 128], strides = [1, 1]} : vector<8x256xf32> to vector<8x128xf32>
    %246 = arith.addf %244, %245 : vector<8x128xf32>
    %247 = arith.negf %246 : vector<8x128xf32>
    %248 = math.exp %247 : vector<8x128xf32>
    %cst_69 = arith.constant 1.000000e+00 : f32
    %249 = vector.broadcast %cst_69 : f32 to vector<8x128xf32>
    %250 = arith.addf %249, %248 : vector<8x128xf32>
    %251 = arith.divf %249, %250 : vector<8x128xf32>
    %252 = vector.extract_strided_slice %240 {offsets = [0, 128], sizes = [8, 128], strides = [1, 1]} : vector<8x384xf32> to vector<8x128xf32>
    %253 = vector.extract_strided_slice %243 {offsets = [0, 128], sizes = [8, 128], strides = [1, 1]} : vector<8x256xf32> to vector<8x128xf32>
    %254 = arith.addf %252, %253 : vector<8x128xf32>
    %255 = arith.negf %254 : vector<8x128xf32>
    %256 = math.exp %255 : vector<8x128xf32>
    %cst_70 = arith.constant 1.000000e+00 : f32
    %257 = vector.broadcast %cst_70 : f32 to vector<8x128xf32>
    %258 = arith.addf %257, %256 : vector<8x128xf32>
    %259 = arith.divf %257, %258 : vector<8x128xf32>
    %cst_71 = arith.constant dense<0.000000e+00> : vector<8x128xf32>
    %260 = tpu.matmul %234, %11, %cst_71 {dimension_numbers = #tpu.dot_dimension_numbers<[1], [0], [0], [1], [0, 0, 1, 1], [], []>} : vector<8x128xf32>, vector<128x128xf32>, vector<8x128xf32> -> vector<8x128xf32>
    %261 = vector.broadcast %13 : vector<1x128xf32> to vector<8x128xf32>
    %262 = arith.addf %260, %261 : vector<8x128xf32>
    %263 = vector.extract_strided_slice %240 {offsets = [0, 256], sizes = [8, 128], strides = [1, 1]} : vector<8x384xf32> to vector<8x128xf32>
    %264 = arith.mulf %251, %262 : vector<8x128xf32>
    %265 = arith.addf %263, %264 : vector<8x128xf32>
    %266 = math.tanh %265 : vector<8x128xf32>
    %cst_72 = arith.constant 1.000000e+00 : f32
    %267 = vector.broadcast %cst_72 : f32 to vector<8x128xf32>
    %268 = arith.subf %267, %259 : vector<8x128xf32>
    %269 = arith.mulf %268, %266 : vector<8x128xf32>
    %270 = arith.mulf %259, %234 : vector<8x128xf32>
    %271 = arith.addf %269, %270 : vector<8x128xf32>
    %272 = arith.index_cast %238 : i32 to index
    %c0_73 = arith.constant 0 : index
    %273 = vector.load %arg19[%272, %c0_73] : memref<64x128xf32, #tpu.memory_space<vmem>>, vector<8x128xf32>
    tpu.vector_store %arg19[%272, %c0_73], %271 {strides = array<i32>} : memref<64x128xf32, #tpu.memory_space<vmem>>, vector<8x128xf32>,
    %c7_i32 = arith.constant 7 : i32
    %c8_i32_74 = arith.constant 8 : i32
    %274 = arith.muli %c7_i32, %c8_i32_74 : i32
    %275 = tpu.assume_multiple %274, 8 : i32
    %276 = arith.index_cast %275 : i32 to index
    %c0_75 = arith.constant 0 : index
    %277 = vector.load %arg18[%276, %c0_75] : memref<64x384xf32, #tpu.memory_space<vmem>>, vector<8x384xf32>
    %cst_76 = arith.constant dense<0.000000e+00> : vector<8x256xf32>
    %278 = tpu.matmul %271, %10, %cst_76 {dimension_numbers = #tpu.dot_dimension_numbers<[1], [0], [0], [1], [0, 0, 1, 1], [], []>} : vector<8x128xf32>, vector<128x256xf32>, vector<8x256xf32> -> vector<8x256xf32>
    %279 = vector.broadcast %12 : vector<1x256xf32> to vector<8x256xf32>
    %280 = arith.addf %278, %279 : vector<8x256xf32>
    %281 = vector.extract_strided_slice %277 {offsets = [0, 0], sizes = [8, 128], strides = [1, 1]} : vector<8x384xf32> to vector<8x128xf32>
    %282 = vector.extract_strided_slice %280 {offsets = [0, 0], sizes = [8, 128], strides = [1, 1]} : vector<8x256xf32> to vector<8x128xf32>
    %283 = arith.addf %281, %282 : vector<8x128xf32>
    %284 = arith.negf %283 : vector<8x128xf32>
    %285 = math.exp %284 : vector<8x128xf32>
    %cst_77 = arith.constant 1.000000e+00 : f32
    %286 = vector.broadcast %cst_77 : f32 to vector<8x128xf32>
    %287 = arith.addf %286, %285 : vector<8x128xf32>
    %288 = arith.divf %286, %287 : vector<8x128xf32>
    %289 = vector.extract_strided_slice %277 {offsets = [0, 128], sizes = [8, 128], strides = [1, 1]} : vector<8x384xf32> to vector<8x128xf32>
    %290 = vector.extract_strided_slice %280 {offsets = [0, 128], sizes = [8, 128], strides = [1, 1]} : vector<8x256xf32> to vector<8x128xf32>
    %291 = arith.addf %289, %290 : vector<8x128xf32>
    %292 = arith.negf %291 : vector<8x128xf32>
    %293 = math.exp %292 : vector<8x128xf32>
    %cst_78 = arith.constant 1.000000e+00 : f32
    %294 = vector.broadcast %cst_78 : f32 to vector<8x128xf32>
    %295 = arith.addf %294, %293 : vector<8x128xf32>
    %296 = arith.divf %294, %295 : vector<8x128xf32>
    %cst_79 = arith.constant dense<0.000000e+00> : vector<8x128xf32>
    %297 = tpu.matmul %271, %11, %cst_79 {dimension_numbers = #tpu.dot_dimension_numbers<[1], [0], [0], [1], [0, 0, 1, 1], [], []>} : vector<8x128xf32>, vector<128x128xf32>, vector<8x128xf32> -> vector<8x128xf32>
    %298 = vector.broadcast %13 : vector<1x128xf32> to vector<8x128xf32>
    %299 = arith.addf %297, %298 : vector<8x128xf32>
    %300 = vector.extract_strided_slice %277 {offsets = [0, 256], sizes = [8, 128], strides = [1, 1]} : vector<8x384xf32> to vector<8x128xf32>
    %301 = arith.mulf %288, %299 : vector<8x128xf32>
    %302 = arith.addf %300, %301 : vector<8x128xf32>
    %303 = math.tanh %302 : vector<8x128xf32>
    %cst_80 = arith.constant 1.000000e+00 : f32
    %304 = vector.broadcast %cst_80 : f32 to vector<8x128xf32>
    %305 = arith.subf %304, %296 : vector<8x128xf32>
    %306 = arith.mulf %305, %303 : vector<8x128xf32>
    %307 = arith.mulf %296, %271 : vector<8x128xf32>
    %308 = arith.addf %306, %307 : vector<8x128xf32>
    %309 = arith.index_cast %275 : i32 to index
    %c0_81 = arith.constant 0 : index
    %310 = vector.load %arg19[%309, %c0_81] : memref<64x128xf32, #tpu.memory_space<vmem>>, vector<8x128xf32>
    tpu.vector_store %arg19[%309, %c0_81], %308 {strides = array<i32>} : memref<64x128xf32, #tpu.memory_space<vmem>>, vector<8x128xf32>,
    %c8_i32_82 = arith.constant 8 : i32
    %c0_83 = arith.constant 0 : index
    %c0_84 = arith.constant 0 : index
    %311 = vector.load %arg21[%c0_83, %c0_84] : memref<8x128xf32, #tpu.memory_space<vmem>>, vector<8x128xf32>
    tpu.vector_store %arg21[%c0_83, %c0_84], %308 {strides = array<i32>} : memref<8x128xf32, #tpu.memory_space<vmem>>, vector<8x128xf32>,
    %c0_85 = arith.constant 0 : index
    %c0_86 = arith.constant 0 : index
    %312 = vector.load %arg19[%c0_85, %c0_86] : memref<64x128xf32, #tpu.memory_space<vmem>>, vector<64x128xf32>
    %c0_87 = arith.constant 0 : index
    %c0_88 = arith.constant 0 : index
    %313 = vector.load %arg9[%c0_87, %c0_88] : memref<128x384xf32, #tpu.memory_space<vmem>>, vector<128x384xf32>
    %cst_89 = arith.constant dense<0.000000e+00> : vector<64x384xf32>
    %314 = tpu.matmul %312, %313, %cst_89 {dimension_numbers = #tpu.dot_dimension_numbers<[1], [0], [0], [1], [0, 0, 1, 1], [], []>} : vector<64x128xf32>, vector<128x384xf32>, vector<64x384xf32> -> vector<64x384xf32>
    %c0_90 = arith.constant 0 : index
    %c0_91 = arith.constant 0 : index
    %315 = vector.load %arg10[%c0_90, %c0_91] : memref<1x384xf32, #tpu.memory_space<vmem>>, vector<1x384xf32>
    %316 = vector.broadcast %315 : vector<1x384xf32> to vector<64x384xf32>
    %317 = arith.addf %314, %316 : vector<64x384xf32>
    %c0_92 = arith.constant 0 : index
    %c0_93 = arith.constant 0 : index
    %318 = vector.load %arg18[%c0_92, %c0_93] : memref<64x384xf32, #tpu.memory_space<vmem>>, vector<64x384xf32>
    tpu.vector_store %arg18[%c0_92, %c0_93], %317 {strides = array<i32>} : memref<64x384xf32, #tpu.memory_space<vmem>>, vector<64x384xf32>,
    %c0_94 = arith.constant 0 : index
    %c0_95 = arith.constant 0 : index
    %319 = vector.load %arg11[%c0_94, %c0_95] : memref<128x256xf32, #tpu.memory_space<vmem>>, vector<128x256xf32>
    %c0_96 = arith.constant 0 : index
    %c0_97 = arith.constant 0 : index
    %320 = vector.load %arg12[%c0_96, %c0_97] : memref<128x128xf32, #tpu.memory_space<vmem>>, vector<128x128xf32>
    %c0_98 = arith.constant 0 : index
    %c0_99 = arith.constant 0 : index
    %321 = vector.load %arg13[%c0_98, %c0_99] : memref<1x256xf32, #tpu.memory_space<vmem>>, vector<1x256xf32>
    %c0_100 = arith.constant 0 : index
    %c0_101 = arith.constant 0 : index
    %322 = vector.load %arg14[%c0_100, %c0_101] : memref<1x128xf32, #tpu.memory_space<vmem>>, vector<1x128xf32>
    %c0_102 = arith.constant 0 : index
    %c0_103 = arith.constant 0 : index
    %323 = vector.load %arg22[%c0_102, %c0_103] : memref<8x128xf32, #tpu.memory_space<vmem>>, vector<8x128xf32>
    %c0_i32_104 = arith.constant 0 : i32
    %c8_i32_105 = arith.constant 8 : i32
    %324 = arith.muli %c0_i32_104, %c8_i32_105 : i32
    %325 = tpu.assume_multiple %324, 8 : i32
    %326 = arith.index_cast %325 : i32 to index
    %c0_106 = arith.constant 0 : index
    %327 = vector.load %arg18[%326, %c0_106] : memref<64x384xf32, #tpu.memory_space<vmem>>, vector<8x384xf32>
    %cst_107 = arith.constant dense<0.000000e+00> : vector<8x256xf32>
    %328 = tpu.matmul %323, %319, %cst_107 {dimension_numbers = #tpu.dot_dimension_numbers<[1], [0], [0], [1], [0, 0, 1, 1], [], []>} : vector<8x128xf32>, vector<128x256xf32>, vector<8x256xf32> -> vector<8x256xf32>
    %329 = vector.broadcast %321 : vector<1x256xf32> to vector<8x256xf32>
    %330 = arith.addf %328, %329 : vector<8x256xf32>
    %331 = vector.extract_strided_slice %327 {offsets = [0, 0], sizes = [8, 128], strides = [1, 1]} : vector<8x384xf32> to vector<8x128xf32>
    %332 = vector.extract_strided_slice %330 {offsets = [0, 0], sizes = [8, 128], strides = [1, 1]} : vector<8x256xf32> to vector<8x128xf32>
    %333 = arith.addf %331, %332 : vector<8x128xf32>
    %334 = arith.negf %333 : vector<8x128xf32>
    %335 = math.exp %334 : vector<8x128xf32>
    %cst_108 = arith.constant 1.000000e+00 : f32
    %336 = vector.broadcast %cst_108 : f32 to vector<8x128xf32>
    %337 = arith.addf %336, %335 : vector<8x128xf32>
    %338 = arith.divf %336, %337 : vector<8x128xf32>
    %339 = vector.extract_strided_slice %327 {offsets = [0, 128], sizes = [8, 128], strides = [1, 1]} : vector<8x384xf32> to vector<8x128xf32>
    %340 = vector.extract_strided_slice %330 {offsets = [0, 128], sizes = [8, 128], strides = [1, 1]} : vector<8x256xf32> to vector<8x128xf32>
    %341 = arith.addf %339, %340 : vector<8x128xf32>
    %342 = arith.negf %341 : vector<8x128xf32>
    %343 = math.exp %342 : vector<8x128xf32>
    %cst_109 = arith.constant 1.000000e+00 : f32
    %344 = vector.broadcast %cst_109 : f32 to vector<8x128xf32>
    %345 = arith.addf %344, %343 : vector<8x128xf32>
    %346 = arith.divf %344, %345 : vector<8x128xf32>
    %cst_110 = arith.constant dense<0.000000e+00> : vector<8x128xf32>
    %347 = tpu.matmul %323, %320, %cst_110 {dimension_numbers = #tpu.dot_dimension_numbers<[1], [0], [0], [1], [0, 0, 1, 1], [], []>} : vector<8x128xf32>, vector<128x128xf32>, vector<8x128xf32> -> vector<8x128xf32>
    %348 = vector.broadcast %322 : vector<1x128xf32> to vector<8x128xf32>
    %349 = arith.addf %347, %348 : vector<8x128xf32>
    %350 = vector.extract_strided_slice %327 {offsets = [0, 256], sizes = [8, 128], strides = [1, 1]} : vector<8x384xf32> to vector<8x128xf32>
    %351 = arith.mulf %338, %349 : vector<8x128xf32>
    %352 = arith.addf %350, %351 : vector<8x128xf32>
    %353 = math.tanh %352 : vector<8x128xf32>
    %cst_111 = arith.constant 1.000000e+00 : f32
    %354 = vector.broadcast %cst_111 : f32 to vector<8x128xf32>
    %355 = arith.subf %354, %346 : vector<8x128xf32>
    %356 = arith.mulf %355, %353 : vector<8x128xf32>
    %357 = arith.mulf %346, %323 : vector<8x128xf32>
    %358 = arith.addf %356, %357 : vector<8x128xf32>
    %359 = arith.index_cast %325 : i32 to index
    %c0_112 = arith.constant 0 : index
    %360 = vector.load %arg20[%359, %c0_112] : memref<64x128xf32, #tpu.memory_space<vmem>>, vector<8x128xf32>
    tpu.vector_store %arg20[%359, %c0_112], %358 {strides = array<i32>} : memref<64x128xf32, #tpu.memory_space<vmem>>, vector<8x128xf32>,
    %c1_i32_113 = arith.constant 1 : i32
    %c8_i32_114 = arith.constant 8 : i32
    %361 = arith.muli %c1_i32_113, %c8_i32_114 : i32
    %362 = tpu.assume_multiple %361, 8 : i32
    %363 = arith.index_cast %362 : i32 to index
    %c0_115 = arith.constant 0 : index
    %364 = vector.load %arg18[%363, %c0_115] : memref<64x384xf32, #tpu.memory_space<vmem>>, vector<8x384xf32>
    %cst_116 = arith.constant dense<0.000000e+00> : vector<8x256xf32>
    %365 = tpu.matmul %358, %319, %cst_116 {dimension_numbers = #tpu.dot_dimension_numbers<[1], [0], [0], [1], [0, 0, 1, 1], [], []>} : vector<8x128xf32>, vector<128x256xf32>, vector<8x256xf32> -> vector<8x256xf32>
    %366 = vector.broadcast %321 : vector<1x256xf32> to vector<8x256xf32>
    %367 = arith.addf %365, %366 : vector<8x256xf32>
    %368 = vector.extract_strided_slice %364 {offsets = [0, 0], sizes = [8, 128], strides = [1, 1]} : vector<8x384xf32> to vector<8x128xf32>
    %369 = vector.extract_strided_slice %367 {offsets = [0, 0], sizes = [8, 128], strides = [1, 1]} : vector<8x256xf32> to vector<8x128xf32>
    %370 = arith.addf %368, %369 : vector<8x128xf32>
    %371 = arith.negf %370 : vector<8x128xf32>
    %372 = math.exp %371 : vector<8x128xf32>
    %cst_117 = arith.constant 1.000000e+00 : f32
    %373 = vector.broadcast %cst_117 : f32 to vector<8x128xf32>
    %374 = arith.addf %373, %372 : vector<8x128xf32>
    %375 = arith.divf %373, %374 : vector<8x128xf32>
    %376 = vector.extract_strided_slice %364 {offsets = [0, 128], sizes = [8, 128], strides = [1, 1]} : vector<8x384xf32> to vector<8x128xf32>
    %377 = vector.extract_strided_slice %367 {offsets = [0, 128], sizes = [8, 128], strides = [1, 1]} : vector<8x256xf32> to vector<8x128xf32>
    %378 = arith.addf %376, %377 : vector<8x128xf32>
    %379 = arith.negf %378 : vector<8x128xf32>
    %380 = math.exp %379 : vector<8x128xf32>
    %cst_118 = arith.constant 1.000000e+00 : f32
    %381 = vector.broadcast %cst_118 : f32 to vector<8x128xf32>
    %382 = arith.addf %381, %380 : vector<8x128xf32>
    %383 = arith.divf %381, %382 : vector<8x128xf32>
    %cst_119 = arith.constant dense<0.000000e+00> : vector<8x128xf32>
    %384 = tpu.matmul %358, %320, %cst_119 {dimension_numbers = #tpu.dot_dimension_numbers<[1], [0], [0], [1], [0, 0, 1, 1], [], []>} : vector<8x128xf32>, vector<128x128xf32>, vector<8x128xf32> -> vector<8x128xf32>
    %385 = vector.broadcast %322 : vector<1x128xf32> to vector<8x128xf32>
    %386 = arith.addf %384, %385 : vector<8x128xf32>
    %387 = vector.extract_strided_slice %364 {offsets = [0, 256], sizes = [8, 128], strides = [1, 1]} : vector<8x384xf32> to vector<8x128xf32>
    %388 = arith.mulf %375, %386 : vector<8x128xf32>
    %389 = arith.addf %387, %388 : vector<8x128xf32>
    %390 = math.tanh %389 : vector<8x128xf32>
    %cst_120 = arith.constant 1.000000e+00 : f32
    %391 = vector.broadcast %cst_120 : f32 to vector<8x128xf32>
    %392 = arith.subf %391, %383 : vector<8x128xf32>
    %393 = arith.mulf %392, %390 : vector<8x128xf32>
    %394 = arith.mulf %383, %358 : vector<8x128xf32>
    %395 = arith.addf %393, %394 : vector<8x128xf32>
    %396 = arith.index_cast %362 : i32 to index
    %c0_121 = arith.constant 0 : index
    %397 = vector.load %arg20[%396, %c0_121] : memref<64x128xf32, #tpu.memory_space<vmem>>, vector<8x128xf32>
    tpu.vector_store %arg20[%396, %c0_121], %395 {strides = array<i32>} : memref<64x128xf32, #tpu.memory_space<vmem>>, vector<8x128xf32>,
    %c2_i32_122 = arith.constant 2 : i32
    %c8_i32_123 = arith.constant 8 : i32
    %398 = arith.muli %c2_i32_122, %c8_i32_123 : i32
    %399 = tpu.assume_multiple %398, 8 : i32
    %400 = arith.index_cast %399 : i32 to index
    %c0_124 = arith.constant 0 : index
    %401 = vector.load %arg18[%400, %c0_124] : memref<64x384xf32, #tpu.memory_space<vmem>>, vector<8x384xf32>
    %cst_125 = arith.constant dense<0.000000e+00> : vector<8x256xf32>
    %402 = tpu.matmul %395, %319, %cst_125 {dimension_numbers = #tpu.dot_dimension_numbers<[1], [0], [0], [1], [0, 0, 1, 1], [], []>} : vector<8x128xf32>, vector<128x256xf32>, vector<8x256xf32> -> vector<8x256xf32>
    %403 = vector.broadcast %321 : vector<1x256xf32> to vector<8x256xf32>
    %404 = arith.addf %402, %403 : vector<8x256xf32>
    %405 = vector.extract_strided_slice %401 {offsets = [0, 0], sizes = [8, 128], strides = [1, 1]} : vector<8x384xf32> to vector<8x128xf32>
    %406 = vector.extract_strided_slice %404 {offsets = [0, 0], sizes = [8, 128], strides = [1, 1]} : vector<8x256xf32> to vector<8x128xf32>
    %407 = arith.addf %405, %406 : vector<8x128xf32>
    %408 = arith.negf %407 : vector<8x128xf32>
    %409 = math.exp %408 : vector<8x128xf32>
    %cst_126 = arith.constant 1.000000e+00 : f32
    %410 = vector.broadcast %cst_126 : f32 to vector<8x128xf32>
    %411 = arith.addf %410, %409 : vector<8x128xf32>
    %412 = arith.divf %410, %411 : vector<8x128xf32>
    %413 = vector.extract_strided_slice %401 {offsets = [0, 128], sizes = [8, 128], strides = [1, 1]} : vector<8x384xf32> to vector<8x128xf32>
    %414 = vector.extract_strided_slice %404 {offsets = [0, 128], sizes = [8, 128], strides = [1, 1]} : vector<8x256xf32> to vector<8x128xf32>
    %415 = arith.addf %413, %414 : vector<8x128xf32>
    %416 = arith.negf %415 : vector<8x128xf32>
    %417 = math.exp %416 : vector<8x128xf32>
    %cst_127 = arith.constant 1.000000e+00 : f32
    %418 = vector.broadcast %cst_127 : f32 to vector<8x128xf32>
    %419 = arith.addf %418, %417 : vector<8x128xf32>
    %420 = arith.divf %418, %419 : vector<8x128xf32>
    %cst_128 = arith.constant dense<0.000000e+00> : vector<8x128xf32>
    %421 = tpu.matmul %395, %320, %cst_128 {dimension_numbers = #tpu.dot_dimension_numbers<[1], [0], [0], [1], [0, 0, 1, 1], [], []>} : vector<8x128xf32>, vector<128x128xf32>, vector<8x128xf32> -> vector<8x128xf32>
    %422 = vector.broadcast %322 : vector<1x128xf32> to vector<8x128xf32>
    %423 = arith.addf %421, %422 : vector<8x128xf32>
    %424 = vector.extract_strided_slice %401 {offsets = [0, 256], sizes = [8, 128], strides = [1, 1]} : vector<8x384xf32> to vector<8x128xf32>
    %425 = arith.mulf %412, %423 : vector<8x128xf32>
    %426 = arith.addf %424, %425 : vector<8x128xf32>
    %427 = math.tanh %426 : vector<8x128xf32>
    %cst_129 = arith.constant 1.000000e+00 : f32
    %428 = vector.broadcast %cst_129 : f32 to vector<8x128xf32>
    %429 = arith.subf %428, %420 : vector<8x128xf32>
    %430 = arith.mulf %429, %427 : vector<8x128xf32>
    %431 = arith.mulf %420, %395 : vector<8x128xf32>
    %432 = arith.addf %430, %431 : vector<8x128xf32>
    %433 = arith.index_cast %399 : i32 to index
    %c0_130 = arith.constant 0 : index
    %434 = vector.load %arg20[%433, %c0_130] : memref<64x128xf32, #tpu.memory_space<vmem>>, vector<8x128xf32>
    tpu.vector_store %arg20[%433, %c0_130], %432 {strides = array<i32>} : memref<64x128xf32, #tpu.memory_space<vmem>>, vector<8x128xf32>,
    %c3_i32_131 = arith.constant 3 : i32
    %c8_i32_132 = arith.constant 8 : i32
    %435 = arith.muli %c3_i32_131, %c8_i32_132 : i32
    %436 = tpu.assume_multiple %435, 8 : i32
    %437 = arith.index_cast %436 : i32 to index
    %c0_133 = arith.constant 0 : index
    %438 = vector.load %arg18[%437, %c0_133] : memref<64x384xf32, #tpu.memory_space<vmem>>, vector<8x384xf32>
    %cst_134 = arith.constant dense<0.000000e+00> : vector<8x256xf32>
    %439 = tpu.matmul %432, %319, %cst_134 {dimension_numbers = #tpu.dot_dimension_numbers<[1], [0], [0], [1], [0, 0, 1, 1], [], []>} : vector<8x128xf32>, vector<128x256xf32>, vector<8x256xf32> -> vector<8x256xf32>
    %440 = vector.broadcast %321 : vector<1x256xf32> to vector<8x256xf32>
    %441 = arith.addf %439, %440 : vector<8x256xf32>
    %442 = vector.extract_strided_slice %438 {offsets = [0, 0], sizes = [8, 128], strides = [1, 1]} : vector<8x384xf32> to vector<8x128xf32>
    %443 = vector.extract_strided_slice %441 {offsets = [0, 0], sizes = [8, 128], strides = [1, 1]} : vector<8x256xf32> to vector<8x128xf32>
    %444 = arith.addf %442, %443 : vector<8x128xf32>
    %445 = arith.negf %444 : vector<8x128xf32>
    %446 = math.exp %445 : vector<8x128xf32>
    %cst_135 = arith.constant 1.000000e+00 : f32
    %447 = vector.broadcast %cst_135 : f32 to vector<8x128xf32>
    %448 = arith.addf %447, %446 : vector<8x128xf32>
    %449 = arith.divf %447, %448 : vector<8x128xf32>
    %450 = vector.extract_strided_slice %438 {offsets = [0, 128], sizes = [8, 128], strides = [1, 1]} : vector<8x384xf32> to vector<8x128xf32>
    %451 = vector.extract_strided_slice %441 {offsets = [0, 128], sizes = [8, 128], strides = [1, 1]} : vector<8x256xf32> to vector<8x128xf32>
    %452 = arith.addf %450, %451 : vector<8x128xf32>
    %453 = arith.negf %452 : vector<8x128xf32>
    %454 = math.exp %453 : vector<8x128xf32>
    %cst_136 = arith.constant 1.000000e+00 : f32
    %455 = vector.broadcast %cst_136 : f32 to vector<8x128xf32>
    %456 = arith.addf %455, %454 : vector<8x128xf32>
    %457 = arith.divf %455, %456 : vector<8x128xf32>
    %cst_137 = arith.constant dense<0.000000e+00> : vector<8x128xf32>
    %458 = tpu.matmul %432, %320, %cst_137 {dimension_numbers = #tpu.dot_dimension_numbers<[1], [0], [0], [1], [0, 0, 1, 1], [], []>} : vector<8x128xf32>, vector<128x128xf32>, vector<8x128xf32> -> vector<8x128xf32>
    %459 = vector.broadcast %322 : vector<1x128xf32> to vector<8x128xf32>
    %460 = arith.addf %458, %459 : vector<8x128xf32>
    %461 = vector.extract_strided_slice %438 {offsets = [0, 256], sizes = [8, 128], strides = [1, 1]} : vector<8x384xf32> to vector<8x128xf32>
    %462 = arith.mulf %449, %460 : vector<8x128xf32>
    %463 = arith.addf %461, %462 : vector<8x128xf32>
    %464 = math.tanh %463 : vector<8x128xf32>
    %cst_138 = arith.constant 1.000000e+00 : f32
    %465 = vector.broadcast %cst_138 : f32 to vector<8x128xf32>
    %466 = arith.subf %465, %457 : vector<8x128xf32>
    %467 = arith.mulf %466, %464 : vector<8x128xf32>
    %468 = arith.mulf %457, %432 : vector<8x128xf32>
    %469 = arith.addf %467, %468 : vector<8x128xf32>
    %470 = arith.index_cast %436 : i32 to index
    %c0_139 = arith.constant 0 : index
    %471 = vector.load %arg20[%470, %c0_139] : memref<64x128xf32, #tpu.memory_space<vmem>>, vector<8x128xf32>
    tpu.vector_store %arg20[%470, %c0_139], %469 {strides = array<i32>} : memref<64x128xf32, #tpu.memory_space<vmem>>, vector<8x128xf32>,
    %c4_i32_140 = arith.constant 4 : i32
    %c8_i32_141 = arith.constant 8 : i32
    %472 = arith.muli %c4_i32_140, %c8_i32_141 : i32
    %473 = tpu.assume_multiple %472, 8 : i32
    %474 = arith.index_cast %473 : i32 to index
    %c0_142 = arith.constant 0 : index
    %475 = vector.load %arg18[%474, %c0_142] : memref<64x384xf32, #tpu.memory_space<vmem>>, vector<8x384xf32>
    %cst_143 = arith.constant dense<0.000000e+00> : vector<8x256xf32>
    %476 = tpu.matmul %469, %319, %cst_143 {dimension_numbers = #tpu.dot_dimension_numbers<[1], [0], [0], [1], [0, 0, 1, 1], [], []>} : vector<8x128xf32>, vector<128x256xf32>, vector<8x256xf32> -> vector<8x256xf32>
    %477 = vector.broadcast %321 : vector<1x256xf32> to vector<8x256xf32>
    %478 = arith.addf %476, %477 : vector<8x256xf32>
    %479 = vector.extract_strided_slice %475 {offsets = [0, 0], sizes = [8, 128], strides = [1, 1]} : vector<8x384xf32> to vector<8x128xf32>
    %480 = vector.extract_strided_slice %478 {offsets = [0, 0], sizes = [8, 128], strides = [1, 1]} : vector<8x256xf32> to vector<8x128xf32>
    %481 = arith.addf %479, %480 : vector<8x128xf32>
    %482 = arith.negf %481 : vector<8x128xf32>
    %483 = math.exp %482 : vector<8x128xf32>
    %cst_144 = arith.constant 1.000000e+00 : f32
    %484 = vector.broadcast %cst_144 : f32 to vector<8x128xf32>
    %485 = arith.addf %484, %483 : vector<8x128xf32>
    %486 = arith.divf %484, %485 : vector<8x128xf32>
    %487 = vector.extract_strided_slice %475 {offsets = [0, 128], sizes = [8, 128], strides = [1, 1]} : vector<8x384xf32> to vector<8x128xf32>
    %488 = vector.extract_strided_slice %478 {offsets = [0, 128], sizes = [8, 128], strides = [1, 1]} : vector<8x256xf32> to vector<8x128xf32>
    %489 = arith.addf %487, %488 : vector<8x128xf32>
    %490 = arith.negf %489 : vector<8x128xf32>
    %491 = math.exp %490 : vector<8x128xf32>
    %cst_145 = arith.constant 1.000000e+00 : f32
    %492 = vector.broadcast %cst_145 : f32 to vector<8x128xf32>
    %493 = arith.addf %492, %491 : vector<8x128xf32>
    %494 = arith.divf %492, %493 : vector<8x128xf32>
    %cst_146 = arith.constant dense<0.000000e+00> : vector<8x128xf32>
    %495 = tpu.matmul %469, %320, %cst_146 {dimension_numbers = #tpu.dot_dimension_numbers<[1], [0], [0], [1], [0, 0, 1, 1], [], []>} : vector<8x128xf32>, vector<128x128xf32>, vector<8x128xf32> -> vector<8x128xf32>
    %496 = vector.broadcast %322 : vector<1x128xf32> to vector<8x128xf32>
    %497 = arith.addf %495, %496 : vector<8x128xf32>
    %498 = vector.extract_strided_slice %475 {offsets = [0, 256], sizes = [8, 128], strides = [1, 1]} : vector<8x384xf32> to vector<8x128xf32>
    %499 = arith.mulf %486, %497 : vector<8x128xf32>
    %500 = arith.addf %498, %499 : vector<8x128xf32>
    %501 = math.tanh %500 : vector<8x128xf32>
    %cst_147 = arith.constant 1.000000e+00 : f32
    %502 = vector.broadcast %cst_147 : f32 to vector<8x128xf32>
    %503 = arith.subf %502, %494 : vector<8x128xf32>
    %504 = arith.mulf %503, %501 : vector<8x128xf32>
    %505 = arith.mulf %494, %469 : vector<8x128xf32>
    %506 = arith.addf %504, %505 : vector<8x128xf32>
    %507 = arith.index_cast %473 : i32 to index
    %c0_148 = arith.constant 0 : index
    %508 = vector.load %arg20[%507, %c0_148] : memref<64x128xf32, #tpu.memory_space<vmem>>, vector<8x128xf32>
    tpu.vector_store %arg20[%507, %c0_148], %506 {strides = array<i32>} : memref<64x128xf32, #tpu.memory_space<vmem>>, vector<8x128xf32>,
    %c5_i32_149 = arith.constant 5 : i32
    %c8_i32_150 = arith.constant 8 : i32
    %509 = arith.muli %c5_i32_149, %c8_i32_150 : i32
    %510 = tpu.assume_multiple %509, 8 : i32
    %511 = arith.index_cast %510 : i32 to index
    %c0_151 = arith.constant 0 : index
    %512 = vector.load %arg18[%511, %c0_151] : memref<64x384xf32, #tpu.memory_space<vmem>>, vector<8x384xf32>
    %cst_152 = arith.constant dense<0.000000e+00> : vector<8x256xf32>
    %513 = tpu.matmul %506, %319, %cst_152 {dimension_numbers = #tpu.dot_dimension_numbers<[1], [0], [0], [1], [0, 0, 1, 1], [], []>} : vector<8x128xf32>, vector<128x256xf32>, vector<8x256xf32> -> vector<8x256xf32>
    %514 = vector.broadcast %321 : vector<1x256xf32> to vector<8x256xf32>
    %515 = arith.addf %513, %514 : vector<8x256xf32>
    %516 = vector.extract_strided_slice %512 {offsets = [0, 0], sizes = [8, 128], strides = [1, 1]} : vector<8x384xf32> to vector<8x128xf32>
    %517 = vector.extract_strided_slice %515 {offsets = [0, 0], sizes = [8, 128], strides = [1, 1]} : vector<8x256xf32> to vector<8x128xf32>
    %518 = arith.addf %516, %517 : vector<8x128xf32>
    %519 = arith.negf %518 : vector<8x128xf32>
    %520 = math.exp %519 : vector<8x128xf32>
    %cst_153 = arith.constant 1.000000e+00 : f32
    %521 = vector.broadcast %cst_153 : f32 to vector<8x128xf32>
    %522 = arith.addf %521, %520 : vector<8x128xf32>
    %523 = arith.divf %521, %522 : vector<8x128xf32>
    %524 = vector.extract_strided_slice %512 {offsets = [0, 128], sizes = [8, 128], strides = [1, 1]} : vector<8x384xf32> to vector<8x128xf32>
    %525 = vector.extract_strided_slice %515 {offsets = [0, 128], sizes = [8, 128], strides = [1, 1]} : vector<8x256xf32> to vector<8x128xf32>
    %526 = arith.addf %524, %525 : vector<8x128xf32>
    %527 = arith.negf %526 : vector<8x128xf32>
    %528 = math.exp %527 : vector<8x128xf32>
    %cst_154 = arith.constant 1.000000e+00 : f32
    %529 = vector.broadcast %cst_154 : f32 to vector<8x128xf32>
    %530 = arith.addf %529, %528 : vector<8x128xf32>
    %531 = arith.divf %529, %530 : vector<8x128xf32>
    %cst_155 = arith.constant dense<0.000000e+00> : vector<8x128xf32>
    %532 = tpu.matmul %506, %320, %cst_155 {dimension_numbers = #tpu.dot_dimension_numbers<[1], [0], [0], [1], [0, 0, 1, 1], [], []>} : vector<8x128xf32>, vector<128x128xf32>, vector<8x128xf32> -> vector<8x128xf32>
    %533 = vector.broadcast %322 : vector<1x128xf32> to vector<8x128xf32>
    %534 = arith.addf %532, %533 : vector<8x128xf32>
    %535 = vector.extract_strided_slice %512 {offsets = [0, 256], sizes = [8, 128], strides = [1, 1]} : vector<8x384xf32> to vector<8x128xf32>
    %536 = arith.mulf %523, %534 : vector<8x128xf32>
    %537 = arith.addf %535, %536 : vector<8x128xf32>
    %538 = math.tanh %537 : vector<8x128xf32>
    %cst_156 = arith.constant 1.000000e+00 : f32
    %539 = vector.broadcast %cst_156 : f32 to vector<8x128xf32>
    %540 = arith.subf %539, %531 : vector<8x128xf32>
    %541 = arith.mulf %540, %538 : vector<8x128xf32>
    %542 = arith.mulf %531, %506 : vector<8x128xf32>
    %543 = arith.addf %541, %542 : vector<8x128xf32>
    %544 = arith.index_cast %510 : i32 to index
    %c0_157 = arith.constant 0 : index
    %545 = vector.load %arg20[%544, %c0_157] : memref<64x128xf32, #tpu.memory_space<vmem>>, vector<8x128xf32>
    tpu.vector_store %arg20[%544, %c0_157], %543 {strides = array<i32>} : memref<64x128xf32, #tpu.memory_space<vmem>>, vector<8x128xf32>,
    %c6_i32_158 = arith.constant 6 : i32
    %c8_i32_159 = arith.constant 8 : i32
    %546 = arith.muli %c6_i32_158, %c8_i32_159 : i32
    %547 = tpu.assume_multiple %546, 8 : i32
    %548 = arith.index_cast %547 : i32 to index
    %c0_160 = arith.constant 0 : index
    %549 = vector.load %arg18[%548, %c0_160] : memref<64x384xf32, #tpu.memory_space<vmem>>, vector<8x384xf32>
    %cst_161 = arith.constant dense<0.000000e+00> : vector<8x256xf32>
    %550 = tpu.matmul %543, %319, %cst_161 {dimension_numbers = #tpu.dot_dimension_numbers<[1], [0], [0], [1], [0, 0, 1, 1], [], []>} : vector<8x128xf32>, vector<128x256xf32>, vector<8x256xf32> -> vector<8x256xf32>
    %551 = vector.broadcast %321 : vector<1x256xf32> to vector<8x256xf32>
    %552 = arith.addf %550, %551 : vector<8x256xf32>
    %553 = vector.extract_strided_slice %549 {offsets = [0, 0], sizes = [8, 128], strides = [1, 1]} : vector<8x384xf32> to vector<8x128xf32>
    %554 = vector.extract_strided_slice %552 {offsets = [0, 0], sizes = [8, 128], strides = [1, 1]} : vector<8x256xf32> to vector<8x128xf32>
    %555 = arith.addf %553, %554 : vector<8x128xf32>
    %556 = arith.negf %555 : vector<8x128xf32>
    %557 = math.exp %556 : vector<8x128xf32>
    %cst_162 = arith.constant 1.000000e+00 : f32
    %558 = vector.broadcast %cst_162 : f32 to vector<8x128xf32>
    %559 = arith.addf %558, %557 : vector<8x128xf32>
    %560 = arith.divf %558, %559 : vector<8x128xf32>
    %561 = vector.extract_strided_slice %549 {offsets = [0, 128], sizes = [8, 128], strides = [1, 1]} : vector<8x384xf32> to vector<8x128xf32>
    %562 = vector.extract_strided_slice %552 {offsets = [0, 128], sizes = [8, 128], strides = [1, 1]} : vector<8x256xf32> to vector<8x128xf32>
    %563 = arith.addf %561, %562 : vector<8x128xf32>
    %564 = arith.negf %563 : vector<8x128xf32>
    %565 = math.exp %564 : vector<8x128xf32>
    %cst_163 = arith.constant 1.000000e+00 : f32
    %566 = vector.broadcast %cst_163 : f32 to vector<8x128xf32>
    %567 = arith.addf %566, %565 : vector<8x128xf32>
    %568 = arith.divf %566, %567 : vector<8x128xf32>
    %cst_164 = arith.constant dense<0.000000e+00> : vector<8x128xf32>
    %569 = tpu.matmul %543, %320, %cst_164 {dimension_numbers = #tpu.dot_dimension_numbers<[1], [0], [0], [1], [0, 0, 1, 1], [], []>} : vector<8x128xf32>, vector<128x128xf32>, vector<8x128xf32> -> vector<8x128xf32>
    %570 = vector.broadcast %322 : vector<1x128xf32> to vector<8x128xf32>
    %571 = arith.addf %569, %570 : vector<8x128xf32>
    %572 = vector.extract_strided_slice %549 {offsets = [0, 256], sizes = [8, 128], strides = [1, 1]} : vector<8x384xf32> to vector<8x128xf32>
    %573 = arith.mulf %560, %571 : vector<8x128xf32>
    %574 = arith.addf %572, %573 : vector<8x128xf32>
    %575 = math.tanh %574 : vector<8x128xf32>
    %cst_165 = arith.constant 1.000000e+00 : f32
    %576 = vector.broadcast %cst_165 : f32 to vector<8x128xf32>
    %577 = arith.subf %576, %568 : vector<8x128xf32>
    %578 = arith.mulf %577, %575 : vector<8x128xf32>
    %579 = arith.mulf %568, %543 : vector<8x128xf32>
    %580 = arith.addf %578, %579 : vector<8x128xf32>
    %581 = arith.index_cast %547 : i32 to index
    %c0_166 = arith.constant 0 : index
    %582 = vector.load %arg20[%581, %c0_166] : memref<64x128xf32, #tpu.memory_space<vmem>>, vector<8x128xf32>
    tpu.vector_store %arg20[%581, %c0_166], %580 {strides = array<i32>} : memref<64x128xf32, #tpu.memory_space<vmem>>, vector<8x128xf32>,
    %c7_i32_167 = arith.constant 7 : i32
    %c8_i32_168 = arith.constant 8 : i32
    %583 = arith.muli %c7_i32_167, %c8_i32_168 : i32
    %584 = tpu.assume_multiple %583, 8 : i32
    %585 = arith.index_cast %584 : i32 to index
    %c0_169 = arith.constant 0 : index
    %586 = vector.load %arg18[%585, %c0_169] : memref<64x384xf32, #tpu.memory_space<vmem>>, vector<8x384xf32>
    %cst_170 = arith.constant dense<0.000000e+00> : vector<8x256xf32>
    %587 = tpu.matmul %580, %319, %cst_170 {dimension_numbers = #tpu.dot_dimension_numbers<[1], [0], [0], [1], [0, 0, 1, 1], [], []>} : vector<8x128xf32>, vector<128x256xf32>, vector<8x256xf32> -> vector<8x256xf32>
    %588 = vector.broadcast %321 : vector<1x256xf32> to vector<8x256xf32>
    %589 = arith.addf %587, %588 : vector<8x256xf32>
    %590 = vector.extract_strided_slice %586 {offsets = [0, 0], sizes = [8, 128], strides = [1, 1]} : vector<8x384xf32> to vector<8x128xf32>
    %591 = vector.extract_strided_slice %589 {offsets = [0, 0], sizes = [8, 128], strides = [1, 1]} : vector<8x256xf32> to vector<8x128xf32>
    %592 = arith.addf %590, %591 : vector<8x128xf32>
    %593 = arith.negf %592 : vector<8x128xf32>
    %594 = math.exp %593 : vector<8x128xf32>
    %cst_171 = arith.constant 1.000000e+00 : f32
    %595 = vector.broadcast %cst_171 : f32 to vector<8x128xf32>
    %596 = arith.addf %595, %594 : vector<8x128xf32>
    %597 = arith.divf %595, %596 : vector<8x128xf32>
    %598 = vector.extract_strided_slice %586 {offsets = [0, 128], sizes = [8, 128], strides = [1, 1]} : vector<8x384xf32> to vector<8x128xf32>
    %599 = vector.extract_strided_slice %589 {offsets = [0, 128], sizes = [8, 128], strides = [1, 1]} : vector<8x256xf32> to vector<8x128xf32>
    %600 = arith.addf %598, %599 : vector<8x128xf32>
    %601 = arith.negf %600 : vector<8x128xf32>
    %602 = math.exp %601 : vector<8x128xf32>
    %cst_172 = arith.constant 1.000000e+00 : f32
    %603 = vector.broadcast %cst_172 : f32 to vector<8x128xf32>
    %604 = arith.addf %603, %602 : vector<8x128xf32>
    %605 = arith.divf %603, %604 : vector<8x128xf32>
    %cst_173 = arith.constant dense<0.000000e+00> : vector<8x128xf32>
    %606 = tpu.matmul %580, %320, %cst_173 {dimension_numbers = #tpu.dot_dimension_numbers<[1], [0], [0], [1], [0, 0, 1, 1], [], []>} : vector<8x128xf32>, vector<128x128xf32>, vector<8x128xf32> -> vector<8x128xf32>
    %607 = vector.broadcast %322 : vector<1x128xf32> to vector<8x128xf32>
    %608 = arith.addf %606, %607 : vector<8x128xf32>
    %609 = vector.extract_strided_slice %586 {offsets = [0, 256], sizes = [8, 128], strides = [1, 1]} : vector<8x384xf32> to vector<8x128xf32>
    %610 = arith.mulf %597, %608 : vector<8x128xf32>
    %611 = arith.addf %609, %610 : vector<8x128xf32>
    %612 = math.tanh %611 : vector<8x128xf32>
    %cst_174 = arith.constant 1.000000e+00 : f32
    %613 = vector.broadcast %cst_174 : f32 to vector<8x128xf32>
    %614 = arith.subf %613, %605 : vector<8x128xf32>
    %615 = arith.mulf %614, %612 : vector<8x128xf32>
    %616 = arith.mulf %605, %580 : vector<8x128xf32>
    %617 = arith.addf %615, %616 : vector<8x128xf32>
    %618 = arith.index_cast %584 : i32 to index
    %c0_175 = arith.constant 0 : index
    %619 = vector.load %arg20[%618, %c0_175] : memref<64x128xf32, #tpu.memory_space<vmem>>, vector<8x128xf32>
    tpu.vector_store %arg20[%618, %c0_175], %617 {strides = array<i32>} : memref<64x128xf32, #tpu.memory_space<vmem>>, vector<8x128xf32>,
    %c8_i32_176 = arith.constant 8 : i32
    %c0_177 = arith.constant 0 : index
    %c0_178 = arith.constant 0 : index
    %620 = vector.load %arg22[%c0_177, %c0_178] : memref<8x128xf32, #tpu.memory_space<vmem>>, vector<8x128xf32>
    tpu.vector_store %arg22[%c0_177, %c0_178], %617 {strides = array<i32>} : memref<8x128xf32, #tpu.memory_space<vmem>>, vector<8x128xf32>,
    %c0_179 = arith.constant 0 : index
    %c0_180 = arith.constant 0 : index
    %621 = vector.load %arg20[%c0_179, %c0_180] : memref<64x128xf32, #tpu.memory_space<vmem>>, vector<64x128xf32>
    %c0_181 = arith.constant 0 : index
    %c0_182 = arith.constant 0 : index
    %622 = vector.load %arg15[%c0_181, %c0_182] : memref<1x128xf32, #tpu.memory_space<vmem>>, vector<1x128xf32>
    %623 = vector.broadcast %622 : vector<1x128xf32> to vector<64x128xf32>
    %624 = arith.mulf %621, %623 : vector<64x128xf32>
    %cst_183 = arith.constant dense<0.000000e+00> : vector<64xf32>
    %625 = vector.multi_reduction <add>, %624, %cst_183 [1] : vector<64x128xf32> to vector<64xf32>
    %626 = vector.shape_cast %625 : vector<64xf32> to vector<64x1xf32>
    %c0_184 = arith.constant 0 : index
    %c0_185 = arith.constant 0 : index
    %627 = vector.load %arg16[%c0_184, %c0_185] : memref<1x1xf32, #tpu.memory_space<vmem>>, vector<1x1xf32>
    %628 = vector.broadcast %627 : vector<1x1xf32> to vector<64x1xf32>
    %629 = arith.addf %626, %628 : vector<64x1xf32>
    %c0_186 = arith.constant 0 : index
    %c0_187 = arith.constant 0 : index
    %630 = vector.load %arg17[%c0_186, %c0_187] : memref<64x1xf32, #tpu.memory_space<vmem>>, vector<64x1xf32>
    tpu.vector_store %arg17[%c0_186, %c0_187], %629 {strides = array<i32>} : memref<64x1xf32, #tpu.memory_space<vmem>>, vector<64x1xf32>,
    return
  }
  func.func @transform_0(%arg0: i32) -> (i32, i32) {
    %c0_i32 = arith.constant 0 : i32
    %c0_i32_0 = arith.constant 0 : i32
    return %arg0, %c0_i32 : i32, i32
  }
  func.func @transform_1(%arg0: i32) -> (i32, i32, i32) {
    %c0_i32 = arith.constant 0 : i32
    %c0_i32_0 = arith.constant 0 : i32
    %c0_i32_1 = arith.constant 0 : i32
    %c0_i32_2 = arith.constant 0 : i32
    return %c0_i32, %c0_i32_0, %c0_i32_1 : i32, i32, i32
  }
  func.func @transform_2(%arg0: i32) -> (i32, i32) {
    %c0_i32 = arith.constant 0 : i32
    %c0_i32_0 = arith.constant 0 : i32
    %c0_i32_1 = arith.constant 0 : i32
    return %c0_i32, %c0_i32_0 : i32, i32
  }
  func.func @transform_3(%arg0: i32) -> (i32, i32) {
    %c0_i32 = arith.constant 0 : i32
    %c0_i32_0 = arith.constant 0 : i32
    %c0_i32_1 = arith.constant 0 : i32
    return %c0_i32, %c0_i32_0 : i32, i32
  }
  func.func @transform_4(%arg0: i32) -> (i32, i32) {
    %c0_i32 = arith.constant 0 : i32
    %c0_i32_0 = arith.constant 0 : i32
    %c0_i32_1 = arith.constant 0 : i32
    return %c0_i32, %c0_i32_0 : i32, i32
  }
  func.func @transform_5(%arg0: i32) -> (i32, i32) {
    %c0_i32 = arith.constant 0 : i32
    %c0_i32_0 = arith.constant 0 : i32
    %c0_i32_1 = arith.constant 0 : i32
    return %c0_i32, %c0_i32_0 : i32, i32
  }
  func.func @transform_6(%arg0: i32) -> (i32, i32) {
    %c0_i32 = arith.constant 0 : i32
    %c0_i32_0 = arith.constant 0 : i32
    %c0_i32_1 = arith.constant 0 : i32
    return %c0_i32, %c0_i32_0 : i32, i32
  }
  func.func @transform_7(%arg0: i32) -> (i32, i32) {
    %c0_i32 = arith.constant 0 : i32
    %c0_i32_0 = arith.constant 0 : i32
    %c0_i32_1 = arith.constant 0 : i32
    return %c0_i32, %c0_i32_0 : i32, i32
  }
  func.func @transform_8(%arg0: i32) -> (i32, i32) {
    %c0_i32 = arith.constant 0 : i32
    %c0_i32_0 = arith.constant 0 : i32
    %c0_i32_1 = arith.constant 0 : i32
    return %c0_i32, %c0_i32_0 : i32, i32
  }
  func.func @transform_9(%arg0: i32) -> (i32, i32) {
    %c0_i32 = arith.constant 0 : i32
    %c0_i32_0 = arith.constant 0 : i32
    %c0_i32_1 = arith.constant 0 : i32
    return %c0_i32, %c0_i32_0 : i32, i32
  }
  func.func @transform_10(%arg0: i32) -> (i32, i32) {
    %c0_i32 = arith.constant 0 : i32
    %c0_i32_0 = arith.constant 0 : i32
    %c0_i32_1 = arith.constant 0 : i32
    return %c0_i32, %c0_i32_0 : i32, i32
  }
  func.func @transform_11(%arg0: i32) -> (i32, i32) {
    %c0_i32 = arith.constant 0 : i32
    %c0_i32_0 = arith.constant 0 : i32
    %c0_i32_1 = arith.constant 0 : i32
    return %c0_i32, %c0_i32_0 : i32, i32
  }
  func.func @transform_12(%arg0: i32) -> (i32, i32) {
    %c0_i32 = arith.constant 0 : i32
    %c0_i32_0 = arith.constant 0 : i32
    %c0_i32_1 = arith.constant 0 : i32
    return %c0_i32, %c0_i32_0 : i32, i32
  }
  func.func @transform_13(%arg0: i32) -> (i32, i32) {
    %c0_i32 = arith.constant 0 : i32
    %c0_i32_0 = arith.constant 0 : i32
    %c0_i32_1 = arith.constant 0 : i32
    return %c0_i32, %c0_i32_0 : i32, i32
  }
  func.func @transform_14(%arg0: i32) -> (i32, i32) {
    %c0_i32 = arith.constant 0 : i32
    %c0_i32_0 = arith.constant 0 : i32
    %c0_i32_1 = arith.constant 0 : i32
    return %c0_i32, %c0_i32_0 : i32, i32
  }
  func.func @transform_15(%arg0: i32) -> (i32, i32) {
    %c0_i32 = arith.constant 0 : i32
    %c0_i32_0 = arith.constant 0 : i32
    %c0_i32_1 = arith.constant 0 : i32
    return %c0_i32, %c0_i32_0 : i32, i32
  }
  func.func @transform_16(%arg0: i32) -> (i32, i32) {
    %c0_i32 = arith.constant 0 : i32
    %c0_i32_0 = arith.constant 0 : i32
    return %arg0, %c0_i32 : i32, i32
  }
}

</mosaic_0001>

<bundles_post_ra>
// kernel: gru_critic_forward.1
= control target key start
LH: loop header
LB: loop body
LE: loop exit
PB: predicated region body
PF: predicated region fallthrough
CT: control target
= control target key end

     0   :  { %vm111_vm0 = vcmask 1043456   ;;  %vm86_vm1 = vcmask 97280   ;;  %s5303_s2 = inlined_call_operand.vmem [shape: f32[12,384], index: 2, kind: input, shape index: {}]   ;;  %s5304_s4 = inlined_call_operand.vmem [shape: f32[128,256], index: 4, kind: input, shape index: {}]   ;;  %s5305_s0 = inlined_call_operand.vmem [shape: f32[64,12], index: 0, kind: input, shape index: {}]   ;;  %s5306_s5 = inlined_call_operand.vmem [shape: f32[128,128], index: 5, kind: input, shape index: {}]   ;;  %s5307_s1 = inlined_call_operand.vmem [shape: f32[2,8,128], index: 1, kind: input, shape index: {}]   ;;  %s5308_s7 = inlined_call_operand.vmem [shape: f32[1,128], index: 7, kind: input, shape index: {}]   ;;  %s5309_s3 = inlined_call_operand.vmem [shape: f32[1,384], index: 3, kind: input, shape index: {}]   ;;  %s5310_s6 = inlined_call_operand.vmem [shape: f32[1,256], index: 6, kind: input, shape index: {}]   ;;  %s5311_s8 = inlined_call_operand.vmem [shape: f32[128,384], index: 8, kind: input, shape index: {}]   ;;  %s5312_s10 = inlined_call_operand.vmem [shape: f32[128,256], index: 10, kind: input, shape index: {}]   ;;  %s5313_s11 = inlined_call_operand.vmem [shape: f32[128,128], index: 11, kind: input, shape index: {}]   ;;  %s5314_s13 = inlined_call_operand.vmem [shape: f32[1,128], index: 13, kind: input, shape index: {}]   ;;  %s5315_s14 = inlined_call_operand.vmem [shape: f32[1,128], index: 14, kind: input, shape index: {}]   ;;  %s5316_s12 = inlined_call_operand.vmem [shape: f32[1,256], index: 12, kind: input, shape index: {}]   ;;  %s5317_s9 = inlined_call_operand.vmem [shape: f32[1,384], index: 9, kind: input, shape index: {}]   ;;  %s5318_s15 = inlined_call_operand.<no memory space> [shape: f32[1,1], index: 15, kind: input, shape index: {}]   ;;  %s5319_s16 = inlined_call_operand.vmem [shape: f32[64,1], index: 16, kind: output, shape index: {}]  }
   0x1   :  { %5367 = sst [smem:[#allocation41_spill]] %s5303_s2  ;;  %v2896_v1 = vld [vmem:[%s5304_s4 + $0xf0] sm:$0xff]  ;;  %v2906_v3 = vld [vmem:[%s5304_s4 + $0xe0] sm:$0xff]  ;;  %v2935_v8 = vld [vmem:[%s5306_s5 + $0x78] sm:$0xff] }
   0x2   :  { %s5368_s23 = sld [smem:[#allocation41_spill]]  ;;  %330 = vmatpush.msra.mxu3 %v2896_v1  ;;  %v2911_v4 = vld [vmem:[%s5305_s0] sm:$0xff]  ;;  %v2916_v5 = vld [vmem:[%s5304_s4 + $0xd0] sm:$0xff]  ;;  %v2953_v11 = vld [vmem:[%s5305_s0 + $0x8] sm:$0xff] }
   0x3   :  { %v2924_v6 = vld [vmem:[%s5304_s4 + $0xc0] sm:$0xff]  ;;  %v2930_v7 = vld [vmem:[%s5304_s4 + $0xb0] sm:$0xff]  ;;  %v2959_v12 = vld [vmem:[%s5306_s5 + $0x68] sm:$0xff] }
   0x4   :  { %331 = vmatpush.msra.mxu3 %v2906_v3  ;;  %v2942_v9 = vld [vmem:[%s5306_s5 + $0x70] sm:$0xff]  ;;  %v2947_v10 = vld [vmem:[%s5304_s4 + $0xa0] sm:$0xff]  ;;  %v2983_v16 = vld [vmem:[%s5306_s5 + $0x58] sm:$0xff] }
   0x5   :  { %v2964_v13 = vld [vmem:[%s5304_s4 + $0x90] sm:$0xff]  ;;  %v2969_v14 = vld [vmem:[%s5306_s5 + $0x60] sm:$0xff]  ;;  %v3014_v21 = vld [vmem:[%s5306_s5 + $0x48] sm:$0xff] }
   0x6   :  { %332 = vmatpush.msra.mxu3 %v2916_v5  ;;  %v2978_v15 = vld [vmem:[%s5304_s4 + $0x80] sm:$0xff]  ;;  %v2990_v17 = vld [vmem:[%s5304_s4 + $0x70] sm:$0xff]  ;;  %v3040_v25 = vld [vmem:[%s5306_s5 + $0x38] sm:$0xff] }
   0x7   :  { %v2997_v18 = vld [vmem:[%s5306_s5 + $0x50] sm:$0xff]  ;;  %v3002_v19 = vld [vmem:[%s5304_s4 + $0x60] sm:$0xff]  ;;  %v3063_v29 = vld [vmem:[%s5305_s0 + $0x18] sm:$0xff] }
   0x8   :  { %v75_v0 = vld [vmem:[%s5368_s23 + $0x18] sm:$0xf]  ;;  %v72_v2 = vld [vmem:[%s5368_s23] sm:$0xff]  ;;  %333 = vmatpush.msra.mxu3 %v2924_v6  ;;  %v3008_v20 = vld [vmem:[%s5305_s0 + $0x10] sm:$0xff] }
   0x9   :  { %2482 = vmatpush.msk.msra.mxu0 %vm111_vm0, %v75_v0  ;;  %v3019_v22 = vld [vmem:[%s5304_s4 + $0x50] sm:$0xff]  ;;  %v3026_v23 = vld [vmem:[%s5306_s5 + $0x40] sm:$0xff]  ;;  %v3069_v30 = vld [vmem:[%s5306_s5 + $0x28] sm:$0xff] }
   0xa   :  { %334 = vmatpush.msra.mxu3 %v2930_v7  ;;  %v3033_v24 = vld [vmem:[%s5304_s4 + $0x40] sm:$0xff]  ;;  %v3045_v26 = vld [vmem:[%s5304_s4 + $0x30] sm:$0xff]  ;;  %v77_v35 = vld [vmem:[%s5368_s23 + $0x28] sm:$0xf] }
   0xb   :  { %136 = vmatpush.msra.mxu0 %v72_v2  ;;  %v3052_v27 = vld [vmem:[%s5306_s5 + $0x30] sm:$0xff]  ;;  %v3057_v28 = vld [vmem:[%s5304_s4 + $0x20] sm:$0xff]  ;;  %v3103_v36 = vld [vmem:[%s5306_s5 + $0x18] sm:$0xff]  ;;  %2500 = vmatpush.msk.msra.mxu2 %vm111_vm0, %v77_v35 }
   0xc   :  { %2483 = vmatmul.msk.f32.vlgmr.msra.gmra.mxu0 %vm86_vm1, %v2911_v4  ;;  %335 = vmatpush.msra.mxu3 %v2947_v10  ;;  %5369 = vst [vmem:[#allocation8_spill] sm:$0xff] %v3057_v28  ;;  %v3074_v31 = vld [vmem:[%s5304_s4 + $0x10] sm:$0xff]  ;;  %v3081_v32 = vld [vmem:[%s5306_s5 + $0x20] sm:$0xff]  ;;  %v3108_v37 = vld [vmem:[%s5304_s4 + $0xf8] sm:$0xff] }
   0xd   :  { %413 = vmatpush.msrb.mxu0 %v2935_v8  ;;  %5370 = vst [vmem:[#allocation9_spill] sm:$0xff] %v3074_v31  ;;  %v3088_v33 = vld [vmem:[%s5304_s4] sm:$0xff]  ;;  %v74_v38 = vld [vmem:[%s5368_s23 + $0x10] sm:$0xff]  ;;  %v3125_v40 = vld [vmem:[%s5304_s4 + $0xe8] sm:$0xff] }
   0xe   :  { %336 = vmatpush.msra.mxu3 %v2964_v13  ;;  %5371 = vst [vmem:[#allocation10_spill] sm:$0xff] %v3088_v33  ;;  %v3094_v34 = vld [vmem:[%s5307_s1] sm:$0xff]  ;;  %v3119_v39 = vld [vmem:[%s5306_s5 + $0x10] sm:$0xff]  ;;  %218 = vmatpush.msra.mxu2 %v74_v38  ;;  %v3130_v41 = vld [vmem:[%s5306_s5 + $0x8] sm:$0xff] }
   0xf   :  { %414 = vmatpush.msrb.mxu0 %v2942_v9  ;;  %5372 = vst [vmem:[#allocation11_spill] sm:$0xff] %v3119_v39  ;;  %v76_v42 = vld [vmem:[%s5368_s23 + $0x20] sm:$0xf]  ;;  %v73_v44 = vld [vmem:[%s5368_s23 + $0x8] sm:$0xff]  ;;  %v3148_v45 = vld [vmem:[%s5304_s4 + $0xd8] sm:$0xff]  ;;  %2501 = vmatmul.msk.f32.vlgmr.msra.gmra.mxu2 %vm86_vm1, %v2911_v4 }
  0x10   :  { %337 = vmatpush.msra.mxu3 %v2978_v15  ;;  %5373 = vst [vmem:[#allocation12_spill] sm:$0xff] %v3130_v41  ;;  %v3139_v43 = vld [vmem:[%s5305_s0 + $0x20] sm:$0xff]  ;;  %2491 = vmatpush.msk.msra.mxu1 %vm111_vm0, %v76_v42  ;;  %v3165_v47 = vld [vmem:[%s5304_s4 + $0xc8] sm:$0xff]  ;;  %v3172_v48 = vld [vmem:[%s5304_s4 + $0xb8] sm:$0xff] }
  0x11   :  { %415 = vmatpush.msrb.mxu0 %v2959_v12  ;;  %v3156_v46 = vld [vmem:[%s5306_s5] sm:$0xff]  ;;  %467 = vmatpush.msrb.mxu2 %v3108_v37  ;;  %v3182_v49 = vld [vmem:[%s5304_s4 + $0xa8] sm:$0xff]  ;;  %v3196_v51 = vld [vmem:[%s5304_s4 + $0x98] sm:$0xff] }
  0x12   :  { %338 = vmatpush.msra.mxu3 %v2990_v17  ;;  %5374 = vst [vmem:[#allocation13_spill] sm:$0xff] %v3156_v46  ;;  %177 = vmatpush.msra.mxu1 %v73_v44  ;;  %v3190_v50 = vld [vmem:[%s5305_s0 + $0x28] sm:$0xff]  ;;  %v3216_v53 = vld [vmem:[%s5304_s4 + $0x78] sm:$0xff]  ;;  %v3234_v55 = vld [vmem:[%s5305_s0 + $0x30] sm:$0xff] }
  0x13   :  { %416 = vmatpush.msrb.mxu0 %v2969_v14  ;;  %2492 = vmatmul.msk.f32.vlgmr.msra.gmra.mxu1 %vm86_vm1, %v2911_v4  ;;  %v3208_v52 = vld [vmem:[%s5304_s4 + $0x88] sm:$0xff]  ;;  %v3240_v56 = vld [vmem:[%s5304_s4 + $0x58] sm:$0xff]  ;;  %v78_v4 = vld [vmem:[%s5309_s3] sm:$0x7] }
  0x14   :  { %2484 = vmatmul.msk.f32.gmra.mxu0 %vm86_vm1, %v2953_v11  ;;  %339 = vmatpush.msra.mxu3 %v3002_v19  ;;  %v3226_v54 = vld [vmem:[%s5304_s4 + $0x68] sm:$0xff]  ;;  %v3260_v58 = vld [vmem:[%s5304_s4 + $0x38] sm:$0xff]  ;;  %v316_v35 = vld [vmem:[%s5310_s6] sm:$0x3] }
  0x15   :  { %417 = vmatpush.msrb.mxu0 %v2983_v16  ;;  %447 = vmatpush.msrb.mxu1 %v2896_v1  ;;  %v3252_v57 = vld [vmem:[%s5304_s4 + $0x48] sm:$0xff]  ;;  %5375 = vst [vmem:[#allocation14_spill] sm:$0xff] %v3260_v58  ;;  %v3278_v60 = vld [vmem:[%s5305_s0 + $0x38] sm:$0xff]  ;;  %v3438_v38 = vperm.slane %v316_v35, 0 }
  0x16   :  { %340 = vmatpush.msra.mxu3 %v3019_v22  ;;  %468 = vmatpush.msrb.mxu2 %v3125_v40  ;;  %v3270_v59 = vld [vmem:[%s5304_s4 + $0x28] sm:$0xff]  ;;  %v3284_v61 = vld [vmem:[%s5304_s4 + $0x18] sm:$0xff] }
  0x17   :  { %418 = vmatpush.msrb.mxu0 %v2997_v18  ;;  %448 = vmatpush.msrb.mxu1 %v2906_v3  ;;  %5376 = vst [vmem:[#allocation15_spill] sm:$0xff] %v3270_v59  ;;  %v3296_v62 = vld [vmem:[%s5304_s4 + $0x8] sm:$0xff] }
  0x18   :  { %341 = vmatpush.msra.mxu3 %v3033_v24  ;;  %2502 = vmatmul.msk.f32.gmra.mxu2 %vm86_vm1, %v2953_v11  ;;  %5377 = vst [vmem:[#allocation16_spill] sm:$0xff] %v3284_v61 }
  0x19   :  { %419 = vmatpush.msrb.mxu0 %v3014_v21  ;;  %449 = vmatpush.msrb.mxu1 %v2916_v5  ;;  %5378 = vst [vmem:[#allocation17_spill] sm:$0xff] %v3296_v62 }
  0x1a   :  { %342 = vmatpush.msra.mxu3 %v3045_v26  ;;  %469 = vmatpush.msrb.mxu2 %v3148_v45  ;;  %5383 = vst [vmem:[#allocation22_spill] sm:$0xff] %v3438_v38 }
  0x1b   :  { %420 = vmatpush.msrb.mxu0 %v3026_v23  ;;  %450 = vmatpush.msrb.mxu1 %v2924_v6 }
  0x1c   :  { %2485 = vmatmul.msk.f32.gmra.mxu0 %vm86_vm1, %v3008_v20  ;;  %343 = vmatpush.msra.mxu3 %v3057_v28 }
  0x1d   :  { %421 = vmatpush.msrb.mxu0 %v3040_v25  ;;  %2493 = vmatmul.msk.f32.gmra.mxu1 %vm86_vm1, %v2953_v11  ;;  %v3430_v11 = vperm.slane %v78_v4, 0 }
  0x1e   :  { %344 = vmatpush.msra.mxu3 %v3074_v31  ;;  %470 = vmatpush.msrb.mxu2 %v3165_v47 }
  0x1f   :  { %422 = vmatpush.msrb.mxu0 %v3052_v27  ;;  %451 = vmatpush.msrb.mxu1 %v2930_v7  ;;  %5381 = vst [vmem:[#allocation20_spill] sm:$0xff] %v3430_v11 }
  0x20   :  { %345 = vmatpush.msra.mxu3 %v3088_v33  ;;  %471 = vmatpush.msrb.mxu2 %v3172_v48 }
  0x21   :  { %423 = vmatpush.msrb.mxu0 %v3069_v30  ;;  %346 = vmatmul.f32.vlgmr.msra.gmra.mxu3 %v3094_v34 }
  0x22   :  { %350 = vmatpush.msrb.mxu3 %v3108_v37  ;;  %452 = vmatpush.msrb.mxu1 %v2947_v10 }
  0x23   :  { %424 = vmatpush.msrb.mxu0 %v3081_v32  ;;  %2503 = vmatmul.msk.f32.gmra.mxu2 %vm86_vm1, %v3008_v20 }
  0x24   :  { %2486 = vmatmul.msk.f32.gmra.mxu0 %vm86_vm1, %v3063_v29  ;;  %351 = vmatpush.msrb.mxu3 %v3125_v40 }
  0x25   :  { %425 = vmatpush.msrb.mxu0 %v3103_v36  ;;  %472 = vmatpush.msrb.mxu2 %v3182_v49 }
  0x26   :  { %352 = vmatpush.msrb.mxu3 %v3148_v45  ;;  %453 = vmatpush.msrb.mxu1 %v2964_v13 }
  0x27   :  { %426 = vmatpush.msrb.mxu0 %v3119_v39  ;;  %473 = vmatpush.msrb.mxu2 %v3196_v51 }
  0x28   :  { %353 = vmatpush.msrb.mxu3 %v3165_v47  ;;  %2494 = vmatmul.msk.f32.gmra.mxu1 %vm86_vm1, %v3008_v20 }
  0x29   :  { %427 = vmatpush.msrb.mxu0 %v3130_v41  ;;  %454 = vmatpush.msrb.mxu1 %v2978_v15 }
  0x2a   :  { %354 = vmatpush.msrb.mxu3 %v3172_v48  ;;  %474 = vmatpush.msrb.mxu2 %v3208_v52 }
  0x2b   :  { %428 = vmatpush.msrb.mxu0 %v3156_v46  ;;  %455 = vmatpush.msrb.mxu1 %v2990_v17 }
  0x2c   :  { %2487 = vmatmul.msk.f32.gmra.mxu0 %vm86_vm1, %v3139_v43  ;;  %355 = vmatpush.msrb.mxu3 %v3182_v49 }
  0x2d   :  { %562 = vmatpush.msra.mxu0 %v2896_v1  ;;  %2504 = vmatmul.msk.f32.gmra.mxu2 %vm86_vm1, %v3063_v29 }
  0x2e   :  { %356 = vmatpush.msrb.mxu3 %v3196_v51  ;;  %475 = vmatpush.msrb.mxu2 %v3216_v53 }
  0x2f   :  { %563 = vmatpush.msra.mxu0 %v2906_v3  ;;  %456 = vmatpush.msrb.mxu1 %v3002_v19 }
  0x30   :  { %357 = vmatpush.msrb.mxu3 %v3208_v52  ;;  %476 = vmatpush.msrb.mxu2 %v3226_v54 }
  0x31   :  { %564 = vmatpush.msra.mxu0 %v2916_v5  ;;  %2495 = vmatmul.msk.f32.gmra.mxu1 %vm86_vm1, %v3063_v29 }
  0x32   :  { %358 = vmatpush.msrb.mxu3 %v3216_v53  ;;  %457 = vmatpush.msrb.mxu1 %v3019_v22 }
  0x33   :  { %565 = vmatpush.msra.mxu0 %v2924_v6  ;;  %477 = vmatpush.msrb.mxu2 %v3240_v56 }
  0x34   :  { %2488 = vmatmul.msk.f32.gmra.mxu0 %vm86_vm1, %v3190_v50  ;;  %359 = vmatpush.msrb.mxu3 %v3226_v54 }
  0x35   :  { %566 = vmatpush.msra.mxu0 %v2930_v7  ;;  %458 = vmatpush.msrb.mxu1 %v3033_v24 }
  0x36   :  { %360 = vmatpush.msrb.mxu3 %v3240_v56  ;;  %2505 = vmatmul.msk.f32.gmra.mxu2 %vm86_vm1, %v3139_v43 }
  0x37   :  { %567 = vmatpush.msra.mxu0 %v2947_v10  ;;  %478 = vmatpush.msrb.mxu2 %v3252_v57 }
  0x38   :  { %361 = vmatpush.msrb.mxu3 %v3252_v57  ;;  %459 = vmatpush.msrb.mxu1 %v3045_v26 }
  0x39   :  { %568 = vmatpush.msra.mxu0 %v2964_v13  ;;  %479 = vmatpush.msrb.mxu2 %v3260_v58 }
  0x3a   :  { %362 = vmatpush.msrb.mxu3 %v3260_v58  ;;  %2496 = vmatmul.msk.f32.gmra.mxu1 %vm86_vm1, %v3139_v43 }
  0x3b   :  { %569 = vmatpush.msra.mxu0 %v2978_v15  ;;  %460 = vmatpush.msrb.mxu1 %v3057_v28 }
  0x3c   :  { %2489 = vmatmul.msk.f32.gmra.mxu0 %vm86_vm1, %v3234_v55  ;;  %363 = vmatpush.msrb.mxu3 %v3270_v59 }
  0x3d   :  { %570 = vmatpush.msra.mxu0 %v2990_v17  ;;  %480 = vmatpush.msrb.mxu2 %v3270_v59 }
  0x3e   :  { %364 = vmatpush.msrb.mxu3 %v3284_v61  ;;  %461 = vmatpush.msrb.mxu1 %v3074_v31 }
  0x3f   :  { %571 = vmatpush.msra.mxu0 %v3002_v19  ;;  %2506 = vmatmul.msk.f32.gmra.mxu2 %vm86_vm1, %v3190_v50 }
  0x40   :  { %365 = vmatpush.msrb.mxu3 %v3296_v62  ;;  %481 = vmatpush.msrb.mxu2 %v3284_v61 }
  0x41   :  { %366 = vmatmul.f32.vlgmr.msrb.gmra.mxu3 %v3094_v34  ;;  %572 = vmatpush.msra.mxu0 %v3019_v22 }
  0x42   :  { %527 = vmatpush.msra.mxu3 %v2935_v8  ;;  %462 = vmatpush.msrb.mxu1 %v3088_v33 }
  0x43   :  { %573 = vmatpush.msra.mxu0 %v3033_v24  ;;  %482 = vmatpush.msrb.mxu2 %v3296_v62 }
  0x44   :  { %2490 = vmatmul.msk.f32.gmra.mxu0 %vm86_vm1, %v3278_v60  ;;  %528 = vmatpush.msra.mxu3 %v2942_v9 }
  0x45   :  { %574 = vmatpush.msra.mxu0 %v3045_v26  ;;  %2497 = vmatmul.msk.f32.gmra.mxu1 %vm86_vm1, %v3190_v50 }
  0x46   :  { %529 = vmatpush.msra.mxu3 %v2959_v12  ;;  %642 = vmatpush.msra.mxu2 %v2935_v8 }
  0x47   :  { %582 = vmatpush.msra.mxu1 %v3108_v37  ;;  %575 = vmatpush.msra.mxu0 %v3057_v28 }
  0x48   :  { %530 = vmatpush.msra.mxu3 %v2969_v14  ;;  %643 = vmatpush.msra.mxu2 %v2942_v9 }
  0x49   :  { %583 = vmatpush.msra.mxu1 %v3125_v40  ;;  %2507 = vmatmul.msk.f32.gmra.mxu2 %vm86_vm1, %v3234_v55 }
  0x4a   :  { %531 = vmatpush.msra.mxu3 %v2983_v16  ;;  %576 = vmatpush.msra.mxu0 %v3074_v31 }
  0x4b   :  { %584 = vmatpush.msra.mxu1 %v3148_v45  ;;  %644 = vmatpush.msra.mxu2 %v2959_v12 }
  0x4c   :  { %429 = vmatmul.f32.vlgmr.msrb.gmra.mxu0 %v3094_v34  ;;  %532 = vmatpush.msra.mxu3 %v2997_v18 }
  0x4d   :  { %577 = vmatpush.msra.mxu0 %v3088_v33  ;;  %585 = vmatpush.msra.mxu1 %v3165_v47 }
  0x4e   :  { %533 = vmatpush.msra.mxu3 %v3014_v21  ;;  %2498 = vmatmul.msk.f32.gmra.mxu1 %vm86_vm1, %v3234_v55 }
  0x4f   :  { %645 = vmatpush.msra.mxu2 %v2969_v14  ;;  %586 = vmatpush.msra.mxu1 %v3172_v48 }
  0x50   :  { %534 = vmatpush.msra.mxu3 %v3026_v23  ;;  %697 = vmatpush.msrb.mxu0 %v3108_v37 }
  0x51   :  { %646 = vmatpush.msra.mxu2 %v2983_v16  ;;  %587 = vmatpush.msra.mxu1 %v3182_v49 }
  0x52   :  { %535 = vmatpush.msra.mxu3 %v3040_v25  ;;  %2508 = vmatmul.msk.f32.gmra.mxu2 %vm86_vm1, %v3278_v60 }
  0x53   :  { %698 = vmatpush.msrb.mxu0 %v3125_v40  ;;  %647 = vmatpush.msra.mxu2 %v2997_v18 }
  0x54   :  { %536 = vmatpush.msra.mxu3 %v3052_v27  ;;  %588 = vmatpush.msra.mxu1 %v3196_v51 }
  0x55   :  { %699 = vmatpush.msrb.mxu0 %v3148_v45  ;;  %648 = vmatpush.msra.mxu2 %v3014_v21 }
  0x56   :  { %537 = vmatpush.msra.mxu3 %v3069_v30  ;;  %2499 = vmatmul.msk.f32.gmra.mxu1 %vm86_vm1, %v3278_v60 }
  0x57   :  { %700 = vmatpush.msrb.mxu0 %v3165_v47  ;;  %589 = vmatpush.msra.mxu1 %v3208_v52 }
  0x58   :  { %538 = vmatpush.msra.mxu3 %v3081_v32  ;;  %649 = vmatpush.msra.mxu2 %v3026_v23 }
  0x59   :  { %590 = vmatpush.msra.mxu1 %v3216_v53  ;;  %701 = vmatpush.msrb.mxu0 %v3172_v48 }
  0x5a   :  { %539 = vmatpush.msra.mxu3 %v3103_v36  ;;  %650 = vmatpush.msra.mxu2 %v3040_v25 }
  0x5b   :  { %591 = vmatpush.msra.mxu1 %v3226_v54  ;;  %702 = vmatpush.msrb.mxu0 %v3182_v49 }
  0x5c   :  { %540 = vmatpush.msra.mxu3 %v3119_v39  ;;  %651 = vmatpush.msra.mxu2 %v3052_v27 }
  0x5d   :  { %592 = vmatpush.msra.mxu1 %v3240_v56  ;;  %703 = vmatpush.msrb.mxu0 %v3196_v51 }
  0x5e   :  { %541 = vmatpush.msra.mxu3 %v3130_v41  ;;  %652 = vmatpush.msra.mxu2 %v3069_v30 }
  0x5f   :  { %593 = vmatpush.msra.mxu1 %v3252_v57  ;;  %704 = vmatpush.msrb.mxu0 %v3208_v52 }
  0x60   :  { %542 = vmatpush.msra.mxu3 %v3156_v46  ;;  %653 = vmatpush.msra.mxu2 %v3081_v32 }
  0x61   :  { %594 = vmatpush.msra.mxu1 %v3260_v58  ;;  %705 = vmatpush.msrb.mxu0 %v3216_v53 }
  0x62   :  { %677 = vmatpush.msrb.mxu3 %v2896_v1  ;;  %654 = vmatpush.msra.mxu2 %v3103_v36 }
  0x63   :  { %595 = vmatpush.msra.mxu1 %v3270_v59  ;;  %706 = vmatpush.msrb.mxu0 %v3226_v54 }
  0x64   :  { %678 = vmatpush.msrb.mxu3 %v2906_v3  ;;  %655 = vmatpush.msra.mxu2 %v3119_v39 }
  0x65   :  { %596 = vmatpush.msra.mxu1 %v3284_v61  ;;  %707 = vmatpush.msrb.mxu0 %v3240_v56 }
  0x66   :  { %679 = vmatpush.msrb.mxu3 %v2916_v5  ;;  %656 = vmatpush.msra.mxu2 %v3130_v41 }
  0x67   :  { %597 = vmatpush.msra.mxu1 %v3296_v62  ;;  %708 = vmatpush.msrb.mxu0 %v3252_v57 }
  0x68   :  { %680 = vmatpush.msrb.mxu3 %v2924_v6  ;;  %657 = vmatpush.msra.mxu2 %v3156_v46 }
  0x69   :  { %709 = vmatpush.msrb.mxu0 %v3260_v58 }
  0x6a   :  { %681 = vmatpush.msrb.mxu3 %v2930_v7 }
  0x6b   :  { %710 = vmatpush.msrb.mxu0 %v3270_v59 }
  0x6c   :  { %682 = vmatpush.msrb.mxu3 %v2947_v10 }
  0x6d   :  { %711 = vmatpush.msrb.mxu0 %v3284_v61 }
  0x6e   :  { %683 = vmatpush.msrb.mxu3 %v2964_v13 }
  0x6f   :  { %712 = vmatpush.msrb.mxu0 %v3296_v62 }
  0x70   :  { %684 = vmatpush.msrb.mxu3 %v2978_v15 }
  0x72   :  { %685 = vmatpush.msrb.mxu3 %v2990_v17 }
  0x74   :  { %686 = vmatpush.msrb.mxu3 %v3002_v19 }
  0x76   :  { %687 = vmatpush.msrb.mxu3 %v3019_v22 }
  0x78   :  { %688 = vmatpush.msrb.mxu3 %v3033_v24 }
  0x7a   :  { %689 = vmatpush.msrb.mxu3 %v3045_v26 }
  0x7c   :  { %690 = vmatpush.msrb.mxu3 %v3057_v28 }
  0x7e   :  { %691 = vmatpush.msrb.mxu3 %v3074_v31 }
  0x80   :  { %692 = vmatpush.msrb.mxu3 %v3088_v33 }
  0x89   :  { %v138_v63 = vpop.f32.mrf.mxu0 }
  0x8a   :  { %v139_v50 = vadd.f32 %v138_v63, %v3430_v11 }
  0x91   :  { %v3423_v0 = vpop.f32.mrf.mxu0 }
  0x92   :  { %5379 = vst [vmem:[#allocation18_spill] sm:$0xff] %v3423_v0 }
  0x99   :  { %v3425_v2 = vpop.f32.mrf.mxu0 }
  0x9a   :  { %5380 = vst [vmem:[#allocation19_spill] sm:$0xff] %v3425_v2 }
  0xa1   :  { %v147_v20 = vpop.f32.mrf.mxu0 }
  0xa2   :  { %v3433_v29 = vadd.f32 %v147_v20, %v3430_v11 }
  0xa4   :  { %5382 = vst [vmem:[#allocation21_spill] sm:$0xff] %v3433_v29  ;;  %v347_v44 = vpop.f32.mrf.mxu3 }
  0xa5   :  { %v348_v55 = vadd.f32 %v347_v44, %v3438_v38  ;;  %v3454_v44 = vperm.slane %v78_v4, 1 }
  0xa7   :  { %v370_v60 = vadd.f32 %v348_v55, %v139_v50  ;;  %5388 = vst [vmem:[#allocation27_spill] sm:$0xff] %v3454_v44  ;;  %v179_v50 = vpop.f32.mrf.mxu1  ;;  %v3456_v55 = vperm.slane %v316_v35, 1  ;;  %v3463_v35 = vld [vmem:[%s5308_s7] ss:$0 sm:$0xff] }
  0xa9   :  { %v150_v42 = vpop.f32.mrf.mxu0  ;;  %v2509_v2 = vmul.f32 -1.442695, %v370_v60  ;;  %5389 = vst [vmem:[#allocation28_spill] sm:$0xff] %v3456_v55 }
  0xaa   :  { %v3441_v43 = vadd.f32 %v150_v42, %v3430_v11 }
  0xab   :  { %2545 = vpow2.f32 %v2509_v2  ;;  %v180_v2 = vadd.f32 %v179_v50, %v3454_v44 }
  0xac   :  { %5384 = vst [vmem:[#allocation23_spill] sm:$0xff] %v3441_v43 }
  0xb1   :  { %v153_v0 = vpop.f32.mrf.mxu0  ;;  %v2546_v29 = vpop.eup %2545 }
  0xb2   :  { %v3446_v20 = vadd.f32 %v153_v0, %v3430_v11  ;;  %v374_v46 = vadd.f32 1.0, %v2546_v29 }
  0xb4   :  { %5385 = vst [vmem:[#allocation24_spill] sm:$0xff] %v3446_v20  ;;  %2547 = vrcp.f32 %v374_v46  ;;  %vm380_vm3 = vweird.f32 %v374_v46 }
  0xb9   :  { %v156_v62 = vpop.f32.mrf.mxu0 }
  0xba   :  { %v3449_v33 = vadd.f32 %v156_v62, %v3430_v11  ;;  %v2548_v63 = vpop.eup %2547 }
  0xbb   :  { %v376_v0 = vmul.f32 %v2548_v63, %v374_v46  ;;  %vm381_vm2 = vweird.f32 %v2548_v63 }
  0xbc   :  { %5386 = vst [vmem:[#allocation25_spill] sm:$0xff] %v3449_v33  ;;  %vm382_vm4 = vmor %vm380_vm3, %vm381_vm2 }
  0xbd   :  { %v377_v62 = vsub.f32 1.0, %v376_v0 }
  0xbf   :  { %v378_v38 = vmul.f32 %v2548_v63, %v377_v62 }
  0xc1   :  { %v159_v42 = vpop.f32.mrf.mxu0  ;;  %v379_v61 = vadd.f32 %v2548_v63, %v378_v38  ;;  %v3466_v38 = vperm.slane %v78_v4, 2 }
  0xc2   :  { %v3452_v43 = vadd.f32 %v159_v42, %v3430_v11  ;;  %v386_v42 = vand.u32 2147483648, %v374_v46 }
  0xc3   :  { %v383_v44 = vsel %vm382_vm4, %v2548_v63, %v379_v61 }
  0xc4   :  { %5387 = vst [vmem:[#allocation26_spill] sm:$0xff] %v3452_v43  ;;  %v367_v60 = vpop.f32.mrf.mxu3  ;;  %v384_v43 = vand.u32 2147483647, %v374_v46  ;;  %v387_v0 = vor.u32 1.1754944e-38, %v386_v42 }
  0xc5   :  { %v368_v20 = vadd.f32 %v367_v60, %v3456_v55 }
  0xc6   :  { %vm385_vm5 = vcmp.eq.f32.partialorder %v384_v43, 8.507059e+37 }
  0xc7   :  { %v390_v33 = vadd.f32 %v368_v20, %v180_v2  ;;  %v388_v20 = vsel %vm385_vm5, %v387_v0, %v383_v44  ;;  %v220_v2 = vpop.f32.mrf.mxu2 }
  0xc8   :  { %v221_v62 = vadd.f32 %v220_v2, %v3466_v38  ;;  %v182_v2 = vpop.f32.mrf.mxu1 }
  0xc9   :  { %v2510_v29 = vmul.f32 -1.442695, %v390_v33  ;;  %v430_v50 = vpop.f32.mrf.mxu0 }
  0xca   :  { %v431_v33 = vadd.f32 %v3463_v35, %v430_v50 }
  0xcb   :  { %2549 = vpow2.f32 %v2510_v29 }
  0xcc   :  { %v433_v46 = vmul.f32 %v431_v33, %v388_v20  ;;  %v5397_v20 = vld [vmem:[#allocation17_spill] sm:$0xff] }
  0xce   :  { %v434_v31 = vadd.f32 %v433_v46, %v221_v62 }
  0xcf   :  { %v223_v46 = vpop.f32.mrf.mxu2 }
  0xd0   :  { %v3523_v62 = vpop.f32.mrf.mxu1 }
  0xd1   :  { %v2550_v11 = vpop.eup %2549  ;;  %5398 = vst [vmem:[#allocation29_spill] sm:$0xff] %v3523_v62 }
  0xd2   :  { %v394_v60 = vadd.f32 1.0, %v2550_v11 }
  0xd4   :  { %2551 = vrcp.f32 %v394_v60  ;;  %v406_v59 = vand.u32 2147483648, %v394_v60  ;;  %v404_v61 = vand.u32 2147483647, %v394_v60  ;;  %vm400_vm7 = vweird.f32 %v394_v60 }
  0xd5   :  { %2553 = vtanh.f32 %v434_v31  ;;  %v5391_v31 = vld [vmem:[#allocation15_spill] sm:$0xff] }
  0xd6   :  { %v407_v43 = vor.u32 1.1754944e-38, %v406_v59  ;;  %vm405_vm9 = vcmp.eq.f32.partialorder %v404_v61, 8.507059e+37  ;;  %v5394_v59 = vld [vmem:[#allocation16_spill] sm:$0xff] }
  0xd8   :  { %v3527_v61 = vpop.f32.mrf.mxu1 }
  0xd9   :  { %5400 = vst [vmem:[#allocation31_spill] sm:$0xff] %v3527_v61  ;;  %v5410_v61 = vld [vmem:[#allocation20_spill] sm:$0xff] }
  0xda   :  { %v2552_v29 = vpop.eup %2551 }
  0xdb   :  { %v396_v55 = vmul.f32 %v2552_v29, %v394_v60  ;;  %vm401_vm6 = vweird.f32 %v2552_v29  ;;  %v2554_v42 = vpop.eup %2553  ;;  %v5396_v60 = vld [vmem:[#allocation10_spill] sm:$0xff] }
  0xdc   :  { %vm402_vm8 = vmor %vm400_vm7, %vm401_vm6 }
  0xdd   :  { %v397_v41 = vsub.f32 1.0, %v396_v55  ;;  %v5395_v55 = vld [vmem:[#allocation13_spill] sm:$0xff] }
  0xdf   :  { %v398_v28 = vmul.f32 %v2552_v29, %v397_v41  ;;  %v5393_v41 = vld [vmem:[#allocation9_spill] sm:$0xff] }
  0xe1   :  { %v399_v11 = vadd.f32 %v2552_v29, %v398_v28  ;;  %v5390_v28 = vld [vmem:[#allocation8_spill] sm:$0xff] }
  0xe3   :  { %v403_v4 = vsel %vm402_vm8, %v2552_v29, %v399_v11  ;;  %v3525_v29 = vpop.f32.mrf.mxu2 }
  0xe4   :  { %v408_v63 = vsel %vm405_vm9, %v407_v43, %v403_v4  ;;  %5399 = vst [vmem:[#allocation30_spill] sm:$0xff] %v3525_v29  ;;  %v3531_v43 = vpop.f32.mrf.mxu1 }
  0xe5   :  { %v436_v44 = vsub.f32 1.0, %v408_v63  ;;  %v438_v0 = vmul.f32 %v408_v63, %v3094_v34  ;;  %v5392_v34 = vld [vmem:[#allocation12_spill] sm:$0xff]  ;;  %5402 = vst [vmem:[#allocation33_spill] sm:$0xff] %v3531_v43 }
  0xe7   :  { %v437_v50 = vmul.f32 %v2554_v42, %v436_v44 }
  0xe9   :  { %v3470_v33 = vadd.f32 %v438_v0, %v437_v50 }
  0xeb   :  { %463 = vmatmul.f32.vlgmr.msrb.gmra.mxu1 %v3470_v33  ;;  %483 = vmatmul.f32.vlgmr.msrb.gmra.mxu2 %v3470_v33  ;;  %v3529_v11 = vpop.f32.mrf.mxu2 }
  0xec   :  { %543 = vmatmul.f32.vlgmr.msra.gmra.mxu3 %v3470_v33  ;;  %757 = vmatpush.msrb.mxu1 %v2935_v8  ;;  %5401 = vst [vmem:[#allocation32_spill] sm:$0xff] %v3529_v11  ;;  %v3535_v63 = vpop.f32.mrf.mxu1 }
  0xed   :  { %792 = vmatpush.msrb.mxu2 %v2896_v1  ;;  %812 = vmatpush.msra.mxu3 %v3108_v37  ;;  %5404 = vst [vmem:[#allocation35_spill] sm:$0xff] %v3535_v63  ;;  %v5413_v63 = vld [vmem:[#allocation27_spill] sm:$0xff] }
  0xee   :  { %758 = vmatpush.msrb.mxu1 %v2942_v9 }
  0xef   :  { %793 = vmatpush.msrb.mxu2 %v2906_v3  ;;  %813 = vmatpush.msra.mxu3 %v3125_v40 }
  0xf0   :  { %759 = vmatpush.msrb.mxu1 %v2959_v12 }
  0xf1   :  { %794 = vmatpush.msrb.mxu2 %v2916_v5  ;;  %814 = vmatpush.msra.mxu3 %v3148_v45 }
  0xf2   :  { %760 = vmatpush.msrb.mxu1 %v2969_v14 }
  0xf3   :  { %795 = vmatpush.msrb.mxu2 %v2924_v6  ;;  %815 = vmatpush.msra.mxu3 %v3165_v47  ;;  %v3533_v4 = vpop.f32.mrf.mxu2 }
  0xf4   :  { %761 = vmatpush.msrb.mxu1 %v2983_v16  ;;  %5403 = vst [vmem:[#allocation34_spill] sm:$0xff] %v3533_v4  ;;  %v3539_v42 = vpop.f32.mrf.mxu1 }
  0xf5   :  { %796 = vmatpush.msrb.mxu2 %v2930_v7  ;;  %816 = vmatpush.msra.mxu3 %v3172_v48  ;;  %5406 = vst [vmem:[#allocation37_spill] sm:$0xff] %v3539_v42 }
  0xf6   :  { %762 = vmatpush.msrb.mxu1 %v2997_v18 }
  0xf7   :  { %797 = vmatpush.msrb.mxu2 %v2947_v10  ;;  %817 = vmatpush.msra.mxu3 %v3182_v49 }
  0xf8   :  { %763 = vmatpush.msrb.mxu1 %v3014_v21 }
  0xf9   :  { %798 = vmatpush.msrb.mxu2 %v2964_v13  ;;  %818 = vmatpush.msra.mxu3 %v3196_v51 }
  0xfa   :  { %764 = vmatpush.msrb.mxu1 %v3026_v23 }
  0xfb   :  { %799 = vmatpush.msrb.mxu2 %v2978_v15  ;;  %819 = vmatpush.msra.mxu3 %v3208_v52  ;;  %v3537_v44 = vpop.f32.mrf.mxu2 }
  0xfc   :  { %765 = vmatpush.msrb.mxu1 %v3040_v25  ;;  %5405 = vst [vmem:[#allocation36_spill] sm:$0xff] %v3537_v44  ;;  %v3543_v0 = vpop.f32.mrf.mxu1  ;;  %v5414_v44 = vld [vmem:[#allocation28_spill] sm:$0xff] }
  0xfd   :  { %800 = vmatpush.msrb.mxu2 %v2990_v17  ;;  %820 = vmatpush.msra.mxu3 %v3216_v53  ;;  %5408 = vst [vmem:[#allocation39_spill] sm:$0xff] %v3543_v0 }
  0xfe   :  { %766 = vmatpush.msrb.mxu1 %v3052_v27 }
  0xff   :  { %801 = vmatpush.msrb.mxu2 %v3002_v19  ;;  %821 = vmatpush.msra.mxu3 %v3226_v54 }
 0x100   :  { %767 = vmatpush.msrb.mxu1 %v3069_v30 }
 0x101   :  { %802 = vmatpush.msrb.mxu2 %v3019_v22  ;;  %822 = vmatpush.msra.mxu3 %v3240_v56 }
 0x102   :  { %768 = vmatpush.msrb.mxu1 %v3081_v32 }
 0x103   :  { %803 = vmatpush.msrb.mxu2 %v3033_v24  ;;  %823 = vmatpush.msra.mxu3 %v3252_v57  ;;  %v3541_v50 = vpop.f32.mrf.mxu2 }
 0x104   :  { %769 = vmatpush.msrb.mxu1 %v3103_v36  ;;  %5407 = vst [vmem:[#allocation38_spill] sm:$0xff] %v3541_v50 }
 0x105   :  { %804 = vmatpush.msrb.mxu2 %v3045_v26  ;;  %824 = vmatpush.msra.mxu3 %v3260_v58 }
 0x106   :  { %770 = vmatpush.msrb.mxu1 %v3119_v39 }
 0x107   :  { %805 = vmatpush.msrb.mxu2 %v5390_v28  ;;  %825 = vmatpush.msra.mxu3 %v5391_v31 }
 0x108   :  { %771 = vmatpush.msrb.mxu1 %v5392_v34 }
 0x109   :  { %806 = vmatpush.msrb.mxu2 %v5393_v41  ;;  %826 = vmatpush.msra.mxu3 %v5394_v59  ;;  %v183_v41 = vadd.f32 %v182_v2, %v5413_v63 }
 0x10a   :  { %772 = vmatpush.msrb.mxu1 %v5395_v55 }
 0x10b   :  { %807 = vmatpush.msrb.mxu2 %v5396_v60  ;;  %827 = vmatpush.msra.mxu3 %v5397_v20  ;;  %v3545_v62 = vpop.f32.mrf.mxu2  ;;  %v5411_v20 = vld [vmem:[#allocation18_spill] sm:$0xff] }
 0x10c   :  { %5409 = vst [vmem:[#allocation40_spill] sm:$0xff] %v3545_v62  ;;  %v142_v11 = vadd.f32 %v5411_v20, %v5410_v61  ;;  %v5412_v60 = vld [vmem:[#allocation22_spill] sm:$0xff] }
 0x168   :  { %v464_v29 = vpop.f32.mrf.mxu1 }
 0x169   :  { %v465_v43 = vadd.f32 %v464_v29, %v5412_v60 }
 0x16b   :  { %v487_v55 = vadd.f32 %v465_v43, %v142_v11 }
 0x16d   :  { %v2511_v4 = vmul.f32 -1.442695, %v487_v55 }
 0x16e   :  { %v484_v59 = vpop.f32.mrf.mxu2 }
 0x16f   :  { %2555 = vpow2.f32 %v2511_v4  ;;  %v485_v42 = vadd.f32 %v484_v59, %v5414_v44  ;;  %v544_v4 = vpop.f32.mrf.mxu3 }
 0x171   :  { %v507_v34 = vadd.f32 %v485_v42, %v183_v41  ;;  %v224_v42 = vadd.f32 %v223_v46, %v3466_v38 }
 0x173   :  { %v2512_v50 = vmul.f32 -1.442695, %v507_v34 }
 0x175   :  { %v2556_v31 = vpop.eup %2555  ;;  %2557 = vpow2.f32 %v2512_v50 }
 0x176   :  { %v491_v0 = vadd.f32 1.0, %v2556_v31 }
 0x178   :  { %2559 = vrcp.f32 %v491_v0  ;;  %v503_v11 = vand.u32 2147483648, %v491_v0  ;;  %v501_v43 = vand.u32 2147483647, %v491_v0  ;;  %vm497_vm11 = vweird.f32 %v491_v0 }
 0x17a   :  { %v504_v34 = vor.u32 1.1754944e-38, %v503_v11  ;;  %vm502_vm13 = vcmp.eq.f32.partialorder %v501_v43, 8.507059e+37 }
 0x17b   :  { %v2558_v62 = vpop.eup %2557 }
 0x17c   :  { %v511_v28 = vadd.f32 1.0, %v2558_v62  ;;  %v545_v62 = vadd.f32 %v3463_v35, %v544_v4 }
 0x17e   :  { %v2560_v39 = vpop.eup %2559  ;;  %2561 = vrcp.f32 %v511_v28  ;;  %v521_v63 = vand.u32 2147483647, %v511_v28  ;;  %vm517_vm15 = vweird.f32 %v511_v28 }
 0x17f   :  { %v493_v20 = vmul.f32 %v2560_v39, %v491_v0  ;;  %vm498_vm10 = vweird.f32 %v2560_v39 }
 0x180   :  { %vm499_vm12 = vmor %vm497_vm11, %vm498_vm10  ;;  %vm522_vm1 = vcmp.eq.f32.partialorder %v521_v63, 8.507059e+37 }
 0x181   :  { %v494_v29 = vsub.f32 1.0, %v493_v20 }
 0x183   :  { %v495_v55 = vmul.f32 %v2560_v39, %v494_v29  ;;  %v523_v29 = vand.u32 2147483648, %v511_v28 }
 0x184   :  { %v2562_v2 = vpop.eup %2561 }
 0x185   :  { %v513_v60 = vmul.f32 %v2562_v2, %v511_v28  ;;  %v496_v59 = vadd.f32 %v2560_v39, %v495_v55  ;;  %vm518_vm14 = vweird.f32 %v2562_v2  ;;  %v524_v0 = vor.u32 1.1754944e-38, %v523_v29 }
 0x186   :  { %vm519_vm0 = vmor %vm517_vm15, %vm518_vm14 }
 0x187   :  { %v514_v41 = vsub.f32 1.0, %v513_v60  ;;  %v500_v31 = vsel %vm499_vm12, %v2560_v39, %v496_v59 }
 0x188   :  { %v505_v50 = vsel %vm502_vm13, %v504_v34, %v500_v31 }
 0x189   :  { %v515_v20 = vmul.f32 %v2562_v2, %v514_v41  ;;  %v547_v44 = vmul.f32 %v545_v62, %v505_v50 }
 0x18b   :  { %v516_v61 = vadd.f32 %v2562_v2, %v515_v20  ;;  %v548_v58 = vadd.f32 %v547_v44, %v224_v42 }
 0x18d   :  { %v520_v55 = vsel %vm519_vm0, %v2562_v2, %v516_v61  ;;  %2563 = vtanh.f32 %v548_v58 }
 0x18e   :  { %v525_v39 = vsel %vm522_vm1, %v524_v0, %v520_v55 }
 0x18f   :  { %v550_v60 = vsub.f32 1.0, %v525_v39  ;;  %v552_v46 = vmul.f32 %v525_v39, %v3470_v33 }
 0x193   :  { %v2564_v11 = vpop.eup %2563 }
 0x194   :  { %v551_v43 = vmul.f32 %v2564_v11, %v550_v60  ;;  %v5431_v60 = vld [vmem:[#allocation30_spill] sm:$0xff] }
 0x195   :  { %v227_v11 = vadd.f32 %v5431_v60, %v3466_v38 }
 0x196   :  { %v3555_v4 = vadd.f32 %v552_v46, %v551_v43 }
 0x198   :  { %578 = vmatmul.f32.vlgmr.msra.gmra.mxu0 %v3555_v4  ;;  %598 = vmatmul.f32.vlgmr.msra.gmra.mxu1 %v3555_v4 }
 0x199   :  { %658 = vmatmul.f32.vlgmr.msra.gmra.mxu2 %v3555_v4  ;;  %872 = vmatpush.msra.mxu0 %v2935_v8  ;;  %v5420_v8 = vld [vmem:[#allocation9_spill] sm:$0xff] }
 0x19a   :  { %907 = vmatpush.msra.mxu1 %v2896_v1  ;;  %927 = vmatpush.msra.mxu2 %v3108_v37  ;;  %v5415_v1 = vld [vmem:[#allocation14_spill] sm:$0xff] }
 0x19b   :  { %873 = vmatpush.msra.mxu0 %v2942_v9  ;;  %v5421_v9 = vld [vmem:[#allocation16_spill] sm:$0xff] }
 0x19c   :  { %908 = vmatpush.msra.mxu1 %v2906_v3  ;;  %928 = vmatpush.msra.mxu2 %v3125_v40  ;;  %v5416_v3 = vld [vmem:[#allocation11_spill] sm:$0xff] }
 0x19d   :  { %874 = vmatpush.msra.mxu0 %v2959_v12  ;;  %v5423_v12 = vld [vmem:[#allocation10_spill] sm:$0xff] }
 0x19e   :  { %909 = vmatpush.msra.mxu1 %v2916_v5  ;;  %929 = vmatpush.msra.mxu2 %v3148_v45  ;;  %v5417_v5 = vld [vmem:[#allocation8_spill] sm:$0xff] }
 0x19f   :  { %875 = vmatpush.msra.mxu0 %v2969_v14 }
 0x1a0   :  { %910 = vmatpush.msra.mxu1 %v2924_v6  ;;  %930 = vmatpush.msra.mxu2 %v3165_v47  ;;  %v5418_v6 = vld [vmem:[#allocation15_spill] sm:$0xff] }
 0x1a1   :  { %876 = vmatpush.msra.mxu0 %v2983_v16  ;;  %v5425_v16 = vld [vmem:[#allocation20_spill] sm:$0xff] }
 0x1a2   :  { %911 = vmatpush.msra.mxu1 %v2930_v7  ;;  %931 = vmatpush.msra.mxu2 %v3172_v48  ;;  %v5419_v7 = vld [vmem:[#allocation12_spill] sm:$0xff] }
 0x1a3   :  { %877 = vmatpush.msra.mxu0 %v2997_v18 }
 0x1a4   :  { %912 = vmatpush.msra.mxu1 %v2947_v10  ;;  %932 = vmatpush.msra.mxu2 %v3182_v49  ;;  %v5422_v10 = vld [vmem:[#allocation13_spill] sm:$0xff] }
 0x1a5   :  { %878 = vmatpush.msra.mxu0 %v3014_v21  ;;  %v5428_v21 = vld [vmem:[#allocation29_spill] sm:$0xff] }
 0x1a6   :  { %913 = vmatpush.msra.mxu1 %v2964_v13  ;;  %933 = vmatpush.msra.mxu2 %v3196_v51  ;;  %v5424_v13 = vld [vmem:[#allocation17_spill] sm:$0xff] }
 0x1a7   :  { %879 = vmatpush.msra.mxu0 %v3026_v23  ;;  %v5429_v23 = vld [vmem:[#allocation22_spill] sm:$0xff] }
 0x1a8   :  { %914 = vmatpush.msra.mxu1 %v2978_v15  ;;  %934 = vmatpush.msra.mxu2 %v3208_v52 }
 0x1a9   :  { %880 = vmatpush.msra.mxu0 %v3040_v25  ;;  %v5430_v25 = vld [vmem:[#allocation28_spill] sm:$0xff] }
 0x1aa   :  { %915 = vmatpush.msra.mxu1 %v2990_v17  ;;  %935 = vmatpush.msra.mxu2 %v3216_v53  ;;  %v5426_v17 = vld [vmem:[#allocation19_spill] sm:$0xff] }
 0x1ab   :  { %881 = vmatpush.msra.mxu0 %v3052_v27  ;;  %v145_v18 = vadd.f32 %v5426_v17, %v5425_v16 }
 0x1ac   :  { %916 = vmatpush.msra.mxu1 %v3002_v19  ;;  %936 = vmatpush.msra.mxu2 %v3226_v54  ;;  %v5427_v19 = vld [vmem:[#allocation27_spill] sm:$0xff] }
 0x1ad   :  { %882 = vmatpush.msra.mxu0 %v3069_v30 }
 0x1ae   :  { %917 = vmatpush.msra.mxu1 %v3019_v22  ;;  %937 = vmatpush.msra.mxu2 %v3240_v56  ;;  %v186_v22 = vadd.f32 %v5428_v21, %v5427_v19  ;;  %v3632_v21 = vld [vmem:[%s5304_s4 + $0xf0] sm:$0xff] }
 0x1af   :  { %883 = vmatpush.msra.mxu0 %v3081_v32 }
 0x1b0   :  { %918 = vmatpush.msra.mxu1 %v3033_v24  ;;  %938 = vmatpush.msra.mxu2 %v3252_v57 }
 0x1b1   :  { %884 = vmatpush.msra.mxu0 %v3103_v36 }
 0x1b2   :  { %919 = vmatpush.msra.mxu1 %v3045_v26  ;;  %939 = vmatpush.msra.mxu2 %v5415_v1 }
 0x1b3   :  { %885 = vmatpush.msra.mxu0 %v5416_v3 }
 0x1b4   :  { %920 = vmatpush.msra.mxu1 %v5417_v5  ;;  %940 = vmatpush.msra.mxu2 %v5418_v6 }
 0x1b5   :  { %886 = vmatpush.msra.mxu0 %v5419_v7 }
 0x1b6   :  { %921 = vmatpush.msra.mxu1 %v5420_v8  ;;  %941 = vmatpush.msra.mxu2 %v5421_v9 }
 0x1b7   :  { %887 = vmatpush.msra.mxu0 %v5422_v10 }
 0x1b8   :  { %922 = vmatpush.msra.mxu1 %v5423_v12  ;;  %942 = vmatpush.msra.mxu2 %v5424_v13 }
 0x215   :  { %v579_v14 = vpop.f32.mrf.mxu0  ;;  %v599_v15 = vpop.f32.mrf.mxu1 }
 0x216   :  { %v580_v24 = vadd.f32 %v579_v14, %v5429_v23  ;;  %v600_v26 = vadd.f32 %v599_v15, %v5430_v25 }
 0x218   :  { %v602_v27 = vadd.f32 %v580_v24, %v145_v18  ;;  %v622_v30 = vadd.f32 %v600_v26, %v186_v22  ;;  %v3626_v18 = vld [vmem:[%s5306_s5 + $0x78] sm:$0xff]  ;;  %v3644_v24 = vld [vmem:[%s5306_s5 + $0x70] sm:$0xff]  ;;  %v3650_v26 = vld [vmem:[%s5304_s4 + $0xe0] sm:$0xff] }
 0x219   :  { %v3638_v22 = vld [vmem:[%s5304_s4 + $0xf8] sm:$0xff] }
 0x21a   :  { %v2513_v32 = vmul.f32 -1.442695, %v602_v27  ;;  %v2514_v36 = vmul.f32 -1.442695, %v622_v30  ;;  %v3656_v27 = vld [vmem:[%s5304_s4 + $0xe8] sm:$0xff] }
 0x21b   :  { %v3662_v30 = vld [vmem:[%s5306_s5 + $0x68] sm:$0xff] }
 0x21c   :  { %2565 = vpow2.f32 %v2513_v32  ;;  %v659_v42 = vpop.f32.mrf.mxu2  ;;  %v3668_v32 = vld [vmem:[%s5304_s4 + $0xd0] sm:$0xff] }
 0x21d   :  { %2567 = vpow2.f32 %v2514_v36  ;;  %v660_v0 = vadd.f32 %v3463_v35, %v659_v42  ;;  %v3674_v36 = vld [vmem:[%s5304_s4 + $0xd8] sm:$0xff]  ;;  %v3842_v42 = vld [vmem:[%s5304_s4] sm:$0xff] }
 0x222   :  { %v2566_v37 = vpop.eup %2565 }
 0x223   :  { %v2568_v40 = vpop.eup %2567  ;;  %v606_v45 = vadd.f32 1.0, %v2566_v37  ;;  %v3680_v37 = vld [vmem:[%s5306_s5 + $0x60] sm:$0xff] }
 0x224   :  { %v626_v58 = vadd.f32 1.0, %v2568_v40  ;;  %v3686_v40 = vld [vmem:[%s5304_s4 + $0xc0] sm:$0xff] }
 0x225   :  { %2569 = vrcp.f32 %v606_v45  ;;  %v618_v34 = vand.u32 2147483648, %v606_v45  ;;  %v616_v31 = vand.u32 2147483647, %v606_v45  ;;  %vm612_vm3 = vweird.f32 %v606_v45 }
 0x226   :  { %2571 = vrcp.f32 %v626_v58  ;;  %v638_v43 = vand.u32 2147483648, %v626_v58  ;;  %vm632_vm7 = vweird.f32 %v626_v58  ;;  %v636_v3 = vand.u32 2147483647, %v626_v58 }
 0x227   :  { %v619_v20 = vor.u32 1.1754944e-38, %v618_v34  ;;  %vm617_vm5 = vcmp.eq.f32.partialorder %v616_v31, 8.507059e+37  ;;  %v3790_v34 = vld [vmem:[%s5304_s4 + $0x40] sm:$0xff] }
 0x228   :  { %v639_v8 = vor.u32 1.1754944e-38, %v638_v43  ;;  %vm637_vm9 = vcmp.eq.f32.partialorder %v636_v3, 8.507059e+37  ;;  %v3816_v31 = vld [vmem:[%s5304_s4 + $0x20] sm:$0xff] }
 0x22b   :  { %v2570_v28 = vpop.eup %2569 }
 0x22c   :  { %v2572_v61 = vpop.eup %2571  ;;  %v608_v63 = vmul.f32 %v2570_v28, %v606_v45  ;;  %vm613_vm2 = vweird.f32 %v2570_v28  ;;  %v3693_v45 = vld [vmem:[%s5306_s5 + $0x58] sm:$0xff] }
 0x22d   :  { %v628_v44 = vmul.f32 %v2572_v61, %v626_v58  ;;  %vm614_vm4 = vmor %vm612_vm3, %vm613_vm2  ;;  %vm633_vm6 = vweird.f32 %v2572_v61  ;;  %v3699_v58 = vld [vmem:[%s5304_s4 + $0xb0] sm:$0xff] }
 0x22e   :  { %v609_v2 = vsub.f32 1.0, %v608_v63  ;;  %vm634_vm8 = vmor %vm632_vm7, %vm633_vm6  ;;  %v3738_v63 = vld [vmem:[%s5304_s4 + $0x80] sm:$0xff] }
 0x22f   :  { %v629_v59 = vsub.f32 1.0, %v628_v44  ;;  %v3751_v44 = vld [vmem:[%s5304_s4 + $0x70] sm:$0xff] }
 0x230   :  { %v610_v41 = vmul.f32 %v2570_v28, %v609_v2  ;;  %v3764_v2 = vld [vmem:[%s5304_s4 + $0x60] sm:$0xff] }
 0x231   :  { %v630_v62 = vmul.f32 %v2572_v61, %v629_v59  ;;  %v3777_v59 = vld [vmem:[%s5304_s4 + $0x50] sm:$0xff] }
 0x232   :  { %v611_v50 = vadd.f32 %v2570_v28, %v610_v41  ;;  %v3803_v41 = vld [vmem:[%s5304_s4 + $0x30] sm:$0xff] }
 0x233   :  { %v631_v39 = vadd.f32 %v2572_v61, %v630_v62  ;;  %v3829_v62 = vld [vmem:[%s5304_s4 + $0x10] sm:$0xff] }
 0x234   :  { %v615_v29 = vsel %vm614_vm4, %v2570_v28, %v611_v50  ;;  %v3712_v28 = vld [vmem:[%s5304_s4 + $0xa0] sm:$0xff] }
 0x235   :  { %v620_v55 = vsel %vm617_vm5, %v619_v20, %v615_v29  ;;  %v635_v7 = vsel %vm634_vm8, %v2572_v61, %v631_v39  ;;  %v3725_v61 = vld [vmem:[%s5304_s4 + $0x90] sm:$0xff]  ;;  %v5432_v20 = vld [vmem:[#allocation31_spill] sm:$0xff] }
 0x236   :  { %v662_v46 = vmul.f32 %v660_v0, %v620_v55  ;;  %v640_v10 = vsel %vm637_vm9, %v639_v8, %v635_v7 }
 0x237   :  { %v665_v12 = vsub.f32 1.0, %v640_v10  ;;  %v667_v16 = vmul.f32 %v640_v10, %v3555_v4 }
 0x238   :  { %v663_v5 = vadd.f32 %v662_v46, %v227_v11  ;;  %v5433_v11 = vld [vmem:[#allocation21_spill] sm:$0xff] }
 0x23a   :  { %2573 = vtanh.f32 %v663_v5 }
 0x240   :  { %v2574_v14 = vpop.eup %2573 }
 0x241   :  { %v666_v15 = vmul.f32 %v2574_v14, %v665_v12 }
 0x243   :  { %v3618_v17 = vadd.f32 %v667_v16, %v666_v15 }
 0x245   :  { %693 = vmatmul.f32.vlgmr.msrb.gmra.mxu3 %v3618_v17  ;;  %713 = vmatmul.f32.vlgmr.msrb.gmra.mxu0 %v3618_v17 }
 0x246   :  { %773 = vmatmul.f32.vlgmr.msrb.gmra.mxu1 %v3618_v17  ;;  %987 = vmatpush.msrb.mxu3 %v3626_v18 }
 0x247   :  { %1022 = vmatpush.msrb.mxu0 %v3632_v21  ;;  %1042 = vmatpush.msrb.mxu1 %v3638_v22 }
 0x248   :  { %988 = vmatpush.msrb.mxu3 %v3644_v24 }
 0x249   :  { %1023 = vmatpush.msrb.mxu0 %v3650_v26  ;;  %1043 = vmatpush.msrb.mxu1 %v3656_v27 }
 0x24a   :  { %989 = vmatpush.msrb.mxu3 %v3662_v30 }
 0x24b   :  { %1024 = vmatpush.msrb.mxu0 %v3668_v32  ;;  %1044 = vmatpush.msrb.mxu1 %v3674_v36 }
 0x24c   :  { %990 = vmatpush.msrb.mxu3 %v3680_v37 }
 0x24d   :  { %1025 = vmatpush.msrb.mxu0 %v3686_v40  ;;  %1045 = vmatpush.msrb.mxu1 %v3165_v47  ;;  %v3706_v47 = vld [vmem:[%s5306_s5 + $0x50] sm:$0xff] }
 0x24e   :  { %991 = vmatpush.msrb.mxu3 %v3693_v45 }
 0x24f   :  { %1026 = vmatpush.msrb.mxu0 %v3699_v58  ;;  %1046 = vmatpush.msrb.mxu1 %v3172_v48  ;;  %v3719_v48 = vld [vmem:[%s5306_s5 + $0x48] sm:$0xff] }
 0x250   :  { %992 = vmatpush.msrb.mxu3 %v3706_v47 }
 0x251   :  { %1027 = vmatpush.msrb.mxu0 %v3712_v28  ;;  %1047 = vmatpush.msrb.mxu1 %v3182_v49  ;;  %v3732_v49 = vld [vmem:[%s5306_s5 + $0x40] sm:$0xff] }
 0x252   :  { %993 = vmatpush.msrb.mxu3 %v3719_v48 }
 0x253   :  { %1028 = vmatpush.msrb.mxu0 %v3725_v61  ;;  %1048 = vmatpush.msrb.mxu1 %v3196_v51  ;;  %v3745_v51 = vld [vmem:[%s5306_s5 + $0x38] sm:$0xff] }
 0x254   :  { %994 = vmatpush.msrb.mxu3 %v3732_v49 }
 0x255   :  { %1029 = vmatpush.msrb.mxu0 %v3738_v63  ;;  %1049 = vmatpush.msrb.mxu1 %v3208_v52  ;;  %v3758_v52 = vld [vmem:[%s5306_s5 + $0x30] sm:$0xff] }
 0x256   :  { %995 = vmatpush.msrb.mxu3 %v3745_v51 }
 0x257   :  { %1030 = vmatpush.msrb.mxu0 %v3751_v44  ;;  %1050 = vmatpush.msrb.mxu1 %v3216_v53  ;;  %v3771_v53 = vld [vmem:[%s5306_s5 + $0x28] sm:$0xff] }
 0x258   :  { %996 = vmatpush.msrb.mxu3 %v3758_v52 }
 0x259   :  { %1031 = vmatpush.msrb.mxu0 %v3764_v2  ;;  %1051 = vmatpush.msrb.mxu1 %v3226_v54  ;;  %v3784_v54 = vld [vmem:[%s5306_s5 + $0x20] sm:$0xff] }
 0x25a   :  { %997 = vmatpush.msrb.mxu3 %v3771_v53 }
 0x25b   :  { %1032 = vmatpush.msrb.mxu0 %v3777_v59  ;;  %1052 = vmatpush.msrb.mxu1 %v3240_v56  ;;  %v3797_v56 = vld [vmem:[%s5306_s5 + $0x18] sm:$0xff] }
 0x25c   :  { %998 = vmatpush.msrb.mxu3 %v3784_v54 }
 0x25d   :  { %1033 = vmatpush.msrb.mxu0 %v3790_v34  ;;  %1053 = vmatpush.msrb.mxu1 %v3252_v57  ;;  %v3810_v57 = vld [vmem:[%s5306_s5 + $0x10] sm:$0xff] }
 0x25e   :  { %999 = vmatpush.msrb.mxu3 %v3797_v56 }
 0x25f   :  { %1034 = vmatpush.msrb.mxu0 %v3803_v41  ;;  %1054 = vmatpush.msrb.mxu1 %v5415_v1  ;;  %v3823_v1 = vld [vmem:[%s5306_s5 + $0x8] sm:$0xff] }
 0x260   :  { %1000 = vmatpush.msrb.mxu3 %v3810_v57 }
 0x261   :  { %1035 = vmatpush.msrb.mxu0 %v3816_v31  ;;  %1055 = vmatpush.msrb.mxu1 %v5418_v6  ;;  %v3836_v6 = vld [vmem:[%s5306_s5] sm:$0xff] }
 0x262   :  { %1001 = vmatpush.msrb.mxu3 %v3823_v1 }
 0x263   :  { %1036 = vmatpush.msrb.mxu0 %v3829_v62  ;;  %1056 = vmatpush.msrb.mxu1 %v5421_v9  ;;  %v189_v9 = vadd.f32 %v5432_v20, %v5427_v19 }
 0x264   :  { %1002 = vmatpush.msrb.mxu3 %v3836_v6 }
 0x265   :  { %1037 = vmatpush.msrb.mxu0 %v3842_v42  ;;  %1057 = vmatpush.msrb.mxu1 %v5424_v13 }
 0x2c2   :  { %v714_v50 = vpop.f32.mrf.mxu0 }
 0x2c3   :  { %v715_v29 = vadd.f32 %v714_v50, %v5430_v25 }
 0x2c5   :  { %v737_v0 = vadd.f32 %v715_v29, %v189_v9 }
 0x2c7   :  { %v2516_v55 = vmul.f32 -1.442695, %v737_v0  ;;  %v774_v0 = vpop.f32.mrf.mxu1 }
 0x2c8   :  { %v694_v39 = vpop.f32.mrf.mxu3 }
 0x2c9   :  { %2575 = vpow2.f32 %v2516_v55  ;;  %v695_v60 = vadd.f32 %v694_v39, %v5429_v23 }
 0x2cb   :  { %v717_v43 = vadd.f32 %v695_v60, %v5433_v11  ;;  %v775_v60 = vadd.f32 %v3463_v35, %v774_v0 }
 0x2cd   :  { %v2515_v46 = vmul.f32 -1.442695, %v717_v43 }
 0x2cf   :  { %v2576_v3 = vpop.eup %2575  ;;  %2577 = vpow2.f32 %v2515_v46 }
 0x2d0   :  { %v741_v5 = vadd.f32 1.0, %v2576_v3  ;;  %v5434_v3 = vld [vmem:[#allocation32_spill] sm:$0xff] }
 0x2d2   :  { %2579 = vrcp.f32 %v741_v5  ;;  %vm747_vm15 = vweird.f32 %v741_v5 }
 0x2d5   :  { %v2578_v13 = vpop.eup %2577 }
 0x2d6   :  { %v721_v7 = vadd.f32 1.0, %v2578_v13  ;;  %v230_v13 = vadd.f32 %v5434_v3, %v3466_v38 }
 0x2d8   :  { %2581 = vrcp.f32 %v721_v7  ;;  %v2580_v8 = vpop.eup %2579  ;;  %v733_v50 = vand.u32 2147483648, %v721_v7  ;;  %v731_v9 = vand.u32 2147483647, %v721_v7  ;;  %vm727_vm11 = vweird.f32 %v721_v7 }
 0x2d9   :  { %v743_v10 = vmul.f32 %v2580_v8, %v741_v5  ;;  %vm748_vm14 = vweird.f32 %v2580_v8 }
 0x2da   :  { %v734_v39 = vor.u32 1.1754944e-38, %v733_v50  ;;  %vm732_vm13 = vcmp.eq.f32.partialorder %v731_v9, 8.507059e+37  ;;  %vm749_vm0 = vmor %vm747_vm15, %vm748_vm14 }
 0x2db   :  { %v744_v15 = vsub.f32 1.0, %v743_v10  ;;  %v753_v10 = vand.u32 2147483648, %v741_v5 }
 0x2dd   :  { %v745_v29 = vmul.f32 %v2580_v8, %v744_v15 }
 0x2de   :  { %v2582_v12 = vpop.eup %2581 }
 0x2df   :  { %v723_v14 = vmul.f32 %v2582_v12, %v721_v7  ;;  %vm728_vm10 = vweird.f32 %v2582_v12  ;;  %v746_v43 = vadd.f32 %v2580_v8, %v745_v29  ;;  %v754_v7 = vor.u32 1.1754944e-38, %v753_v10 }
 0x2e0   :  { %vm729_vm12 = vmor %vm727_vm11, %vm728_vm10 }
 0x2e1   :  { %v724_v16 = vsub.f32 1.0, %v723_v14 }
 0x2e3   :  { %v725_v20 = vmul.f32 %v2582_v12, %v724_v16  ;;  %v751_v16 = vand.u32 2147483647, %v741_v5 }
 0x2e5   :  { %v726_v55 = vadd.f32 %v2582_v12, %v725_v20  ;;  %v750_v20 = vsel %vm749_vm0, %v2580_v8, %v746_v43  ;;  %vm752_vm1 = vcmp.eq.f32.partialorder %v751_v16, 8.507059e+37  ;;  %v5436_v8 = vld [vmem:[#allocation23_spill] sm:$0xff] }
 0x2e6   :  { %v755_v50 = vsel %vm752_vm1, %v754_v7, %v750_v20 }
 0x2e7   :  { %v730_v11 = vsel %vm729_vm12, %v2582_v12, %v726_v55  ;;  %v780_v0 = vsub.f32 1.0, %v755_v50  ;;  %v782_v9 = vmul.f32 %v755_v50, %v3618_v17 }
 0x2e8   :  { %v735_v46 = vsel %vm732_vm13, %v734_v39, %v730_v11 }
 0x2e9   :  { %v777_v14 = vmul.f32 %v775_v60, %v735_v46 }
 0x2eb   :  { %v778_v15 = vadd.f32 %v777_v14, %v230_v13 }
 0x2ed   :  { %2583 = vtanh.f32 %v778_v15 }
 0x2f3   :  { %v2584_v12 = vpop.eup %2583 }
 0x2f4   :  { %v781_v29 = vmul.f32 %v2584_v12, %v780_v0 }
 0x2f6   :  { %v3855_v55 = vadd.f32 %v782_v9, %v781_v29 }
 0x2f8   :  { %808 = vmatmul.f32.vlgmr.msrb.gmra.mxu2 %v3855_v55  ;;  %828 = vmatmul.f32.vlgmr.msra.gmra.mxu3 %v3855_v55 }
 0x2f9   :  { %888 = vmatmul.f32.vlgmr.msra.gmra.mxu0 %v3855_v55  ;;  %1102 = vmatpush.msrb.mxu2 %v3626_v18 }
 0x2fa   :  { %1137 = vmatpush.msra.mxu3 %v3632_v21  ;;  %1157 = vmatpush.msra.mxu0 %v3638_v22  ;;  %v2740_v21 = vld [vmem:[%s5304_s4 + $0xc8] sm:$0xff]  ;;  %v2741_v22 = vld [vmem:[%s5304_s4 + $0xb8] sm:$0xff] }
 0x2fb   :  { %1103 = vmatpush.msrb.mxu2 %v3644_v24 }
 0x2fc   :  { %1138 = vmatpush.msra.mxu3 %v3650_v26  ;;  %1158 = vmatpush.msra.mxu0 %v3656_v27  ;;  %v2742_v26 = vld [vmem:[%s5304_s4 + $0xa8] sm:$0xff]  ;;  %v2743_v27 = vld [vmem:[%s5304_s4 + $0x98] sm:$0xff] }
 0x2fd   :  { %1104 = vmatpush.msrb.mxu2 %v3662_v30 }
 0x2fe   :  { %1139 = vmatpush.msra.mxu3 %v3668_v32  ;;  %1159 = vmatpush.msra.mxu0 %v3674_v36  ;;  %v2744_v32 = vld [vmem:[%s5304_s4 + $0x88] sm:$0xff]  ;;  %v2745_v36 = vld [vmem:[%s5304_s4 + $0x78] sm:$0xff] }
 0x2ff   :  { %1105 = vmatpush.msrb.mxu2 %v3680_v37 }
 0x300   :  { %1140 = vmatpush.msra.mxu3 %v3686_v40  ;;  %1160 = vmatpush.msra.mxu0 %v2740_v21  ;;  %v2746_v40 = vld [vmem:[%s5304_s4 + $0x68] sm:$0xff] }
 0x301   :  { %1106 = vmatpush.msrb.mxu2 %v3693_v45 }
 0x302   :  { %1141 = vmatpush.msra.mxu3 %v3699_v58  ;;  %1161 = vmatpush.msra.mxu0 %v2741_v22  ;;  %v2747_v58 = vld [vmem:[%s5304_s4 + $0x58] sm:$0xff] }
 0x303   :  { %1107 = vmatpush.msrb.mxu2 %v3706_v47 }
 0x304   :  { %1142 = vmatpush.msra.mxu3 %v3712_v28  ;;  %1162 = vmatpush.msra.mxu0 %v2742_v26  ;;  %v2748_v28 = vld [vmem:[%s5304_s4 + $0x48] sm:$0xff] }
 0x305   :  { %1108 = vmatpush.msrb.mxu2 %v3719_v48 }
 0x306   :  { %1143 = vmatpush.msra.mxu3 %v3725_v61  ;;  %1163 = vmatpush.msra.mxu0 %v2743_v27  ;;  %v2749_v61 = vld [vmem:[%s5304_s4 + $0x38] sm:$0xff] }
 0x307   :  { %1109 = vmatpush.msrb.mxu2 %v3732_v49 }
 0x308   :  { %1144 = vmatpush.msra.mxu3 %v3738_v63  ;;  %1164 = vmatpush.msra.mxu0 %v2744_v32  ;;  %v2750_v63 = vld [vmem:[%s5304_s4 + $0x28] sm:$0xff] }
 0x309   :  { %1110 = vmatpush.msrb.mxu2 %v3745_v51 }
 0x30a   :  { %1145 = vmatpush.msra.mxu3 %v3751_v44  ;;  %1165 = vmatpush.msra.mxu0 %v2745_v36  ;;  %v2751_v44 = vld [vmem:[%s5304_s4 + $0x18] sm:$0xff] }
 0x30b   :  { %1111 = vmatpush.msrb.mxu2 %v3758_v52 }
 0x30c   :  { %1146 = vmatpush.msra.mxu3 %v3764_v2  ;;  %1166 = vmatpush.msra.mxu0 %v2746_v40  ;;  %v2752_v2 = vld [vmem:[%s5304_s4 + $0x8] sm:$0xff]  ;;  %v5437_v40 = vld [vmem:[#allocation34_spill] sm:$0xff] }
 0x30d   :  { %1112 = vmatpush.msrb.mxu2 %v3771_v53 }
 0x30e   :  { %1147 = vmatpush.msra.mxu3 %v3777_v59  ;;  %1167 = vmatpush.msra.mxu0 %v2747_v58  ;;  %v233_v58 = vadd.f32 %v5437_v40, %v3466_v38 }
 0x30f   :  { %1113 = vmatpush.msrb.mxu2 %v3784_v54 }
 0x310   :  { %1148 = vmatpush.msra.mxu3 %v3790_v34  ;;  %1168 = vmatpush.msra.mxu0 %v2748_v28 }
 0x311   :  { %1114 = vmatpush.msrb.mxu2 %v3797_v56 }
 0x312   :  { %1149 = vmatpush.msra.mxu3 %v3803_v41  ;;  %1169 = vmatpush.msra.mxu0 %v2749_v61  ;;  %v5435_v41 = vld [vmem:[#allocation33_spill] sm:$0xff] }
 0x313   :  { %1115 = vmatpush.msrb.mxu2 %v3810_v57 }
 0x314   :  { %1150 = vmatpush.msra.mxu3 %v3816_v31  ;;  %1170 = vmatpush.msra.mxu0 %v2750_v63  ;;  %v192_v31 = vadd.f32 %v5435_v41, %v5427_v19 }
 0x315   :  { %1116 = vmatpush.msrb.mxu2 %v3823_v1 }
 0x316   :  { %1151 = vmatpush.msra.mxu3 %v3829_v62  ;;  %1171 = vmatpush.msra.mxu0 %v2751_v44 }
 0x317   :  { %1117 = vmatpush.msrb.mxu2 %v3836_v6 }
 0x318   :  { %1152 = vmatpush.msra.mxu3 %v3842_v42  ;;  %1172 = vmatpush.msra.mxu0 %v2752_v2 }
 0x376   :  { %v889_v9 = vpop.f32.mrf.mxu0 }
 0x377   :  { %v890_v26 = vadd.f32 %v3463_v35, %v889_v9 }
 0x37b   :  { %v809_v59 = vpop.f32.mrf.mxu2  ;;  %v829_v34 = vpop.f32.mrf.mxu3 }
 0x37c   :  { %v810_v62 = vadd.f32 %v809_v59, %v5429_v23  ;;  %v830_v5 = vadd.f32 %v829_v34, %v5430_v25 }
 0x37e   :  { %v832_v39 = vadd.f32 %v810_v62, %v5436_v8  ;;  %v852_v60 = vadd.f32 %v830_v5, %v192_v31  ;;  %v1279_v8 = vld [vmem:[%s5311_s8 + $0xc0] sm:$0xff] }
 0x380   :  { %v2517_v11 = vmul.f32 -1.442695, %v832_v39  ;;  %v2518_v43 = vmul.f32 -1.442695, %v852_v60  ;;  %v1276_v60 = vld [vmem:[%s5311_s8 + $0xa8] sm:$0xff] }
 0x382   :  { %2585 = vpow2.f32 %v2517_v11 }
 0x383   :  { %2587 = vpow2.f32 %v2518_v43  ;;  %v1273_v43 = vld [vmem:[%s5311_s8 + $0x90] sm:$0xff] }
 0x388   :  { %v2586_v42 = vpop.eup %2585 }
 0x389   :  { %v2588_v46 = vpop.eup %2587  ;;  %v836_v3 = vadd.f32 1.0, %v2586_v42 }
 0x38a   :  { %v856_v13 = vadd.f32 1.0, %v2588_v46  ;;  %v1270_v46 = vld [vmem:[%s5311_s8 + $0x78] sm:$0xff] }
 0x38b   :  { %2589 = vrcp.f32 %v836_v3  ;;  %v848_v7 = vand.u32 2147483648, %v836_v3  ;;  %v846_v12 = vand.u32 2147483647, %v836_v3  ;;  %vm842_vm3 = vweird.f32 %v836_v3 }
 0x38c   :  { %2591 = vrcp.f32 %v856_v13  ;;  %v868_v61 = vand.u32 2147483648, %v856_v13  ;;  %vm862_vm7 = vweird.f32 %v856_v13  ;;  %v866_v63 = vand.u32 2147483647, %v856_v13 }
 0x38d   :  { %v849_v22 = vor.u32 1.1754944e-38, %v848_v7  ;;  %vm847_vm5 = vcmp.eq.f32.partialorder %v846_v12, 8.507059e+37  ;;  %v1255_v7 = vld [vmem:[%s5311_s8] sm:$0xff] }
 0x38e   :  { %v869_v59 = vor.u32 1.1754944e-38, %v868_v61  ;;  %vm867_vm9 = vcmp.eq.f32.partialorder %v866_v63, 8.507059e+37  ;;  %v5440_v63 = vld [vmem:[#allocation36_spill] sm:$0xff] }
 0x391   :  { %v2590_v10 = vpop.eup %2589 }
 0x392   :  { %v2592_v14 = vpop.eup %2591  ;;  %v838_v16 = vmul.f32 %v2590_v10, %v836_v3  ;;  %vm843_vm2 = vweird.f32 %v2590_v10 }
 0x393   :  { %v858_v15 = vmul.f32 %v2592_v14, %v856_v13  ;;  %vm844_vm4 = vmor %vm842_vm3, %vm843_vm2  ;;  %vm863_vm6 = vweird.f32 %v2592_v14  ;;  %v1267_v13 = vld [vmem:[%s5311_s8 + $0x60] sm:$0xff] }
 0x394   :  { %v839_v20 = vsub.f32 1.0, %v838_v16  ;;  %vm864_vm8 = vmor %vm862_vm7, %vm863_vm6 }
 0x395   :  { %v859_v50 = vsub.f32 1.0, %v858_v15  ;;  %v1258_v15 = vld [vmem:[%s5311_s8 + $0x18] sm:$0xff] }
 0x396   :  { %v840_v0 = vmul.f32 %v2590_v10, %v839_v20 }
 0x397   :  { %v860_v29 = vmul.f32 %v2592_v14, %v859_v50 }
 0x398   :  { %v841_v21 = vadd.f32 %v2590_v10, %v840_v0 }
 0x399   :  { %v861_v36 = vadd.f32 %v2592_v14, %v860_v29 }
 0x39a   :  { %v845_v27 = vsel %vm844_vm4, %v2590_v10, %v841_v21  ;;  %v1264_v10 = vld [vmem:[%s5311_s8 + $0x48] sm:$0xff] }
 0x39b   :  { %v850_v32 = vsel %vm847_vm5, %v849_v22, %v845_v27  ;;  %v865_v2 = vsel %vm864_vm8, %v2592_v14, %v861_v36  ;;  %v1261_v14 = vld [vmem:[%s5311_s8 + $0x30] sm:$0xff] }
 0x39c   :  { %v892_v28 = vmul.f32 %v890_v26, %v850_v32  ;;  %v870_v34 = vsel %vm867_vm9, %v869_v59, %v865_v2 }
 0x39d   :  { %v895_v35 = vsub.f32 1.0, %v870_v34  ;;  %v897_v62 = vmul.f32 %v870_v34, %v3855_v55 }
 0x39e   :  { %v893_v44 = vadd.f32 %v892_v28, %v233_v58  ;;  %v4020_v28 = vld [vmem:[%s5308_s7] ss:$0 sm:$0xff] }
 0x3a0   :  { %2593 = vtanh.f32 %v893_v44  ;;  %v236_v44 = vadd.f32 %v5440_v63, %v3466_v38  ;;  %v1281_v63 = vld [vmem:[%s5311_s8 + $0xd0] sm:$0xff] }
 0x3a6   :  { %v2594_v41 = vpop.eup %2593 }
 0x3a7   :  { %v896_v31 = vmul.f32 %v2594_v41, %v895_v35 }
 0x3a9   :  { %v3943_v5 = vadd.f32 %v897_v62, %v896_v31 }
 0x3ab   :  { %923 = vmatmul.f32.vlgmr.msra.gmra.mxu1 %v3943_v5  ;;  %943 = vmatmul.f32.vlgmr.msra.gmra.mxu2 %v3943_v5 }
 0x3ac   :  { %1003 = vmatmul.f32.vlgmr.msrb.gmra.mxu3 %v3943_v5  ;;  %1217 = vmatpush.msra.mxu1 %v3626_v18  ;;  %v1300_v18 = vld [vmem:[%s5311_s8 + $0x168] sm:$0xff] }
 0x3ad   :  { %1311 = vmatpush.msra.mxu2 %v1300_v18 }
 0x3ae   :  { %1218 = vmatpush.msra.mxu1 %v3644_v24  ;;  %v1297_v24 = vld [vmem:[%s5311_s8 + $0x150] sm:$0xff] }
 0x3af   :  { %1312 = vmatpush.msra.mxu2 %v1297_v24 }
 0x3b0   :  { %1219 = vmatpush.msra.mxu1 %v3662_v30  ;;  %v1294_v30 = vld [vmem:[%s5311_s8 + $0x138] sm:$0xff] }
 0x3b1   :  { %1313 = vmatpush.msra.mxu2 %v1294_v30 }
 0x3b2   :  { %1220 = vmatpush.msra.mxu1 %v3680_v37  ;;  %v1291_v37 = vld [vmem:[%s5311_s8 + $0x120] sm:$0xff] }
 0x3b3   :  { %1314 = vmatpush.msra.mxu2 %v1291_v37 }
 0x3b4   :  { %1221 = vmatpush.msra.mxu1 %v3693_v45 }
 0x3b6   :  { %1222 = vmatpush.msra.mxu1 %v3706_v47 }
 0x3b8   :  { %1223 = vmatpush.msra.mxu1 %v3719_v48  ;;  %v1288_v48 = vld [vmem:[%s5311_s8 + $0x108] sm:$0xff] }
 0x3b9   :  { %1315 = vmatpush.msra.mxu2 %v1288_v48 }
 0x3ba   :  { %1224 = vmatpush.msra.mxu1 %v3732_v49  ;;  %v5438_v49 = vld [vmem:[#allocation24_spill] sm:$0xff] }
 0x3bc   :  { %1225 = vmatpush.msra.mxu1 %v3745_v51 }
 0x3be   :  { %1226 = vmatpush.msra.mxu1 %v3758_v52  ;;  %v1285_v52 = vld [vmem:[%s5311_s8 + $0xf0] sm:$0xff] }
 0x3bf   :  { %1316 = vmatpush.msra.mxu2 %v1285_v52  ;;  %v4046_v52 = vld [vmem:[%s5312_s10 + $0xe0] sm:$0xff] }
 0x3c0   :  { %1227 = vmatpush.msra.mxu1 %v3771_v53 }
 0x3c2   :  { %1228 = vmatpush.msra.mxu1 %v3784_v54  ;;  %v1282_v54 = vld [vmem:[%s5311_s8 + $0xd8] sm:$0xff] }
 0x3c3   :  { %1317 = vmatpush.msra.mxu2 %v1282_v54  ;;  %v4058_v54 = vld [vmem:[%s5312_s10 + $0xc0] sm:$0xff] }
 0x3c4   :  { %1229 = vmatpush.msra.mxu1 %v3797_v56 }
 0x3c5   :  { %1318 = vmatpush.msra.mxu2 %v1279_v8  ;;  %v1299_v8 = vld [vmem:[%s5311_s8 + $0x160] sm:$0xff] }
 0x3c6   :  { %1230 = vmatpush.msra.mxu1 %v3810_v57  ;;  %v5439_v57 = vld [vmem:[#allocation35_spill] sm:$0xff] }
 0x3c7   :  { %1319 = vmatpush.msra.mxu2 %v1276_v60  ;;  %v1295_v60 = vld [vmem:[%s5311_s8 + $0x140] sm:$0xff] }
 0x3c8   :  { %1231 = vmatpush.msra.mxu1 %v3823_v1  ;;  %v195_v1 = vadd.f32 %v5439_v57, %v5427_v19  ;;  %v1302_v57 = vld [vmem:[%s5311_s8 + $0x178] sm:$0xff] }
 0x3c9   :  { %1320 = vmatpush.msra.mxu2 %v1273_v43  ;;  %v4094_v43 = vld [vmem:[%s5312_s10 + $0x90] sm:$0xff] }
 0x3ca   :  { %1232 = vmatpush.msra.mxu1 %v3836_v6 }
 0x3cb   :  { %1321 = vmatpush.msra.mxu2 %v1270_v46 }
 0x3cd   :  { %1322 = vmatpush.msra.mxu2 %v1267_v13 }
 0x3cf   :  { %1323 = vmatpush.msra.mxu2 %v1264_v10 }
 0x3d1   :  { %1324 = vmatpush.msra.mxu2 %v1261_v14 }
 0x3d3   :  { %1325 = vmatpush.msra.mxu2 %v1258_v15  ;;  %v1293_v15 = vld [vmem:[%s5311_s8 + $0x130] sm:$0xff] }
 0x3d5   :  { %1326 = vmatpush.msra.mxu2 %v1255_v7  ;;  %v5442_v7 = vld [vmem:[#allocation25_spill] sm:$0xff] }
 0x428   :  { %v924_v45 = vpop.f32.mrf.mxu1 }
 0x429   :  { %v925_v47 = vadd.f32 %v924_v45, %v5429_v23 }
 0x42b   :  { %v947_v51 = vadd.f32 %v925_v47, %v5438_v49 }
 0x42d   :  { %v2519_v53 = vmul.f32 -1.442695, %v947_v51  ;;  %v4040_v51 = vld [vmem:[%s5312_s10 + $0xf0] sm:$0xff] }
 0x42e   :  { %v944_v56 = vpop.f32.mrf.mxu2 }
 0x42f   :  { %2595 = vpow2.f32 %v2519_v53  ;;  %v945_v6 = vadd.f32 %v944_v56, %v5430_v25  ;;  %v1004_v26 = vpop.f32.mrf.mxu3  ;;  %v4052_v53 = vld [vmem:[%s5312_s10 + $0xd0] sm:$0xff] }
 0x430   :  { %v1005_v61 = vadd.f32 %v4020_v28, %v1004_v26  ;;  %v1301_v56 = vld [vmem:[%s5311_s8 + $0x170] sm:$0xff]  ;;  %v1286_v26 = vld [vmem:[%s5311_s8 + $0xf8] sm:$0xff] }
 0x431   :  { %v967_v39 = vadd.f32 %v945_v6, %v195_v1  ;;  %v4070_v1 = vld [vmem:[%s5312_s10 + $0xb0] sm:$0xff]  ;;  %1352 = vmatpush.msrb.mxu3 %v1301_v56  ;;  %v1298_v6 = vld [vmem:[%s5311_s8 + $0x158] sm:$0xff] }
 0x432   :  { %v1269_v56 = vld [vmem:[%s5311_s8 + $0x70] sm:$0xff] }
 0x433   :  { %v2520_v11 = vmul.f32 -1.442695, %v967_v39  ;;  %v4082_v39 = vld [vmem:[%s5312_s10 + $0xa0] sm:$0xff]  ;;  %1353 = vmatpush.msrb.mxu3 %v1298_v6  ;;  %v1265_v6 = vld [vmem:[%s5311_s8 + $0x50] sm:$0xff] }
 0x435   :  { %v2596_v42 = vpop.eup %2595  ;;  %2597 = vpow2.f32 %v2520_v11  ;;  %v1296_v11 = vld [vmem:[%s5311_s8 + $0x148] sm:$0xff]  ;;  %1354 = vmatpush.msrb.mxu3 %v1295_v60  ;;  %v1262_v60 = vld [vmem:[%s5311_s8 + $0x38] sm:$0xff] }
 0x436   :  { %v951_v3 = vadd.f32 1.0, %v2596_v42 }
 0x438   :  { %2599 = vrcp.f32 %v951_v3  ;;  %v963_v9 = vand.u32 2147483648, %v951_v3  ;;  %v961_v21 = vand.u32 2147483647, %v951_v3  ;;  %vm957_vm11 = vweird.f32 %v951_v3 }
 0x43a   :  { %v964_v36 = vor.u32 1.1754944e-38, %v963_v9  ;;  %vm962_vm13 = vcmp.eq.f32.partialorder %v961_v21, 8.507059e+37  ;;  %v1290_v9 = vld [vmem:[%s5311_s8 + $0x118] sm:$0xff] }
 0x43b   :  { %v2598_v16 = vpop.eup %2597 }
 0x43c   :  { %v971_v20 = vadd.f32 1.0, %v2598_v16  ;;  %v1292_v16 = vld [vmem:[%s5311_s8 + $0x128] sm:$0xff] }
 0x43d   :  { %1355 = vmatpush.msrb.mxu3 %v1292_v16  ;;  %v1256_v16 = vld [vmem:[%s5311_s8 + $0x8] sm:$0xff] }
 0x43e   :  { %v2600_v50 = vpop.eup %2599  ;;  %2601 = vrcp.f32 %v971_v20  ;;  %v983_v34 = vand.u32 2147483648, %v971_v20  ;;  %v981_v41 = vand.u32 2147483647, %v971_v20  ;;  %vm977_vm15 = vweird.f32 %v971_v20 }
 0x43f   :  { %v953_v0 = vmul.f32 %v2600_v50, %v951_v3  ;;  %vm958_vm10 = vweird.f32 %v2600_v50  ;;  %v5441_v3 = vld [vmem:[#allocation37_spill] sm:$0xff] }
 0x440   :  { %vm959_vm12 = vmor %vm957_vm11, %vm958_vm10  ;;  %v984_v18 = vor.u32 1.1754944e-38, %v983_v34  ;;  %vm982_vm1 = vcmp.eq.f32.partialorder %v981_v41, 8.507059e+37  ;;  %v198_v13 = vadd.f32 %v5441_v3, %v5427_v19  ;;  %v4171_v34 = vld [vmem:[%s5312_s10 + $0x30] sm:$0xff]  ;;  %v1274_v41 = vld [vmem:[%s5311_s8 + $0x98] sm:$0xff] }
 0x441   :  { %v954_v12 = vsub.f32 1.0, %v953_v0  ;;  %v1260_v3 = vld [vmem:[%s5311_s8 + $0x28] sm:$0xff] }
 0x443   :  { %v955_v29 = vmul.f32 %v2600_v50, %v954_v12  ;;  %v1289_v12 = vld [vmem:[%s5311_s8 + $0x110] sm:$0xff] }
 0x444   :  { %v2602_v22 = vpop.eup %2601  ;;  %1356 = vmatpush.msrb.mxu3 %v1289_v12 }
 0x445   :  { %v973_v27 = vmul.f32 %v2602_v22, %v971_v20  ;;  %v956_v32 = vadd.f32 %v2600_v50, %v955_v29  ;;  %vm978_vm14 = vweird.f32 %v2602_v22  ;;  %v4110_v20 = vld [vmem:[%s5312_s10 + $0x80] sm:$0xff]  ;;  %v4123_v29 = vld [vmem:[%s5312_s10 + $0x70] sm:$0xff] }
 0x446   :  { %vm979_vm0 = vmor %vm977_vm15, %vm978_vm14  ;;  %1357 = vmatpush.msrb.mxu3 %v1286_v26 }
 0x447   :  { %v974_v40 = vsub.f32 1.0, %v973_v27  ;;  %v960_v58 = vsel %vm959_vm12, %v2600_v50, %v956_v32  ;;  %v1287_v27 = vld [vmem:[%s5311_s8 + $0x100] sm:$0xff] }
 0x448   :  { %v965_v2 = vsel %vm962_vm13, %v964_v36, %v960_v58  ;;  %v4135_v32 = vld [vmem:[%s5312_s10 + $0x60] sm:$0xff]  ;;  %v4147_v58 = vld [vmem:[%s5312_s10 + $0x50] sm:$0xff] }
 0x449   :  { %v975_v59 = vmul.f32 %v2602_v22, %v974_v40  ;;  %v1007_v35 = vmul.f32 %v1005_v61, %v965_v2  ;;  %v1283_v36 = vld [vmem:[%s5311_s8 + $0xe0] sm:$0xff]  ;;  %v1284_v40 = vld [vmem:[%s5311_s8 + $0xe8] sm:$0xff]  ;;  %v1277_v2 = vld [vmem:[%s5311_s8 + $0xb0] sm:$0xff] }
 0x44a   :  { %1358 = vmatpush.msrb.mxu3 %v1283_v36  ;;  %v1280_v61 = vld [vmem:[%s5311_s8 + $0xc8] sm:$0xff] }
 0x44b   :  { %v976_v31 = vadd.f32 %v2602_v22, %v975_v59  ;;  %v1008_v62 = vadd.f32 %v1007_v35, %v236_v44  ;;  %v4159_v44 = vld [vmem:[%s5312_s10 + $0x40] sm:$0xff]  ;;  %v1278_v59 = vld [vmem:[%s5311_s8 + $0xb8] sm:$0xff] }
 0x44c   :  { %1359 = vmatpush.msrb.mxu3 %v1280_v61 }
 0x44d   :  { %v980_v24 = vsel %vm979_vm0, %v2602_v22, %v976_v31  ;;  %2603 = vtanh.f32 %v1008_v62  ;;  %v1275_v31 = vld [vmem:[%s5311_s8 + $0xa0] sm:$0xff] }
 0x44e   :  { %v985_v30 = vsel %vm982_vm1, %v984_v18, %v980_v24  ;;  %1360 = vmatpush.msrb.mxu3 %v1277_v2  ;;  %v4183_v62 = vld [vmem:[%s5312_s10 + $0x20] sm:$0xff]  ;;  %v5443_v2 = vld [vmem:[#allocation38_spill] sm:$0xff] }
 0x44f   :  { %v1010_v37 = vsub.f32 1.0, %v985_v30  ;;  %v1012_v48 = vmul.f32 %v985_v30, %v3943_v5  ;;  %v1271_v30 = vld [vmem:[%s5311_s8 + $0x80] sm:$0xff] }
 0x450   :  { %1361 = vmatpush.msrb.mxu3 %v1274_v41 }
 0x452   :  { %1362 = vmatpush.msrb.mxu3 %v1271_v30 }
 0x453   :  { %v2604_v45 = vpop.eup %2603 }
 0x454   :  { %v1011_v47 = vmul.f32 %v2604_v45, %v1010_v37  ;;  %v1272_v37 = vld [vmem:[%s5311_s8 + $0x88] sm:$0xff]  ;;  %v4194_v45 = vld [vmem:[%s5312_s10 + $0x10] sm:$0xff] }
 0x456   :  { %v4026_v49 = vadd.f32 %v1012_v48, %v1011_v47  ;;  %v1268_v48 = vld [vmem:[%s5311_s8 + $0x68] sm:$0xff] }
 0x457   :  { %1363 = vmatpush.msrb.mxu3 %v1268_v48 }
 0x458   :  { %1038 = vmatmul.f32.vlgmr.msrb.gmra.mxu0 %v4026_v49  ;;  %1058 = vmatmul.f32.vlgmr.msrb.gmra.mxu1 %v4026_v49 }
 0x459   :  { %1118 = vmatmul.f32.vlgmr.msrb.gmra.mxu2 %v4026_v49  ;;  %1517 = vmatpush.msrb.mxu1 %v4040_v51 }
 0x45a   :  { %1393 = vmatpush.msrb.mxu0 %v1302_v57  ;;  %v4206_v57 = vld [vmem:[%s5312_s10] sm:$0xff]  ;;  %1364 = vmatpush.msrb.mxu3 %v1265_v6 }
 0x45b   :  { %1518 = vmatpush.msrb.mxu1 %v4046_v52 }
 0x45c   :  { %1394 = vmatpush.msrb.mxu0 %v1299_v8  ;;  %v1266_v8 = vld [vmem:[%s5311_s8 + $0x58] sm:$0xff]  ;;  %1365 = vmatpush.msrb.mxu3 %v1262_v60 }
 0x45d   :  { %1519 = vmatpush.msrb.mxu1 %v4052_v53 }
 0x45e   :  { %1395 = vmatpush.msrb.mxu0 %v1296_v11  ;;  %v1263_v11 = vld [vmem:[%s5311_s8 + $0x40] sm:$0xff] }
 0x45f   :  { %1520 = vmatpush.msrb.mxu1 %v4058_v54 }
 0x460   :  { %1396 = vmatpush.msrb.mxu0 %v1293_v15 }
 0x461   :  { %1327 = vmatmul.f32.vlgmr.msra.gmra.mxu2 %v3470_v33  ;;  %1521 = vmatpush.msrb.mxu1 %v4070_v1 }
 0x462   :  { %1397 = vmatpush.msrb.mxu0 %v1290_v9 }
 0x463   :  { %1522 = vmatpush.msrb.mxu1 %v4082_v39 }
 0x464   :  { %1398 = vmatpush.msrb.mxu0 %v1287_v27 }
 0x465   :  { %1523 = vmatpush.msrb.mxu1 %v4094_v43 }
 0x466   :  { %1399 = vmatpush.msrb.mxu0 %v1284_v40 }
 0x467   :  { %1524 = vmatpush.msrb.mxu1 %v4110_v20 }
 0x468   :  { %1400 = vmatpush.msrb.mxu0 %v1281_v63 }
 0x469   :  { %1330 = vmatmul.f32.gmra.mxu2 %v3555_v4  ;;  %1525 = vmatpush.msrb.mxu1 %v4123_v29 }
 0x46a   :  { %1401 = vmatpush.msrb.mxu0 %v1278_v59  ;;  %v239_v59 = vadd.f32 %v5443_v2, %v3466_v38  ;;  %v5446_v2 = vld [vmem:[#allocation26_spill] sm:$0xff] }
 0x46b   :  { %1526 = vmatpush.msrb.mxu1 %v4135_v32 }
 0x46c   :  { %1402 = vmatpush.msrb.mxu0 %v1275_v31 }
 0x46d   :  { %1527 = vmatpush.msrb.mxu1 %v4147_v58 }
 0x46e   :  { %1403 = vmatpush.msrb.mxu0 %v1272_v37 }
 0x46f   :  { %1528 = vmatpush.msrb.mxu1 %v4159_v44 }
 0x470   :  { %1404 = vmatpush.msrb.mxu0 %v1269_v56 }
 0x471   :  { %1333 = vmatmul.f32.gmra.mxu2 %v3618_v17  ;;  %1529 = vmatpush.msrb.mxu1 %v4171_v34 }
 0x472   :  { %1405 = vmatpush.msrb.mxu0 %v1266_v8 }
 0x473   :  { %1530 = vmatpush.msrb.mxu1 %v4183_v62 }
 0x474   :  { %1406 = vmatpush.msrb.mxu0 %v1263_v11  ;;  %v4243_v11 = vld [vmem:[%s5312_s10 + $0xf8] sm:$0xff] }
 0x475   :  { %1531 = vmatpush.msrb.mxu1 %v4194_v45 }
 0x476   :  { %1407 = vmatpush.msrb.mxu0 %v1260_v3  ;;  %v4274_v3 = vld [vmem:[%s5307_s1 + $0x8] sm:$0xff] }
 0x477   :  { %1532 = vmatpush.msrb.mxu1 %v4206_v57 }
 0x479   :  { %1336 = vmatmul.f32.gmra.mxu2 %v3855_v55 }
 0x481   :  { %1339 = vmatmul.f32.gmra.mxu2 %v3943_v5 }
 0x489   :  { %1342 = vmatmul.f32.gmra.mxu2 %v4026_v49 }
 0x4d5   :  { %v1039_v42 = vpop.f32.mrf.mxu0  ;;  %v1059_v46 = vpop.f32.mrf.mxu1 }
 0x4d6   :  { %v1040_v10 = vadd.f32 %v1039_v42, %v5429_v23  ;;  %v1060_v14 = vadd.f32 %v1059_v46, %v5430_v25  ;;  %v1259_v46 = vld [vmem:[%s5311_s8 + $0x20] sm:$0xff] }
 0x4d7   :  { %1366 = vmatpush.msrb.mxu3 %v1259_v46  ;;  %v4267_v46 = vld [vmem:[%s5312_s10 + $0xc8] sm:$0xff] }
 0x4d8   :  { %v1062_v50 = vadd.f32 %v1040_v10, %v5442_v7  ;;  %v1082_v0 = vadd.f32 %v1060_v14, %v198_v13  ;;  %v1257_v7 = vld [vmem:[%s5311_s8 + $0x10] sm:$0xff] }
 0x4d9   :  { %1367 = vmatpush.msrb.mxu3 %v1256_v16  ;;  %1408 = vmatpush.msrb.mxu0 %v1257_v7  ;;  %v4313_v16 = vld [vmem:[%s5312_s10 + $0x78] sm:$0xff] }
 0x4da   :  { %v2521_v21 = vmul.f32 -1.442695, %v1062_v50  ;;  %v2522_v22 = vmul.f32 -1.442695, %v1082_v0  ;;  %v4330_v7 = vld [vmem:[%s5312_s10 + $0x58] sm:$0xff] }
 0x4dc   :  { %2605 = vpow2.f32 %v2521_v21 }
 0x4dd   :  { %2607 = vpow2.f32 %v2522_v22  ;;  %v1119_v22 = vpop.f32.mrf.mxu2 }
 0x4de   :  { %v1120_v40 = vadd.f32 %v4020_v28, %v1119_v22 }
 0x4e2   :  { %v2606_v35 = vpop.eup %2605 }
 0x4e3   :  { %v2608_v18 = vpop.eup %2607  ;;  %v1066_v24 = vadd.f32 1.0, %v2606_v35 }
 0x4e4   :  { %v1086_v47 = vadd.f32 1.0, %v2608_v18 }
 0x4e5   :  { %2609 = vrcp.f32 %v1066_v24  ;;  %v1078_v0 = vand.u32 2147483648, %v1066_v24  ;;  %v1076_v9 = vand.u32 2147483647, %v1066_v24  ;;  %vm1072_vm3 = vweird.f32 %v1066_v24 }
 0x4e6   :  { %2611 = vrcp.f32 %v1086_v47  ;;  %v1098_v35 = vand.u32 2147483648, %v1086_v47  ;;  %vm1092_vm7 = vweird.f32 %v1086_v47  ;;  %v1096_v31 = vand.u32 2147483647, %v1086_v47 }
 0x4e7   :  { %v1079_v27 = vor.u32 1.1754944e-38, %v1078_v0  ;;  %vm1077_vm5 = vcmp.eq.f32.partialorder %v1076_v9, 8.507059e+37  ;;  %v4355_v0 = vld [vmem:[%s5312_s10 + $0x28] sm:$0xff] }
 0x4e8   :  { %vm1097_vm9 = vcmp.eq.f32.partialorder %v1096_v31, 8.507059e+37  ;;  %v4376_v9 = vld [vmem:[%s5312_s10 + $0x8] sm:$0xff] }
 0x4e9   :  { %5444 = vst [vmem:[#allocation18_spill] sm:$0xff] %v4376_v9 }
 0x4eb   :  { %v2610_v42 = vpop.eup %2609 }
 0x4ec   :  { %v2612_v13 = vpop.eup %2611  ;;  %v1068_v10 = vmul.f32 %v2610_v42, %v1066_v24  ;;  %vm1073_vm2 = vweird.f32 %v2610_v42  ;;  %v1099_v24 = vor.u32 1.1754944e-38, %v1098_v35  ;;  %v4461_v35 = vld [vmem:[%s5313_s11 + $0x48] sm:$0xff] }
 0x4ed   :  { %v1088_v14 = vmul.f32 %v2612_v13, %v1086_v47  ;;  %vm1074_vm4 = vmor %vm1072_vm3, %vm1073_vm2  ;;  %vm1093_vm6 = vweird.f32 %v2612_v13  ;;  %v4252_v47 = vld [vmem:[%s5312_s10 + $0xe8] sm:$0xff] }
 0x4ee   :  { %v1069_v15 = vsub.f32 1.0, %v1068_v10  ;;  %vm1094_vm8 = vmor %vm1092_vm7, %vm1093_vm6  ;;  %v4290_v10 = vld [vmem:[%s5312_s10 + $0xa8] sm:$0xff] }
 0x4ef   :  { %v1089_v50 = vsub.f32 1.0, %v1088_v14  ;;  %v4297_v14 = vld [vmem:[%s5312_s10 + $0x98] sm:$0xff] }
 0x4f0   :  { %v1070_v12 = vmul.f32 %v2610_v42, %v1069_v15  ;;  %v4322_v15 = vld [vmem:[%s5312_s10 + $0x68] sm:$0xff] }
 0x4f1   :  { %v1090_v21 = vmul.f32 %v2612_v13, %v1089_v50  ;;  %v4346_v50 = vld [vmem:[%s5312_s10 + $0x38] sm:$0xff] }
 0x4f2   :  { %v1071_v26 = vadd.f32 %v2610_v42, %v1070_v12  ;;  %v4360_v12 = vld [vmem:[%s5313_s11 + $0x78] sm:$0xff] }
 0x4f3   :  { %v1091_v63 = vadd.f32 %v2612_v13, %v1090_v21  ;;  %1600 = vmatpush.msrb.mxu2 %v4360_v12 }
 0x4f4   :  { %v1075_v36 = vsel %vm1074_vm4, %v2610_v42, %v1071_v26  ;;  %v4259_v42 = vld [vmem:[%s5312_s10 + $0xd8] sm:$0xff] }
 0x4f5   :  { %v1080_v61 = vsel %vm1077_vm5, %v1079_v27, %v1075_v36  ;;  %v1095_v30 = vsel %vm1094_vm8, %v2612_v13, %v1091_v63  ;;  %v4280_v13 = vld [vmem:[%s5312_s10 + $0xb8] sm:$0xff]  ;;  %v4431_v27 = vld [vmem:[%s5313_s11 + $0x68] sm:$0xff]  ;;  %v4436_v36 = vld [vmem:[%s5313_s11 + $0x60] sm:$0xff] }
 0x4f6   :  { %v1122_v41 = vmul.f32 %v1120_v40, %v1080_v61  ;;  %v1100_v37 = vsel %vm1097_vm9, %v1099_v24, %v1095_v30  ;;  %v4452_v63 = vld [vmem:[%s5313_s11 + $0x50] sm:$0xff] }
 0x4f7   :  { %v1125_v48 = vsub.f32 1.0, %v1100_v37  ;;  %v1127_v8 = vmul.f32 %v1100_v37, %v4026_v49  ;;  %v4492_v37 = vld [vmem:[%s5313_s11 + $0x30] sm:$0xff] }
 0x4f8   :  { %v1123_v18 = vadd.f32 %v1122_v41, %v239_v59  ;;  %v4469_v41 = vld [vmem:[%s5313_s11 + $0x40] sm:$0xff] }
 0x4fa   :  { %2613 = vtanh.f32 %v1123_v18  ;;  %v4477_v18 = vld [vmem:[%s5313_s11 + $0x38] sm:$0xff] }
 0x500   :  { %v2614_v56 = vpop.eup %2613 }
 0x501   :  { %v1126_v6 = vmul.f32 %v2614_v56, %v1125_v48  ;;  %v4499_v56 = vld [vmem:[%s5313_s11 + $0x28] sm:$0xff] }
 0x503   :  { %v4238_v60 = vadd.f32 %v1127_v8, %v1126_v6  ;;  %v4509_v8 = vld [vmem:[%s5313_s11 + $0x20] sm:$0xff] }
 0x505   :  { %1153 = vmatmul.f32.vlgmr.msra.gmra.mxu3 %v4238_v60  ;;  %1173 = vmatmul.f32.vlgmr.msra.gmra.mxu0 %v4238_v60 }
 0x506   :  { %1233 = vmatmul.f32.vlgmr.msra.gmra.mxu1 %v4238_v60  ;;  %1345 = vmatmul.f32.gmra.mxu2 %v4238_v60 }
 0x507   :  { %1537 = vmatpush.msra.mxu1 %v4243_v11  ;;  %1631 = vmatpush.msra.mxu3 %v4040_v51 }
 0x508   :  { %1651 = vmatpush.msra.mxu0 %v4243_v11 }
 0x509   :  { %1538 = vmatpush.msra.mxu1 %v4252_v47  ;;  %1632 = vmatpush.msra.mxu3 %v4046_v52 }
 0x50a   :  { %1652 = vmatpush.msra.mxu0 %v4252_v47 }
 0x50b   :  { %1539 = vmatpush.msra.mxu1 %v4259_v42  ;;  %1633 = vmatpush.msra.mxu3 %v4052_v53 }
 0x50c   :  { %1653 = vmatpush.msra.mxu0 %v4259_v42 }
 0x50d   :  { %1540 = vmatpush.msra.mxu1 %v4267_v46  ;;  %1368 = vmatmul.f32.vlgmr.msrb.gmra.mxu3 %v3470_v33 }
 0x50e   :  { %1409 = vmatmul.f32.vlgmr.msrb.gmra.mxu0 %v3470_v33  ;;  %1533 = vmatmul.f32.vlgmr.msrb.gmra.mxu1 %v4274_v3  ;;  %v4305_v33 = vld [vmem:[%s5312_s10 + $0x88] sm:$0xff] }
 0x50f   :  { %1541 = vmatpush.msra.mxu1 %v4280_v13  ;;  %1634 = vmatpush.msra.mxu3 %v4058_v54 }
 0x510   :  { %1654 = vmatpush.msra.mxu0 %v4267_v46 }
 0x511   :  { %1542 = vmatpush.msra.mxu1 %v4290_v10  ;;  %1635 = vmatpush.msra.mxu3 %v4070_v1 }
 0x512   :  { %1655 = vmatpush.msra.mxu0 %v4280_v13 }
 0x513   :  { %1543 = vmatpush.msra.mxu1 %v4297_v14  ;;  %1636 = vmatpush.msra.mxu3 %v4082_v39 }
 0x514   :  { %1656 = vmatpush.msra.mxu0 %v4290_v10 }
 0x515   :  { %1544 = vmatpush.msra.mxu1 %v4305_v33  ;;  %1371 = vmatmul.f32.gmra.mxu3 %v3555_v4 }
 0x516   :  { %1412 = vmatmul.f32.gmra.mxu0 %v3555_v4  ;;  %1637 = vmatpush.msra.mxu3 %v4094_v43  ;;  %v4338_v4 = vld [vmem:[%s5312_s10 + $0x48] sm:$0xff] }
 0x517   :  { %1545 = vmatpush.msra.mxu1 %v4313_v16  ;;  %1657 = vmatpush.msra.mxu0 %v4297_v14 }
 0x518   :  { %1638 = vmatpush.msra.mxu3 %v4110_v20 }
 0x519   :  { %1546 = vmatpush.msra.mxu1 %v4322_v15  ;;  %1658 = vmatpush.msra.mxu0 %v4305_v33 }
 0x51a   :  { %1639 = vmatpush.msra.mxu3 %v4123_v29 }
 0x51b   :  { %1547 = vmatpush.msra.mxu1 %v4330_v7  ;;  %1659 = vmatpush.msra.mxu0 %v4313_v16 }
 0x51c   :  { %1640 = vmatpush.msra.mxu3 %v4135_v32 }
 0x51d   :  { %1548 = vmatpush.msra.mxu1 %v4338_v4  ;;  %1374 = vmatmul.f32.gmra.mxu3 %v3618_v17 }
 0x51e   :  { %1415 = vmatmul.f32.gmra.mxu0 %v3618_v17  ;;  %1641 = vmatpush.msra.mxu3 %v4147_v58  ;;  %v4368_v17 = vld [vmem:[%s5312_s10 + $0x18] sm:$0xff] }
 0x51f   :  { %1549 = vmatpush.msra.mxu1 %v4346_v50  ;;  %1660 = vmatpush.msra.mxu0 %v4322_v15 }
 0x520   :  { %1642 = vmatpush.msra.mxu3 %v4159_v44 }
 0x521   :  { %1550 = vmatpush.msra.mxu1 %v4355_v0  ;;  %1661 = vmatpush.msra.mxu0 %v4330_v7 }
 0x522   :  { %1643 = vmatpush.msra.mxu3 %v4171_v34 }
 0x523   :  { %1551 = vmatpush.msra.mxu1 %v4368_v17  ;;  %1662 = vmatpush.msra.mxu0 %v4338_v4 }
 0x524   :  { %1644 = vmatpush.msra.mxu3 %v4183_v62 }
 0x525   :  { %1552 = vmatpush.msra.mxu1 %v4376_v9  ;;  %1377 = vmatmul.f32.gmra.mxu3 %v3855_v55 }
 0x526   :  { %1553 = vmatmul.f32.vlgmr.msra.gmra.mxu1 %v4274_v3  ;;  %1418 = vmatmul.f32.gmra.mxu0 %v3855_v55  ;;  %v4420_v55 = vld [vmem:[%s5313_s11 + $0x70] sm:$0xff] }
 0x527   :  { %1711 = vmatpush.msrb.mxu1 %v4360_v12  ;;  %1645 = vmatpush.msra.mxu3 %v4194_v45 }
 0x528   :  { %1663 = vmatpush.msra.mxu0 %v4346_v50  ;;  %1601 = vmatpush.msrb.mxu2 %v4420_v55 }
 0x529   :  { %1646 = vmatpush.msra.mxu3 %v4206_v57  ;;  %1712 = vmatpush.msrb.mxu1 %v4420_v55 }
 0x52a   :  { %1664 = vmatpush.msra.mxu0 %v4355_v0  ;;  %1602 = vmatpush.msrb.mxu2 %v4431_v27 }
 0x52b   :  { %1763 = vmatpush.msrb.mxu3 %v4243_v11  ;;  %1713 = vmatpush.msrb.mxu1 %v4431_v27 }
 0x52c   :  { %1665 = vmatpush.msra.mxu0 %v4368_v17  ;;  %1603 = vmatpush.msrb.mxu2 %v4436_v36 }
 0x52d   :  { %1764 = vmatpush.msrb.mxu3 %v4252_v47  ;;  %1714 = vmatpush.msrb.mxu1 %v4436_v36 }
 0x52e   :  { %1380 = vmatmul.f32.gmra.mxu3 %v3943_v5  ;;  %1421 = vmatmul.f32.gmra.mxu0 %v3943_v5 }
 0x52f   :  { %1765 = vmatpush.msrb.mxu3 %v4259_v42  ;;  %1666 = vmatpush.msra.mxu0 %v4376_v9 }
 0x531   :  { %1823 = vmatpush.msrb.mxu0 %v4360_v12  ;;  %1766 = vmatpush.msrb.mxu3 %v4267_v46 }
 0x533   :  { %1767 = vmatpush.msrb.mxu3 %v4280_v13  ;;  %1824 = vmatpush.msrb.mxu0 %v4420_v55 }
 0x535   :  { %1768 = vmatpush.msrb.mxu3 %v4290_v10  ;;  %1825 = vmatpush.msrb.mxu0 %v4431_v27 }
 0x536   :  { %1383 = vmatmul.f32.gmra.mxu3 %v4026_v49  ;;  %1424 = vmatmul.f32.gmra.mxu0 %v4026_v49  ;;  %v5445_v49 = vld [vmem:[#allocation39_spill] sm:$0xff] }
 0x537   :  { %1769 = vmatpush.msrb.mxu3 %v4297_v14  ;;  %v201_v21 = vadd.f32 %v5445_v49, %v5427_v19  ;;  %v4443_v19 = vld [vmem:[%s5313_s11 + $0x58] sm:$0xff]  ;;  %1826 = vmatpush.msrb.mxu0 %v4436_v36 }
 0x538   :  { %1604 = vmatpush.msrb.mxu2 %v4443_v19  ;;  %1715 = vmatpush.msrb.mxu1 %v4443_v19 }
 0x539   :  { %1770 = vmatpush.msrb.mxu3 %v4305_v33  ;;  %1827 = vmatpush.msrb.mxu0 %v4443_v19 }
 0x53a   :  { %1605 = vmatpush.msrb.mxu2 %v4452_v63  ;;  %1716 = vmatpush.msrb.mxu1 %v4452_v63 }
 0x53b   :  { %1771 = vmatpush.msrb.mxu3 %v4313_v16  ;;  %1828 = vmatpush.msrb.mxu0 %v4452_v63 }
 0x53c   :  { %1606 = vmatpush.msrb.mxu2 %v4461_v35  ;;  %1717 = vmatpush.msrb.mxu1 %v4461_v35 }
 0x53d   :  { %1772 = vmatpush.msrb.mxu3 %v4322_v15  ;;  %1829 = vmatpush.msrb.mxu0 %v4461_v35 }
 0x53e   :  { %1386 = vmatmul.f32.gmra.mxu3 %v4238_v60  ;;  %1427 = vmatmul.f32.gmra.mxu0 %v4238_v60 }
 0x53f   :  { %1773 = vmatpush.msrb.mxu3 %v4330_v7  ;;  %1607 = vmatpush.msrb.mxu2 %v4469_v41 }
 0x540   :  { %1718 = vmatpush.msrb.mxu1 %v4469_v41  ;;  %1830 = vmatpush.msrb.mxu0 %v4469_v41 }
 0x541   :  { %1774 = vmatpush.msrb.mxu3 %v4338_v4  ;;  %1608 = vmatpush.msrb.mxu2 %v4477_v18 }
 0x542   :  { %1719 = vmatpush.msrb.mxu1 %v4477_v18  ;;  %1831 = vmatpush.msrb.mxu0 %v4477_v18 }
 0x543   :  { %1775 = vmatpush.msrb.mxu3 %v4346_v50  ;;  %1609 = vmatpush.msrb.mxu2 %v4492_v37 }
 0x544   :  { %1720 = vmatpush.msrb.mxu1 %v4492_v37  ;;  %1832 = vmatpush.msrb.mxu0 %v4492_v37 }
 0x545   :  { %1776 = vmatpush.msrb.mxu3 %v4355_v0  ;;  %1610 = vmatpush.msrb.mxu2 %v4499_v56 }
 0x546   :  { %1721 = vmatpush.msrb.mxu1 %v4499_v56  ;;  %1833 = vmatpush.msrb.mxu0 %v4499_v56 }
 0x547   :  { %1777 = vmatpush.msrb.mxu3 %v4368_v17  ;;  %1611 = vmatpush.msrb.mxu2 %v4509_v8 }
 0x548   :  { %1722 = vmatpush.msrb.mxu1 %v4509_v8  ;;  %1834 = vmatpush.msrb.mxu0 %v4509_v8 }
 0x549   :  { %1778 = vmatpush.msrb.mxu3 %v4376_v9 }
 0x582   :  { %v1174_v5 = vpop.f32.mrf.mxu0 }
 0x583   :  { %v1175_v22 = vadd.f32 %v1174_v5, %v5430_v25  ;;  %v4517_v5 = vld [vmem:[%s5313_s11 + $0x18] sm:$0xff] }
 0x584   :  { %5447 = vst [vmem:[#allocation14_spill] sm:$0xff] %v4517_v5  ;;  %1612 = vmatpush.msrb.mxu2 %v4517_v5  ;;  %1723 = vmatpush.msrb.mxu1 %v4517_v5 }
 0x585   :  { %v1197_v26 = vadd.f32 %v1175_v22, %v201_v21  ;;  %v4527_v21 = vld [vmem:[%s5313_s11 + $0x10] sm:$0xff]  ;;  %1835 = vmatpush.msrb.mxu0 %v4517_v5 }
 0x586   :  { %5448 = vst [vmem:[#allocation11_spill] sm:$0xff] %v4527_v21  ;;  %1613 = vmatpush.msrb.mxu2 %v4527_v21  ;;  %1724 = vmatpush.msrb.mxu1 %v4527_v21 }
 0x587   :  { %v2524_v40 = vmul.f32 -1.442695, %v1197_v26  ;;  %v4534_v26 = vld [vmem:[%s5313_s11 + $0x8] sm:$0xff]  ;;  %1836 = vmatpush.msrb.mxu0 %v4527_v21 }
 0x588   :  { %v1154_v25 = vpop.f32.mrf.mxu3  ;;  %5449 = vst [vmem:[#allocation8_spill] sm:$0xff] %v4534_v26  ;;  %1614 = vmatpush.msrb.mxu2 %v4534_v26  ;;  %1725 = vmatpush.msrb.mxu1 %v4534_v26 }
 0x589   :  { %2615 = vpow2.f32 %v2524_v40  ;;  %v1155_v61 = vadd.f32 %v1154_v25, %v5429_v23  ;;  %v4540_v25 = vld [vmem:[%s5313_s11] sm:$0xff]  ;;  %1837 = vmatpush.msrb.mxu0 %v4534_v26 }
 0x58a   :  { %5450 = vst [vmem:[#allocation15_spill] sm:$0xff] %v4540_v25  ;;  %1615 = vmatpush.msrb.mxu2 %v4540_v25  ;;  %1726 = vmatpush.msrb.mxu1 %v4540_v25 }
 0x58b   :  { %v1177_v59 = vadd.f32 %v1155_v61, %v5446_v2  ;;  %1838 = vmatpush.msrb.mxu0 %v4540_v25 }
 0x58c   :  { %1743 = vmatpush.msra.mxu2 %v4040_v51  ;;  %1855 = vmatpush.msra.mxu1 %v4040_v51  ;;  %v5451_v51 = vld [vmem:[#allocation40_spill] sm:$0xff] }
 0x58d   :  { %v2523_v23 = vmul.f32 -1.442695, %v1177_v59 }
 0x58e   :  { %1744 = vmatpush.msra.mxu2 %v4046_v52  ;;  %1856 = vmatpush.msra.mxu1 %v4046_v52 }
 0x58f   :  { %v2616_v31 = vpop.eup %2615  ;;  %2617 = vpow2.f32 %v2523_v23 }
 0x590   :  { %v4480_v30 = vadd.f32 1.0, %v2616_v31  ;;  %1745 = vmatpush.msra.mxu2 %v4052_v53  ;;  %1857 = vmatpush.msra.mxu1 %v4052_v53 }
 0x592   :  { %2619 = vrcp.f32 %v4480_v30  ;;  %1746 = vmatpush.msra.mxu2 %v4058_v54  ;;  %vm1207_vm15 = vweird.f32 %v4480_v30  ;;  %1858 = vmatpush.msra.mxu1 %v4058_v54 }
 0x594   :  { %1747 = vmatpush.msra.mxu2 %v4070_v1  ;;  %1859 = vmatpush.msra.mxu1 %v4070_v1 }
 0x595   :  { %v2618_v24 = vpop.eup %2617 }
 0x596   :  { %v1181_v48 = vadd.f32 1.0, %v2618_v24  ;;  %v1234_v24 = vpop.f32.mrf.mxu1  ;;  %1748 = vmatpush.msra.mxu2 %v4082_v39  ;;  %1860 = vmatpush.msra.mxu1 %v4082_v39 }
 0x598   :  { %2621 = vrcp.f32 %v1181_v48  ;;  %v4504_v6 = vpop.eup %2619  ;;  %v1193_v59 = vand.u32 2147483648, %v1181_v48  ;;  %v1191_v31 = vand.u32 2147483647, %v1181_v48  ;;  %vm1187_vm11 = vweird.f32 %v1181_v48  ;;  %1749 = vmatpush.msra.mxu2 %v4094_v43  ;;  %1861 = vmatpush.msra.mxu1 %v4094_v43  ;;  %v1328_v43 = vpop.f32.mrf.mxu2 }
 0x599   :  { %v1203_v49 = vmul.f32 %v4504_v6, %v4480_v30  ;;  %vm1208_vm14 = vweird.f32 %v4504_v6 }
 0x59a   :  { %v1194_v26 = vor.u32 1.1754944e-38, %v1193_v59  ;;  %vm1192_vm13 = vcmp.eq.f32.partialorder %v1191_v31, 8.507059e+37  ;;  %vm1209_vm0 = vmor %vm1207_vm15, %vm1208_vm14  ;;  %1750 = vmatpush.msra.mxu2 %v4110_v20  ;;  %1862 = vmatpush.msra.mxu1 %v4110_v20 }
 0x59b   :  { %v1204_v61 = vsub.f32 1.0, %v1203_v49 }
 0x59c   :  { %1751 = vmatpush.msra.mxu2 %v4123_v29  ;;  %1863 = vmatpush.msra.mxu1 %v4123_v29 }
 0x59d   :  { %v1205_v49 = vmul.f32 %v4504_v6, %v1204_v61  ;;  %v1213_v61 = vand.u32 2147483648, %v4480_v30 }
 0x59e   :  { %v2622_v22 = vpop.eup %2621  ;;  %1752 = vmatpush.msra.mxu2 %v4135_v32  ;;  %1864 = vmatpush.msra.mxu1 %v4135_v32 }
 0x59f   :  { %v1183_v40 = vmul.f32 %v2622_v22, %v1181_v48  ;;  %vm1188_vm10 = vweird.f32 %v2622_v22  ;;  %v1206_v5 = vadd.f32 %v4504_v6, %v1205_v49  ;;  %v242_v48 = vadd.f32 %v5451_v51, %v3466_v38 }
 0x5a0   :  { %vm1189_vm12 = vmor %vm1187_vm11, %vm1188_vm10  ;;  %v1214_v38 = vor.u32 1.1754944e-38, %v1213_v61  ;;  %1753 = vmatpush.msra.mxu2 %v4147_v58  ;;  %1865 = vmatpush.msra.mxu1 %v4147_v58  ;;  %v1369_v61 = vpop.f32.mrf.mxu3  ;;  %vm2461_vm10 = vcmask 7168  }
 0x5a1   :  { %v1184_v2 = vsub.f32 1.0, %v1183_v40  ;;  %v1210_v53 = vsel %vm1209_vm0, %v4504_v6, %v1206_v5  ;;  %v1506_v5 = vld [vmem:[%s5316_s12] sm:$0x3] }
 0x5a2   :  { %1754 = vmatpush.msra.mxu2 %v4159_v44  ;;  %1866 = vmatpush.msra.mxu1 %v4159_v44 }
 0x5a3   :  { %v1185_v23 = vmul.f32 %v2622_v22, %v1184_v2  ;;  %v1235_v2 = vadd.f32 %v4020_v28, %v1234_v24  ;;  %v1211_v28 = vand.u32 2147483647, %v4480_v30 }
 0x5a4   :  { %1755 = vmatpush.msra.mxu2 %v4171_v34  ;;  %1867 = vmatpush.msra.mxu1 %v4171_v34 }
 0x5a5   :  { %v1186_v40 = vadd.f32 %v2622_v22, %v1185_v23  ;;  %vm1212_vm1 = vcmp.eq.f32.partialorder %v1211_v28, 8.507059e+37 }
 0x5a6   :  { %1756 = vmatpush.msra.mxu2 %v4183_v62  ;;  %1868 = vmatpush.msra.mxu1 %v4183_v62 }
 0x5a7   :  { %v1190_v21 = vsel %vm1189_vm12, %v2622_v22, %v1186_v40  ;;  %v1303_v22 = vld [vmem:[%s5317_s9] sm:$0x7]  ;;  %v4625_v40 = vperm.slane %v1506_v5, 1 }
 0x5a8   :  { %v1195_v25 = vsel %vm1192_vm13, %v1194_v26, %v1190_v21  ;;  %v1215_v21 = vsel %vm1212_vm1, %v1214_v38, %v1210_v53  ;;  %1757 = vmatpush.msra.mxu2 %v4194_v45  ;;  %1869 = vmatpush.msra.mxu1 %v4194_v45  ;;  %v4617_v26 = vperm.slane %v1506_v5, 0  ;;  %v4621_v31 = vperm.slane %v1303_v22, 0 }
 0x5a9   :  { %v1237_v59 = vmul.f32 %v1235_v2, %v1195_v25  ;;  %v1240_v54 = vsub.f32 1.0, %v1215_v21  ;;  %v1242_v6 = vmul.f32 %v1215_v21, %v4238_v60  ;;  %v4609_v60 = vpop.f32.mrf.mxu2  ;;  %v1534_v25 = vpop.f32.mrf.mxu1  ;;  %5456 = vst [vmem:[#allocation10_spill] sm:$0xff] %v4625_v40 }
 0x5aa   :  { %1758 = vmatpush.msra.mxu2 %v4206_v57  ;;  %1870 = vmatpush.msra.mxu1 %v4206_v57  ;;  %5452 = vst [vmem:[#allocation12_spill] sm:$0xff] %v4609_v60  ;;  %v1535_v24 = vadd.f32 %v1534_v25, %v4617_v26  ;;  %v1329_v49 = vadd.f32 %v1328_v43, %v4621_v31 }
 0x5ab   :  { %v1238_v52 = vadd.f32 %v1237_v59, %v242_v48  ;;  %5453 = vst [vmem:[#allocation9_spill] sm:$0xff] %v4617_v26  ;;  %v4627_v48 = vperm.slane %v1303_v22, 1 }
 0x5ac   :  { %5455 = vst [vmem:[#allocation13_spill] sm:$0xff] %v4621_v31  ;;  %v1557_v2 = vadd.f32 %v1535_v24, %v1329_v49 }
 0x5ad   :  { %2623 = vtanh.f32 %v1238_v52  ;;  %5457 = vst [vmem:[#allocation17_spill] sm:$0xff] %v4627_v48  ;;  %v1370_v53 = vadd.f32 %v1369_v61, %v4627_v48 }
 0x5ae   :  { %v2525_v52 = vmul.f32 -1.442695, %v1557_v2 }
 0x5b0   :  { %2625 = vpow2.f32 %v2525_v52 }
 0x5b1   :  { %v4619_v23 = vpop.f32.mrf.mxu2  ;;  %v1554_v51 = vpop.f32.mrf.mxu1 }
 0x5b2   :  { %5454 = vst [vmem:[#allocation16_spill] sm:$0xff] %v4619_v23  ;;  %v1555_v28 = vadd.f32 %v1554_v51, %v4625_v40  ;;  %v21_v51 = vstv %s5318_s15 }
 0x5b3   :  { %v2624_v30 = vpop.eup %2623  ;;  %22 = vst [vmem:[#allocation7] sm:$0x1] %v21_v51 }
 0x5b4   :  { %v1241_v1 = vmul.f32 %v2624_v30, %v1240_v54  ;;  %v1577_v38 = vadd.f32 %v1555_v28, %v1370_v53 }
 0x5b6   :  { %v1243_v39 = vadd.f32 %v1242_v6, %v1241_v1  ;;  %v2526_v21 = vmul.f32 -1.442695, %v1577_v38  ;;  %v2626_v30 = vpop.eup %2625 }
 0x5b7   :  { %v1561_v1 = vadd.f32 1.0, %v2626_v30 }
 0x5b8   :  { %1348 = vmatmul.f32.gmra.mxu2 %v1243_v39  ;;  %1389 = vmatmul.f32.gmra.mxu3 %v1243_v39  ;;  %2627 = vpow2.f32 %v2526_v21 }
 0x5b9   :  { %1430 = vmatmul.f32.gmra.mxu0 %v1243_v39  ;;  %v4629_v59 = vpop.f32.mrf.mxu2  ;;  %2629 = vrcp.f32 %v1561_v1  ;;  %v1573_v21 = vand.u32 2147483648, %v1561_v1  ;;  %vm1567_vm3 = vweird.f32 %v1561_v1  ;;  %v1571_v30 = vand.u32 2147483647, %v1561_v1 }
 0x5ba   :  { %5458 = vst [vmem:[#allocation20_spill] sm:$0xff] %v4629_v59 }
 0x5bb   :  { %vm1572_vm5 = vcmp.eq.f32.partialorder %v1571_v30, 8.507059e+37 }
 0x5be   :  { %v2628_v6 = vpop.eup %2627 }
 0x5bf   :  { %v1581_v43 = vadd.f32 1.0, %v2628_v6  ;;  %v2630_v5 = vpop.eup %2629  ;;  %v4647_v6 = vld [vmem:[%s5314_s13] ss:$0 sm:$0xff] }
 0x5c0   :  { %1616 = vmatmul.f32.vlgmr.msrb.gmra.mxu2 %v4274_v3  ;;  %v1563_v25 = vmul.f32 %v2630_v5, %v1561_v1  ;;  %vm1568_vm2 = vweird.f32 %v2630_v5 }
 0x5c1   :  { %1875 = vmatpush.msrb.mxu2 %v4243_v11  ;;  %v4633_v54 = vpop.f32.mrf.mxu2  ;;  %2631 = vrcp.f32 %v1581_v43  ;;  %vm1569_vm4 = vmor %vm1567_vm3, %vm1568_vm2  ;;  %v1593_v59 = vand.u32 2147483648, %v1581_v43  ;;  %vm1587_vm7 = vweird.f32 %v1581_v43  ;;  %v1591_v26 = vand.u32 2147483647, %v1581_v43 }
 0x5c2   :  { %5459 = vst [vmem:[#allocation19_spill] sm:$0xff] %v4633_v54  ;;  %v1564_v2 = vsub.f32 1.0, %v1563_v25 }
 0x5c3   :  { %1876 = vmatpush.msrb.mxu2 %v4252_v47  ;;  %v1594_v60 = vor.u32 1.1754944e-38, %v1593_v59  ;;  %vm1592_vm9 = vcmp.eq.f32.partialorder %v1591_v26, 8.507059e+37  ;;  %v4694_v59 = vld [vmem:[%s5312_s10 + $0xc0] sm:$0xff] }
 0x5c4   :  { %v1565_v28 = vmul.f32 %v2630_v5, %v1564_v2  ;;  %v1574_v2 = vor.u32 1.1754944e-38, %v1573_v21 }
 0x5c5   :  { %1877 = vmatpush.msrb.mxu2 %v4259_v42 }
 0x5c6   :  { %v1566_v38 = vadd.f32 %v2630_v5, %v1565_v28 }
 0x5c7   :  { %1878 = vmatpush.msrb.mxu2 %v4267_v46  ;;  %v2632_v49 = vpop.eup %2631 }
 0x5c8   :  { %v1583_v61 = vmul.f32 %v2632_v49, %v1581_v43  ;;  %v1570_v51 = vsel %vm1569_vm4, %v2630_v5, %v1566_v38  ;;  %vm1588_vm6 = vweird.f32 %v2632_v49  ;;  %v4702_v43 = vld [vmem:[%s5312_s10 + $0xb0] sm:$0xff] }
 0x5c9   :  { %1879 = vmatpush.msrb.mxu2 %v4280_v13  ;;  %v4635_v39 = vpop.f32.mrf.mxu2  ;;  %v1575_v28 = vsel %vm1572_vm5, %v1574_v2, %v1570_v51  ;;  %vm1589_vm8 = vmor %vm1587_vm7, %vm1588_vm6 }
 0x5ca   :  { %5460 = vst [vmem:[#allocation27_spill] sm:$0xff] %v4635_v39  ;;  %v1584_v53 = vsub.f32 1.0, %v1583_v61  ;;  %v1410_v39 = vpop.f32.mrf.mxu0 }
 0x5cb   :  { %1880 = vmatpush.msrb.mxu2 %v4290_v10 }
 0x5cc   :  { %v1585_v25 = vmul.f32 %v2632_v49, %v1584_v53 }
 0x5cd   :  { %1881 = vmatpush.msrb.mxu2 %v4297_v14 }
 0x5cf   :  { %1882 = vmatpush.msrb.mxu2 %v4305_v33 }
 0x5d1   :  { %1883 = vmatpush.msrb.mxu2 %v4313_v16  ;;  %v4637_v24 = vpop.f32.mrf.mxu2 }
 0x5d2   :  { %5461 = vst [vmem:[#allocation29_spill] sm:$0xff] %v4637_v24  ;;  %v4649_v24 = vperm.slane %v1303_v22, 2 }
 0x5d3   :  { %1884 = vmatpush.msrb.mxu2 %v4322_v15 }
 0x5d4   :  { %v1411_v1 = vadd.f32 %v1410_v39, %v4649_v24  ;;  %v4657_v39 = vld [vmem:[%s5315_s14] ss:$0 sm:$0xff] }
 0x5d5   :  { %1885 = vmatpush.msrb.mxu2 %v4330_v7 }
 0x5d7   :  { %1886 = vmatpush.msrb.mxu2 %v4338_v4 }
 0x5d9   :  { %1887 = vmatpush.msrb.mxu2 %v4346_v50 }
 0x5db   :  { %1888 = vmatpush.msrb.mxu2 %v4355_v0 }
 0x5dd   :  { %1889 = vmatpush.msrb.mxu2 %v4368_v17 }
 0x5df   :  { %1890 = vmatpush.msrb.mxu2 %v4376_v9 }
 0x63b   :  { %v4642_v52 = vpop.f32.mrf.mxu2 }
 0x63c   :  { %5462 = vst [vmem:[#allocation22_spill] sm:$0xff] %v4642_v52  ;;  %v1586_v52 = vadd.f32 %v2632_v49, %v1585_v25 }
 0x63e   :  { %v1590_v22 = vsel %vm1589_vm8, %v2632_v49, %v1586_v52  ;;  %v4710_v49 = vld [vmem:[%s5312_s10 + $0xa0] sm:$0xff]  ;;  %v4718_v52 = vld [vmem:[%s5312_s10 + $0x90] sm:$0xff] }
 0x63f   :  { %v1595_v5 = vsel %vm1592_vm9, %v1594_v60, %v1590_v22  ;;  %v4678_v60 = vld [vmem:[%s5312_s10 + $0xe0] sm:$0xff] }
 0x640   :  { %v1623_v38 = vsub.f32 1.0, %v1595_v5  ;;  %v4767_v22 = vld [vmem:[#allocation7] ss:$0 sm:$0xff] }
 0x641   :  { %5476 = vst [vmem:[#allocation35_spill] sm:$0xff] %v4767_v22 }
 0x643   :  { %v1617_v54 = vpop.f32.mrf.mxu2 }
 0x644   :  { %v1618_v61 = vadd.f32 %v4647_v6, %v1617_v54  ;;  %v1625_v54 = vmul.f32 %v4274_v3, %v1595_v5  ;;  %v4670_v3 = vld [vmem:[%s5312_s10 + $0xf0] sm:$0xff] }
 0x646   :  { %v1620_v23 = vmul.f32 %v1618_v61, %v1575_v28 }
 0x648   :  { %v1621_v53 = vadd.f32 %v1620_v23, %v1411_v1  ;;  %v4686_v23 = vld [vmem:[%s5312_s10 + $0xd0] sm:$0xff] }
 0x64a   :  { %2633 = vtanh.f32 %v1621_v53 }
 0x650   :  { %v2634_v21 = vpop.eup %2633 }
 0x651   :  { %v1624_v30 = vmul.f32 %v2634_v21, %v1623_v38 }
 0x653   :  { %v4659_v25 = vadd.f32 %v1625_v54, %v1624_v30 }
 0x655   :  { %1647 = vmatmul.f32.vlgmr.msra.gmra.mxu3 %v4659_v25  ;;  %1667 = vmatmul.f32.vlgmr.msra.gmra.mxu0 %v4659_v25  ;;  %v2425_v26 = vmul.f32 %v4657_v39, %v4659_v25 }
 0x656   :  { %1727 = vmatmul.f32.vlgmr.msrb.gmra.mxu1 %v4659_v25  ;;  %1935 = vmatpush.msra.mxu3 %v4360_v12 }
 0x657   :  { %2433 = vadd.xlane.f32.xlu0 %v2425_v26  ;;  %1967 = vmatpush.msra.mxu0 %v4670_v3 }
 0x658   :  { %1936 = vmatpush.msra.mxu3 %v4420_v55  ;;  %1987 = vmatpush.msrb.mxu1 %v4243_v11 }
 0x659   :  { %1968 = vmatpush.msra.mxu0 %v4678_v60 }
 0x65a   :  { %1937 = vmatpush.msra.mxu3 %v4431_v27  ;;  %1988 = vmatpush.msrb.mxu1 %v4252_v47 }
 0x65b   :  { %1969 = vmatpush.msra.mxu0 %v4686_v23 }
 0x65c   :  { %1938 = vmatpush.msra.mxu3 %v4436_v36  ;;  %1989 = vmatpush.msrb.mxu1 %v4259_v42 }
 0x65d   :  { %1970 = vmatpush.msra.mxu0 %v4694_v59 }
 0x65e   :  { %1939 = vmatpush.msra.mxu3 %v4443_v19  ;;  %1990 = vmatpush.msrb.mxu1 %v4267_v46 }
 0x65f   :  { %1971 = vmatpush.msra.mxu0 %v4702_v43 }
 0x660   :  { %1940 = vmatpush.msra.mxu3 %v4452_v63  ;;  %1991 = vmatpush.msrb.mxu1 %v4280_v13 }
 0x661   :  { %1972 = vmatpush.msra.mxu0 %v4710_v49 }
 0x662   :  { %1941 = vmatpush.msra.mxu3 %v4461_v35  ;;  %1992 = vmatpush.msrb.mxu1 %v4290_v10 }
 0x663   :  { %1973 = vmatpush.msra.mxu0 %v4718_v52 }
 0x664   :  { %1942 = vmatpush.msra.mxu3 %v4469_v41  ;;  %1993 = vmatpush.msrb.mxu1 %v4297_v14 }
 0x665   :  { %1974 = vmatpush.msra.mxu0 %v4110_v20  ;;  %v5463_v20 = vld [vmem:[#allocation14_spill] sm:$0xff] }
 0x666   :  { %1943 = vmatpush.msra.mxu3 %v4477_v18  ;;  %1994 = vmatpush.msrb.mxu1 %v4305_v33 }
 0x667   :  { %1975 = vmatpush.msra.mxu0 %v4123_v29  ;;  %v5464_v29 = vld [vmem:[#allocation11_spill] sm:$0xff] }
 0x668   :  { %1944 = vmatpush.msra.mxu3 %v4492_v37  ;;  %1995 = vmatpush.msrb.mxu1 %v4313_v16 }
 0x669   :  { %1976 = vmatpush.msra.mxu0 %v4135_v32  ;;  %v5465_v32 = vld [vmem:[#allocation8_spill] sm:$0xff] }
 0x66a   :  { %1945 = vmatpush.msra.mxu3 %v4499_v56  ;;  %1996 = vmatpush.msrb.mxu1 %v4322_v15 }
 0x66b   :  { %1977 = vmatpush.msra.mxu0 %v4147_v58  ;;  %v5466_v58 = vld [vmem:[#allocation15_spill] sm:$0xff] }
 0x66c   :  { %1946 = vmatpush.msra.mxu3 %v4509_v8  ;;  %1997 = vmatpush.msrb.mxu1 %v4330_v7 }
 0x66d   :  { %1978 = vmatpush.msra.mxu0 %v4159_v44  ;;  %v1413_v44 = vpop.f32.mrf.mxu0 }
 0x66e   :  { %1947 = vmatpush.msra.mxu3 %v5463_v20  ;;  %1998 = vmatpush.msrb.mxu1 %v4338_v4 }
 0x66f   :  { %1979 = vmatpush.msra.mxu0 %v4171_v34  ;;  %v1372_v34 = vpop.f32.mrf.mxu3 }
 0x670   :  { %1948 = vmatpush.msra.mxu3 %v5464_v29  ;;  %1999 = vmatpush.msrb.mxu1 %v4346_v50 }
 0x671   :  { %1980 = vmatpush.msra.mxu0 %v4183_v62 }
 0x672   :  { %1949 = vmatpush.msra.mxu3 %v5465_v32  ;;  %2000 = vmatpush.msrb.mxu1 %v4355_v0 }
 0x673   :  { %1981 = vmatpush.msra.mxu0 %v4194_v45 }
 0x674   :  { %1950 = vmatpush.msra.mxu3 %v5466_v58  ;;  %2001 = vmatpush.msrb.mxu1 %v4368_v17 }
 0x675   :  { %1982 = vmatpush.msra.mxu0 %v4206_v57  ;;  %v4749_v51 = vpop.f32.mrf.mxu0 }
 0x676   :  { %2002 = vmatpush.msrb.mxu1 %v4376_v9  ;;  %5467 = vst [vmem:[#allocation28_spill] sm:$0xff] %v4749_v51 }
 0x677   :  { %v4751_v2 = vpop.f32.mrf.mxu3 }
 0x678   :  { %5468 = vst [vmem:[#allocation30_spill] sm:$0xff] %v4751_v2 }
 0x67d   :  { %v4753_v62 = vpop.f32.mrf.mxu0 }
 0x67e   :  { %5469 = vst [vmem:[#allocation31_spill] sm:$0xff] %v4753_v62 }
 0x67f   :  { %v4755_v61 = vpop.f32.mrf.mxu3 }
 0x680   :  { %5470 = vst [vmem:[#allocation21_spill] sm:$0xff] %v4755_v61 }
 0x685   :  { %v4757_v28 = vpop.f32.mrf.mxu0 }
 0x686   :  { %5471 = vst [vmem:[#allocation32_spill] sm:$0xff] %v4757_v28 }
 0x687   :  { %v4759_v45 = vpop.f32.mrf.mxu3 }
 0x688   :  { %5472 = vst [vmem:[#allocation33_spill] sm:$0xff] %v4759_v45 }
 0x68d   :  { %v4761_v1 = vpop.f32.mrf.mxu0 }
 0x68e   :  { %5473 = vst [vmem:[#allocation23_spill] sm:$0xff] %v4761_v1 }
 0x68f   :  { %v4763_v53 = vpop.f32.mrf.mxu3 }
 0x690   :  { %5474 = vst [vmem:[#allocation34_spill] sm:$0xff] %v4763_v53 }
 0x695   :  { %v4765_v57 = vpop.f32.mrf.mxu0 }
 0x696   :  { %5475 = vst [vmem:[#allocation24_spill] sm:$0xff] %v4765_v57  ;;  %v1373_v57 = vadd.f32 %v1372_v34, %v4627_v48 }
 0x697   :  { %v4769_v5 = vpop.f32.mrf.mxu3 }
 0x698   :  { %5477 = vst [vmem:[#allocation36_spill] sm:$0xff] %v4769_v5 }
 0x69d   :  { %v4771_v38 = vpop.f32.mrf.mxu0 }
 0x69e   :  { %5478 = vst [vmem:[#allocation37_spill] sm:$0xff] %v4771_v38  ;;  %v5480_v38 = vld [vmem:[#allocation12_spill] sm:$0xff] }
 0x69f   :  { %v4778_v54 = vpop.f32.mrf.mxu3  ;;  %v1332_v45 = vadd.f32 %v5480_v38, %v4621_v31 }
 0x6a0   :  { %5479 = vst [vmem:[#allocation25_spill] sm:$0xff] %v4778_v54 }
 0x6ca   :  { %v2434_v21 = vpop.xlane.xlu0 %2433 }
 0x6cb   :  { %v2453_v30 = vadd.f32 %v4767_v22, %v2434_v21  ;;  %v5481_v21 = vld [vmem:[#allocation9_spill] sm:$0xff] }
 0x6cd   :  { %2462 = vst.msk [vmem:[%s5319_s16] sm:$0xff] %vm2461_vm10, %v2453_v30 }
 0x6d2   :  { %v1668_v26 = vpop.f32.mrf.mxu0 }
 0x6d3   :  { %v1669_v1 = vadd.f32 %v1668_v26, %v4625_v40 }
 0x6d5   :  { %v1691_v53 = vadd.f32 %v1669_v1, %v1373_v57 }
 0x6d7   :  { %v2528_v5 = vmul.f32 -1.442695, %v1691_v53 }
 0x6d8   :  { %v1648_v28 = vpop.f32.mrf.mxu3 }
 0x6d9   :  { %2635 = vpow2.f32 %v2528_v5  ;;  %v1649_v62 = vadd.f32 %v1648_v28, %v5481_v21 }
 0x6db   :  { %v1671_v61 = vadd.f32 %v1649_v62, %v1332_v45  ;;  %v1728_v62 = vpop.f32.mrf.mxu1 }
 0x6dd   :  { %v2527_v51 = vmul.f32 -1.442695, %v1671_v61 }
 0x6df   :  { %v2636_v2 = vpop.eup %2635  ;;  %2637 = vpow2.f32 %v2527_v51 }
 0x6e0   :  { %v1695_v30 = vadd.f32 1.0, %v2636_v2  ;;  %v1729_v2 = vadd.f32 %v4647_v6, %v1728_v62 }
 0x6e2   :  { %2639 = vrcp.f32 %v1695_v30  ;;  %vm1701_vm0 = vweird.f32 %v1695_v30 }
 0x6e5   :  { %v2638_v54 = vpop.eup %2637 }
 0x6e6   :  { %v1675_v22 = vadd.f32 1.0, %v2638_v54 }
 0x6e8   :  { %2641 = vrcp.f32 %v1675_v22  ;;  %v2640_v34 = vpop.eup %2639  ;;  %v1687_v48 = vand.u32 2147483648, %v1675_v22  ;;  %v1685_v5 = vand.u32 2147483647, %v1675_v22  ;;  %vm1681_vm12 = vweird.f32 %v1675_v22 }
 0x6e9   :  { %v1697_v26 = vmul.f32 %v2640_v34, %v1695_v30  ;;  %vm1702_vm15 = vweird.f32 %v2640_v34 }
 0x6ea   :  { %v1688_v51 = vor.u32 1.1754944e-38, %v1687_v48  ;;  %vm1686_vm14 = vcmp.eq.f32.partialorder %v1685_v5, 8.507059e+37  ;;  %vm1703_vm1 = vmor %vm1701_vm0, %vm1702_vm15 }
 0x6eb   :  { %v1698_v57 = vsub.f32 1.0, %v1697_v26  ;;  %v1414_v26 = vadd.f32 %v1413_v44, %v4649_v24 }
 0x6ed   :  { %v1699_v28 = vmul.f32 %v2640_v34, %v1698_v57 }
 0x6ee   :  { %v2642_v1 = vpop.eup %2641 }
 0x6ef   :  { %v1677_v53 = vmul.f32 %v2642_v1, %v1675_v22  ;;  %vm1682_vm11 = vweird.f32 %v2642_v1  ;;  %v1700_v21 = vadd.f32 %v2640_v34, %v1699_v28 }
 0x6f0   :  { %vm1683_vm13 = vmor %vm1681_vm12, %vm1682_vm11 }
 0x6f1   :  { %v1678_v40 = vsub.f32 1.0, %v1677_v53  ;;  %v1707_v53 = vand.u32 2147483648, %v1695_v30  ;;  %v1704_v9 = vsel %vm1703_vm1, %v2640_v34, %v1700_v21  ;;  %v5487_v21 = vld [vmem:[#allocation30_spill] sm:$0xff]  ;;  %v5488_v34 = vld [vmem:[#allocation9_spill] sm:$0xff] }
 0x6f3   :  { %v1679_v38 = vmul.f32 %v2642_v1, %v1678_v40  ;;  %v1705_v40 = vand.u32 2147483647, %v1695_v30 }
 0x6f5   :  { %v1680_v61 = vadd.f32 %v2642_v1, %v1679_v38  ;;  %v1708_v38 = vor.u32 1.1754944e-38, %v1707_v53  ;;  %vm1706_vm2 = vcmp.eq.f32.partialorder %v1705_v40, 8.507059e+37 }
 0x6f7   :  { %v1684_v45 = vsel %vm1683_vm13, %v2642_v1, %v1680_v61  ;;  %v1709_v48 = vsel %vm1706_vm2, %v1708_v38, %v1704_v9  ;;  %v5485_v9 = vld [vmem:[#allocation16_spill] sm:$0xff] }
 0x6f8   :  { %v1689_v54 = vsel %vm1686_vm14, %v1688_v51, %v1684_v45  ;;  %v1734_v22 = vsub.f32 1.0, %v1709_v48  ;;  %v1736_v5 = vmul.f32 %v1709_v48, %v4659_v25  ;;  %v5486_v25 = vld [vmem:[#allocation17_spill] sm:$0xff]  ;;  %v5489_v51 = vld [vmem:[#allocation10_spill] sm:$0xff] }
 0x6f9   :  { %v1731_v31 = vmul.f32 %v1729_v2, %v1689_v54  ;;  %v1376_v30 = vadd.f32 %v5487_v21, %v5486_v25 }
 0x6fb   :  { %v1732_v57 = vadd.f32 %v1731_v31, %v1414_v26 }
 0x6fd   :  { %2643 = vtanh.f32 %v1732_v57 }
 0x703   :  { %v2644_v62 = vpop.eup %2643 }
 0x704   :  { %v1735_v1 = vmul.f32 %v2644_v62, %v1734_v22 }
 0x706   :  { %v4788_v61 = vadd.f32 %v1736_v5, %v1735_v1 }
 0x708   :  { %1759 = vmatmul.f32.vlgmr.msra.gmra.mxu2 %v4788_v61  ;;  %1779 = vmatmul.f32.vlgmr.msrb.gmra.mxu3 %v4788_v61  ;;  %v2426_v44 = vmul.f32 %v4657_v39, %v4788_v61 }
 0x709   :  { %1839 = vmatmul.f32.vlgmr.msrb.gmra.mxu0 %v4788_v61  ;;  %2047 = vmatpush.msra.mxu2 %v4360_v12 }
 0x70a   :  { %2435 = vadd.xlane.f32.xlu0 %v2426_v44  ;;  %2079 = vmatpush.msrb.mxu3 %v4670_v3 }
 0x70b   :  { %2048 = vmatpush.msra.mxu2 %v4420_v55  ;;  %2099 = vmatpush.msrb.mxu0 %v4243_v11  ;;  %v4820_v11 = vld [vmem:[%s5312_s10 + $0x80] sm:$0xff] }
 0x70c   :  { %2080 = vmatpush.msrb.mxu3 %v4678_v60 }
 0x70d   :  { %2049 = vmatpush.msra.mxu2 %v4431_v27  ;;  %2100 = vmatpush.msrb.mxu0 %v4252_v47  ;;  %v4828_v47 = vld [vmem:[%s5312_s10 + $0x70] sm:$0xff] }
 0x70e   :  { %2081 = vmatpush.msrb.mxu3 %v4686_v23 }
 0x70f   :  { %2050 = vmatpush.msra.mxu2 %v4436_v36  ;;  %2101 = vmatpush.msrb.mxu0 %v4259_v42  ;;  %v4836_v42 = vld [vmem:[%s5312_s10 + $0x60] sm:$0xff] }
 0x710   :  { %2082 = vmatpush.msrb.mxu3 %v4694_v59 }
 0x711   :  { %2051 = vmatpush.msra.mxu2 %v4443_v19  ;;  %2102 = vmatpush.msrb.mxu0 %v4267_v46  ;;  %v4844_v46 = vld [vmem:[%s5312_s10 + $0x50] sm:$0xff] }
 0x712   :  { %2083 = vmatpush.msrb.mxu3 %v4702_v43 }
 0x713   :  { %2052 = vmatpush.msra.mxu2 %v4452_v63  ;;  %2103 = vmatpush.msrb.mxu0 %v4280_v13  ;;  %v4852_v13 = vld [vmem:[%s5312_s10 + $0x40] sm:$0xff] }
 0x714   :  { %2084 = vmatpush.msrb.mxu3 %v4710_v49 }
 0x715   :  { %2053 = vmatpush.msra.mxu2 %v4461_v35  ;;  %2104 = vmatpush.msrb.mxu0 %v4290_v10  ;;  %v4860_v10 = vld [vmem:[%s5312_s10 + $0x30] sm:$0xff] }
 0x716   :  { %2085 = vmatpush.msrb.mxu3 %v4718_v52 }
 0x717   :  { %2054 = vmatpush.msra.mxu2 %v4469_v41  ;;  %2105 = vmatpush.msrb.mxu0 %v4297_v14  ;;  %v4868_v14 = vld [vmem:[%s5312_s10 + $0x20] sm:$0xff] }
 0x718   :  { %2086 = vmatpush.msrb.mxu3 %v4820_v11 }
 0x719   :  { %2055 = vmatpush.msra.mxu2 %v4477_v18  ;;  %2106 = vmatpush.msrb.mxu0 %v4305_v33  ;;  %v4876_v33 = vld [vmem:[%s5312_s10 + $0x10] sm:$0xff] }
 0x71a   :  { %2087 = vmatpush.msrb.mxu3 %v4828_v47 }
 0x71b   :  { %2056 = vmatpush.msra.mxu2 %v4492_v37  ;;  %2107 = vmatpush.msrb.mxu0 %v4313_v16  ;;  %v4884_v16 = vld [vmem:[%s5312_s10] sm:$0xff] }
 0x71c   :  { %2088 = vmatpush.msrb.mxu3 %v4836_v42 }
 0x71d   :  { %2057 = vmatpush.msra.mxu2 %v4499_v56  ;;  %2108 = vmatpush.msrb.mxu0 %v4322_v15  ;;  %v5482_v15 = vld [vmem:[#allocation18_spill] sm:$0xff] }
 0x71e   :  { %2089 = vmatpush.msrb.mxu3 %v4844_v46 }
 0x71f   :  { %2058 = vmatpush.msra.mxu2 %v4509_v8  ;;  %2109 = vmatpush.msrb.mxu0 %v4330_v7 }
 0x720   :  { %2090 = vmatpush.msrb.mxu3 %v4852_v13 }
 0x721   :  { %2059 = vmatpush.msra.mxu2 %v5463_v20  ;;  %2110 = vmatpush.msrb.mxu0 %v4338_v4  ;;  %v5483_v4 = vld [vmem:[#allocation35_spill] sm:$0xff] }
 0x722   :  { %2091 = vmatpush.msrb.mxu3 %v4860_v10 }
 0x723   :  { %2060 = vmatpush.msra.mxu2 %v5464_v29  ;;  %2111 = vmatpush.msrb.mxu0 %v4346_v50 }
 0x724   :  { %2092 = vmatpush.msrb.mxu3 %v4868_v14 }
 0x725   :  { %2061 = vmatpush.msra.mxu2 %v5465_v32  ;;  %2112 = vmatpush.msrb.mxu0 %v4355_v0 }
 0x726   :  { %2093 = vmatpush.msrb.mxu3 %v4876_v33 }
 0x727   :  { %2062 = vmatpush.msra.mxu2 %v5466_v58  ;;  %2113 = vmatpush.msrb.mxu0 %v4368_v17  ;;  %v5484_v17 = vld [vmem:[#allocation13_spill] sm:$0xff] }
 0x728   :  { %2094 = vmatpush.msrb.mxu3 %v4884_v16  ;;  %v1335_v31 = vadd.f32 %v5485_v9, %v5484_v17 }
 0x729   :  { %2114 = vmatpush.msrb.mxu0 %v5482_v15 }
 0x77d   :  { %v2436_v7 = vpop.xlane.xlu0 %2435 }
 0x77e   :  { %v2454_v50 = vadd.f32 %v5483_v4, %v2436_v7 }
 0x780   :  { %2463 = vst.msk [vmem:[%s5319_s16 + $0x8] sm:$0xff] %vm2461_vm10, %v2454_v50 }
 0x78b   :  { %v1760_v0 = vpop.f32.mrf.mxu2  ;;  %v1780_v12 = vpop.f32.mrf.mxu3 }
 0x78c   :  { %v1761_v28 = vadd.f32 %v1760_v0, %v5488_v34  ;;  %v1781_v2 = vadd.f32 %v1780_v12, %v5489_v51  ;;  %v1840_v12 = vpop.f32.mrf.mxu0 }
 0x78e   :  { %v1783_v45 = vadd.f32 %v1761_v28, %v1335_v31  ;;  %v1803_v54 = vadd.f32 %v1781_v2, %v1376_v30  ;;  %v1841_v30 = vadd.f32 %v4647_v6, %v1840_v12  ;;  %v4929_v12 = vld [vmem:[%s5312_s10 + $0xe8] sm:$0xff] }
 0x790   :  { %v2529_v26 = vmul.f32 -1.442695, %v1783_v45  ;;  %v2530_v53 = vmul.f32 -1.442695, %v1803_v54  ;;  %v5490_v54 = vld [vmem:[#allocation28_spill] sm:$0xff] }
 0x792   :  { %2645 = vpow2.f32 %v2529_v26  ;;  %v1417_v26 = vadd.f32 %v5490_v54, %v4649_v24 }
 0x793   :  { %2647 = vpow2.f32 %v2530_v53 }
 0x798   :  { %v2646_v40 = vpop.eup %2645 }
 0x799   :  { %v2648_v57 = vpop.eup %2647  ;;  %v1787_v38 = vadd.f32 1.0, %v2646_v40 }
 0x79a   :  { %v1807_v48 = vadd.f32 1.0, %v2648_v57 }
 0x79b   :  { %2649 = vrcp.f32 %v1787_v38  ;;  %v1799_v15 = vand.u32 2147483648, %v1787_v38  ;;  %v1797_v0 = vand.u32 2147483647, %v1787_v38  ;;  %vm1793_vm4 = vweird.f32 %v1787_v38 }
 0x79c   :  { %2651 = vrcp.f32 %v1807_v48  ;;  %v1819_v40 = vand.u32 2147483648, %v1807_v48  ;;  %vm1813_vm8 = vweird.f32 %v1807_v48  ;;  %v1817_v57 = vand.u32 2147483647, %v1807_v48 }
 0x79d   :  { %v1800_v21 = vor.u32 1.1754944e-38, %v1799_v15  ;;  %vm1798_vm6 = vcmp.eq.f32.partialorder %v1797_v0, 8.507059e+37 }
 0x79e   :  { %vm1818_vm11 = vcmp.eq.f32.partialorder %v1817_v57, 8.507059e+37 }
 0x7a1   :  { %v2650_v22 = vpop.eup %2649 }
 0x7a2   :  { %v2652_v62 = vpop.eup %2651  ;;  %v1789_v1 = vmul.f32 %v2650_v22, %v1787_v38  ;;  %vm1794_vm3 = vweird.f32 %v2650_v22  ;;  %v1820_v38 = vor.u32 1.1754944e-38, %v1819_v40 }
 0x7a3   :  { %v1809_v5 = vmul.f32 %v2652_v62, %v1807_v48  ;;  %vm1795_vm5 = vmor %vm1793_vm4, %vm1794_vm3  ;;  %vm1814_vm7 = vweird.f32 %v2652_v62 }
 0x7a4   :  { %v1790_v44 = vsub.f32 1.0, %v1789_v1  ;;  %vm1815_vm9 = vmor %vm1813_vm8, %vm1814_vm7 }
 0x7a5   :  { %v1810_v7 = vsub.f32 1.0, %v1809_v5 }
 0x7a6   :  { %v1791_v50 = vmul.f32 %v2650_v22, %v1790_v44 }
 0x7a7   :  { %v1811_v9 = vmul.f32 %v2652_v62, %v1810_v7 }
 0x7a8   :  { %v1792_v31 = vadd.f32 %v2650_v22, %v1791_v50 }
 0x7a9   :  { %v1812_v45 = vadd.f32 %v2652_v62, %v1811_v9 }
 0x7aa   :  { %v1796_v28 = vsel %vm1795_vm5, %v2650_v22, %v1792_v31 }
 0x7ab   :  { %v1801_v2 = vsel %vm1798_vm6, %v1800_v21, %v1796_v28  ;;  %v1816_v5 = vsel %vm1815_vm9, %v2652_v62, %v1812_v45  ;;  %v4913_v62 = vld [vmem:[%s5313_s11 + $0x78] sm:$0xff]  ;;  %v5491_v21 = vld [vmem:[#allocation20_spill] sm:$0xff] }
 0x7ac   :  { %v1843_v53 = vmul.f32 %v1841_v30, %v1801_v2  ;;  %v1821_v44 = vsel %vm1818_vm11, %v1820_v38, %v1816_v5  ;;  %v1338_v30 = vadd.f32 %v5491_v21, %v5484_v17 }
 0x7ad   :  { %v1846_v15 = vsub.f32 1.0, %v1821_v44  ;;  %v1848_v50 = vmul.f32 %v1821_v44, %v4788_v61  ;;  %v4921_v61 = vld [vmem:[%s5312_s10 + $0xf8] sm:$0xff] }
 0x7ae   :  { %v1844_v1 = vadd.f32 %v1843_v53, %v1417_v26  ;;  %v5492_v26 = vld [vmem:[#allocation21_spill] sm:$0xff] }
 0x7af   :  { %v1379_v53 = vadd.f32 %v5492_v26, %v5486_v25 }
 0x7b0   :  { %2653 = vtanh.f32 %v1844_v1 }
 0x7b6   :  { %v2654_v22 = vpop.eup %2653 }
 0x7b7   :  { %v1847_v7 = vmul.f32 %v2654_v22, %v1846_v15 }
 0x7b9   :  { %v4903_v0 = vadd.f32 %v1848_v50, %v1847_v7 }
 0x7bb   :  { %1871 = vmatmul.f32.vlgmr.msra.gmra.mxu1 %v4903_v0  ;;  %1891 = vmatmul.f32.vlgmr.msrb.gmra.mxu2 %v4903_v0  ;;  %v2427_v48 = vmul.f32 %v4657_v39, %v4903_v0 }
 0x7bc   :  { %1951 = vmatmul.f32.vlgmr.msra.gmra.mxu3 %v4903_v0  ;;  %2159 = vmatpush.msra.mxu1 %v4913_v62 }
 0x7bd   :  { %2437 = vadd.xlane.f32.xlu1 %v2427_v48  ;;  %2191 = vmatpush.msrb.mxu2 %v4670_v3 }
 0x7be   :  { %2160 = vmatpush.msra.mxu1 %v4420_v55  ;;  %2211 = vmatpush.msra.mxu3 %v4921_v61  ;;  %v4937_v55 = vld [vmem:[%s5312_s10 + $0xd8] sm:$0xff] }
 0x7bf   :  { %2192 = vmatpush.msrb.mxu2 %v4678_v60 }
 0x7c0   :  { %2161 = vmatpush.msra.mxu1 %v4431_v27  ;;  %2212 = vmatpush.msra.mxu3 %v4929_v12  ;;  %v4945_v27 = vld [vmem:[%s5312_s10 + $0xc8] sm:$0xff] }
 0x7c1   :  { %2193 = vmatpush.msrb.mxu2 %v4686_v23 }
 0x7c2   :  { %2162 = vmatpush.msra.mxu1 %v4436_v36  ;;  %2213 = vmatpush.msra.mxu3 %v4937_v55  ;;  %v4953_v36 = vld [vmem:[%s5312_s10 + $0xb8] sm:$0xff] }
 0x7c3   :  { %2194 = vmatpush.msrb.mxu2 %v4694_v59 }
 0x7c4   :  { %2163 = vmatpush.msra.mxu1 %v4443_v19  ;;  %2214 = vmatpush.msra.mxu3 %v4945_v27  ;;  %v4961_v19 = vld [vmem:[%s5312_s10 + $0xa8] sm:$0xff] }
 0x7c5   :  { %2195 = vmatpush.msrb.mxu2 %v4702_v43 }
 0x7c6   :  { %2164 = vmatpush.msra.mxu1 %v4452_v63  ;;  %2215 = vmatpush.msra.mxu3 %v4953_v36  ;;  %v4969_v63 = vld [vmem:[%s5312_s10 + $0x98] sm:$0xff] }
 0x7c7   :  { %2196 = vmatpush.msrb.mxu2 %v4710_v49 }
 0x7c8   :  { %2165 = vmatpush.msra.mxu1 %v4461_v35  ;;  %2216 = vmatpush.msra.mxu3 %v4961_v19  ;;  %v4977_v35 = vld [vmem:[%s5312_s10 + $0x88] sm:$0xff] }
 0x7c9   :  { %2197 = vmatpush.msrb.mxu2 %v4718_v52 }
 0x7ca   :  { %2166 = vmatpush.msra.mxu1 %v4469_v41  ;;  %2217 = vmatpush.msra.mxu3 %v4969_v63  ;;  %v4985_v41 = vld [vmem:[%s5312_s10 + $0x78] sm:$0xff] }
 0x7cb   :  { %2198 = vmatpush.msrb.mxu2 %v4820_v11 }
 0x7cc   :  { %2167 = vmatpush.msra.mxu1 %v4477_v18  ;;  %2218 = vmatpush.msra.mxu3 %v4977_v35  ;;  %v4993_v18 = vld [vmem:[%s5312_s10 + $0x68] sm:$0xff] }
 0x7cd   :  { %2199 = vmatpush.msrb.mxu2 %v4828_v47 }
 0x7ce   :  { %2168 = vmatpush.msra.mxu1 %v4492_v37  ;;  %2219 = vmatpush.msra.mxu3 %v4985_v41  ;;  %v5001_v37 = vld [vmem:[%s5312_s10 + $0x58] sm:$0xff] }
 0x7cf   :  { %2200 = vmatpush.msrb.mxu2 %v4836_v42 }
 0x7d0   :  { %2169 = vmatpush.msra.mxu1 %v4499_v56  ;;  %2220 = vmatpush.msra.mxu3 %v4993_v18  ;;  %v5009_v56 = vld [vmem:[%s5312_s10 + $0x48] sm:$0xff] }
 0x7d1   :  { %2201 = vmatpush.msrb.mxu2 %v4844_v46 }
 0x7d2   :  { %2170 = vmatpush.msra.mxu1 %v4509_v8  ;;  %2221 = vmatpush.msra.mxu3 %v5001_v37  ;;  %v5017_v8 = vld [vmem:[%s5312_s10 + $0x38] sm:$0xff] }
 0x7d3   :  { %2202 = vmatpush.msrb.mxu2 %v4852_v13 }
 0x7d4   :  { %2171 = vmatpush.msra.mxu1 %v5463_v20  ;;  %2222 = vmatpush.msra.mxu3 %v5009_v56  ;;  %v5025_v20 = vld [vmem:[%s5312_s10 + $0x28] sm:$0xff] }
 0x7d5   :  { %2203 = vmatpush.msrb.mxu2 %v4860_v10 }
 0x7d6   :  { %2172 = vmatpush.msra.mxu1 %v5464_v29  ;;  %2223 = vmatpush.msra.mxu3 %v5017_v8  ;;  %v5033_v29 = vld [vmem:[%s5312_s10 + $0x18] sm:$0xff] }
 0x7d7   :  { %2204 = vmatpush.msrb.mxu2 %v4868_v14 }
 0x7d8   :  { %2173 = vmatpush.msra.mxu1 %v5465_v32  ;;  %2224 = vmatpush.msra.mxu3 %v5025_v20  ;;  %v5040_v32 = vld [vmem:[%s5312_s10 + $0x8] sm:$0xff] }
 0x7d9   :  { %2205 = vmatpush.msrb.mxu2 %v4876_v33 }
 0x7da   :  { %2174 = vmatpush.msra.mxu1 %v5466_v58  ;;  %2225 = vmatpush.msra.mxu3 %v5033_v29 }
 0x7db   :  { %2206 = vmatpush.msrb.mxu2 %v4884_v16 }
 0x7dc   :  { %2226 = vmatpush.msra.mxu3 %v5040_v32 }
 0x830   :  { %v2438_v9 = vpop.xlane.xlu1 %2437 }
 0x831   :  { %v2455_v31 = vadd.f32 %v5483_v4, %v2438_v9 }
 0x833   :  { %2464 = vst.msk [vmem:[%s5319_s16 + $0x10] sm:$0xff] %vm2461_vm10, %v2455_v31 }
 0x838   :  { %v1872_v58 = vpop.f32.mrf.mxu1 }
 0x839   :  { %v1873_v28 = vadd.f32 %v1872_v58, %v5488_v34 }
 0x83b   :  { %v1895_v2 = vadd.f32 %v1873_v28, %v1338_v30 }
 0x83d   :  { %v2531_v45 = vmul.f32 -1.442695, %v1895_v2 }
 0x83e   :  { %v1892_v54 = vpop.f32.mrf.mxu2 }
 0x83f   :  { %2655 = vpow2.f32 %v2531_v45  ;;  %v1893_v40 = vadd.f32 %v1892_v54, %v5489_v51  ;;  %v1952_v21 = vpop.f32.mrf.mxu3 }
 0x840   :  { %v1953_v26 = vadd.f32 %v4647_v6, %v1952_v21 }
 0x841   :  { %v1915_v57 = vadd.f32 %v1893_v40, %v1379_v53  ;;  %v5493_v53 = vld [vmem:[#allocation31_spill] sm:$0xff] }
 0x842   :  { %v1420_v40 = vadd.f32 %v5493_v53, %v4649_v24 }
 0x843   :  { %v2532_v1 = vmul.f32 -1.442695, %v1915_v57 }
 0x845   :  { %v2656_v5 = vpop.eup %2655  ;;  %2657 = vpow2.f32 %v2532_v1 }
 0x846   :  { %v1899_v38 = vadd.f32 1.0, %v2656_v5 }
 0x848   :  { %2659 = vrcp.f32 %v1899_v38  ;;  %v1911_v48 = vand.u32 2147483648, %v1899_v38  ;;  %v1909_v31 = vand.u32 2147483647, %v1899_v38  ;;  %vm1905_vm13 = vweird.f32 %v1899_v38 }
 0x84a   :  { %v1912_v2 = vor.u32 1.1754944e-38, %v1911_v48  ;;  %vm1910_vm15 = vcmp.eq.f32.partialorder %v1909_v31, 8.507059e+37 }
 0x84b   :  { %v2658_v44 = vpop.eup %2657 }
 0x84c   :  { %v1919_v15 = vadd.f32 1.0, %v2658_v44 }
 0x84e   :  { %v2660_v22 = vpop.eup %2659  ;;  %2661 = vrcp.f32 %v1919_v15  ;;  %v1931_v5 = vand.u32 2147483648, %v1919_v15  ;;  %vm1925_vm1 = vweird.f32 %v1919_v15 }
 0x84f   :  { %v1901_v7 = vmul.f32 %v2660_v22, %v1899_v38  ;;  %vm1906_vm12 = vweird.f32 %v2660_v22 }
 0x850   :  { %vm1907_vm14 = vmor %vm1905_vm13, %vm1906_vm12  ;;  %v1932_v38 = vor.u32 1.1754944e-38, %v1931_v5 }
 0x851   :  { %v1902_v50 = vsub.f32 1.0, %v1901_v7  ;;  %v1929_v7 = vand.u32 2147483647, %v1919_v15 }
 0x853   :  { %v1903_v9 = vmul.f32 %v2660_v22, %v1902_v50  ;;  %vm1930_vm3 = vcmp.eq.f32.partialorder %v1929_v7, 8.507059e+37 }
 0x854   :  { %v2662_v58 = vpop.eup %2661 }
 0x855   :  { %v1921_v30 = vmul.f32 %v2662_v58, %v1919_v15  ;;  %v1904_v28 = vadd.f32 %v2660_v22, %v1903_v9  ;;  %vm1926_vm0 = vweird.f32 %v2662_v58 }
 0x856   :  { %vm1927_vm2 = vmor %vm1925_vm1, %vm1926_vm0 }
 0x857   :  { %v1922_v45 = vsub.f32 1.0, %v1921_v30  ;;  %v1908_v54 = vsel %vm1907_vm14, %v2660_v22, %v1904_v28 }
 0x858   :  { %v1913_v57 = vsel %vm1910_vm15, %v1912_v2, %v1908_v54 }
 0x859   :  { %v1923_v1 = vmul.f32 %v2662_v58, %v1922_v45  ;;  %v1955_v44 = vmul.f32 %v1953_v26, %v1913_v57 }
 0x85b   :  { %v1924_v50 = vadd.f32 %v2662_v58, %v1923_v1  ;;  %v1956_v9 = vadd.f32 %v1955_v44, %v1420_v40 }
 0x85d   :  { %v1928_v48 = vsel %vm1927_vm2, %v2662_v58, %v1924_v50  ;;  %2663 = vtanh.f32 %v1956_v9  ;;  %v5078_v58 = vld [vmem:[%s5313_s11 + $0x68] sm:$0xff] }
 0x85e   :  { %v1933_v22 = vsel %vm1930_vm3, %v1932_v38, %v1928_v48 }
 0x85f   :  { %v1958_v31 = vsub.f32 1.0, %v1933_v22  ;;  %v1960_v28 = vmul.f32 %v1933_v22, %v4903_v0  ;;  %v5070_v0 = vld [vmem:[%s5313_s11 + $0x70] sm:$0xff] }
 0x863   :  { %v2664_v21 = vpop.eup %2663 }
 0x864   :  { %v1959_v30 = vmul.f32 %v2664_v21, %v1958_v31  ;;  %v5496_v21 = vld [vmem:[#allocation32_spill] sm:$0xff] }
 0x866   :  { %v5058_v2 = vadd.f32 %v1960_v28, %v1959_v30  ;;  %v1423_v30 = vadd.f32 %v5496_v21, %v4649_v24 }
 0x868   :  { %1983 = vmatmul.f32.vlgmr.msra.gmra.mxu0 %v5058_v2  ;;  %2003 = vmatmul.f32.vlgmr.msrb.gmra.mxu1 %v5058_v2  ;;  %v2428_v15 = vmul.f32 %v4657_v39, %v5058_v2 }
 0x869   :  { %2063 = vmatmul.f32.vlgmr.msra.gmra.mxu2 %v5058_v2  ;;  %2271 = vmatpush.msra.mxu0 %v4913_v62 }
 0x86a   :  { %2439 = vadd.xlane.f32.xlu1 %v2428_v15  ;;  %2303 = vmatpush.msrb.mxu1 %v4670_v3  ;;  %v5086_v3 = vld [vmem:[%s5313_s11 + $0x60] sm:$0xff] }
 0x86b   :  { %2272 = vmatpush.msra.mxu0 %v5070_v0  ;;  %2323 = vmatpush.msra.mxu2 %v4921_v61 }
 0x86c   :  { %2304 = vmatpush.msrb.mxu1 %v4678_v60  ;;  %v5094_v60 = vld [vmem:[%s5313_s11 + $0x58] sm:$0xff] }
 0x86d   :  { %2273 = vmatpush.msra.mxu0 %v5078_v58  ;;  %2324 = vmatpush.msra.mxu2 %v4929_v12 }
 0x86e   :  { %2305 = vmatpush.msrb.mxu1 %v4686_v23  ;;  %v5102_v23 = vld [vmem:[%s5313_s11 + $0x50] sm:$0xff] }
 0x86f   :  { %2274 = vmatpush.msra.mxu0 %v5086_v3  ;;  %2325 = vmatpush.msra.mxu2 %v4937_v55  ;;  %v5494_v55 = vld [vmem:[#allocation19_spill] sm:$0xff] }
 0x870   :  { %2306 = vmatpush.msrb.mxu1 %v4694_v59  ;;  %v5110_v59 = vld [vmem:[%s5313_s11 + $0x48] sm:$0xff] }
 0x871   :  { %2275 = vmatpush.msra.mxu0 %v5094_v60  ;;  %2326 = vmatpush.msra.mxu2 %v4945_v27  ;;  %v1341_v27 = vadd.f32 %v5494_v55, %v5484_v17 }
 0x872   :  { %2307 = vmatpush.msrb.mxu1 %v4702_v43  ;;  %v5118_v43 = vld [vmem:[%s5313_s11 + $0x40] sm:$0xff] }
 0x873   :  { %2276 = vmatpush.msra.mxu0 %v5102_v23  ;;  %2327 = vmatpush.msra.mxu2 %v4953_v36  ;;  %v5495_v36 = vld [vmem:[#allocation33_spill] sm:$0xff] }
 0x874   :  { %2308 = vmatpush.msrb.mxu1 %v4710_v49  ;;  %v5126_v49 = vld [vmem:[%s5313_s11 + $0x38] sm:$0xff] }
 0x875   :  { %2277 = vmatpush.msra.mxu0 %v5110_v59  ;;  %2328 = vmatpush.msra.mxu2 %v4961_v19  ;;  %v1382_v19 = vadd.f32 %v5495_v36, %v5486_v25 }
 0x876   :  { %2309 = vmatpush.msrb.mxu1 %v4718_v52  ;;  %v5134_v52 = vld [vmem:[%s5313_s11 + $0x30] sm:$0xff] }
 0x877   :  { %2278 = vmatpush.msra.mxu0 %v5118_v43  ;;  %2329 = vmatpush.msra.mxu2 %v4969_v63 }
 0x878   :  { %2310 = vmatpush.msrb.mxu1 %v4820_v11  ;;  %v5142_v11 = vld [vmem:[%s5313_s11 + $0x28] sm:$0xff] }
 0x879   :  { %2279 = vmatpush.msra.mxu0 %v5126_v49  ;;  %2330 = vmatpush.msra.mxu2 %v4977_v35 }
 0x87a   :  { %2311 = vmatpush.msrb.mxu1 %v4828_v47  ;;  %v5150_v47 = vld [vmem:[%s5313_s11 + $0x20] sm:$0xff] }
 0x87b   :  { %2280 = vmatpush.msra.mxu0 %v5134_v52  ;;  %2331 = vmatpush.msra.mxu2 %v4985_v41 }
 0x87c   :  { %2312 = vmatpush.msrb.mxu1 %v4836_v42  ;;  %v5158_v42 = vld [vmem:[%s5313_s11 + $0x18] sm:$0xff] }
 0x87d   :  { %2281 = vmatpush.msra.mxu0 %v5142_v11  ;;  %2332 = vmatpush.msra.mxu2 %v4993_v18 }
 0x87e   :  { %2313 = vmatpush.msrb.mxu1 %v4844_v46  ;;  %v5166_v46 = vld [vmem:[%s5313_s11 + $0x10] sm:$0xff] }
 0x87f   :  { %2282 = vmatpush.msra.mxu0 %v5150_v47  ;;  %2333 = vmatpush.msra.mxu2 %v5001_v37 }
 0x880   :  { %2314 = vmatpush.msrb.mxu1 %v4852_v13  ;;  %v5174_v13 = vld [vmem:[%s5313_s11 + $0x8] sm:$0xff] }
 0x881   :  { %2283 = vmatpush.msra.mxu0 %v5158_v42  ;;  %2334 = vmatpush.msra.mxu2 %v5009_v56 }
 0x882   :  { %2315 = vmatpush.msrb.mxu1 %v4860_v10  ;;  %v5182_v10 = vld [vmem:[%s5313_s11] sm:$0xff] }
 0x883   :  { %2284 = vmatpush.msra.mxu0 %v5166_v46  ;;  %2335 = vmatpush.msra.mxu2 %v5017_v8 }
 0x884   :  { %2316 = vmatpush.msrb.mxu1 %v4868_v14 }
 0x885   :  { %2285 = vmatpush.msra.mxu0 %v5174_v13  ;;  %2336 = vmatpush.msra.mxu2 %v5025_v20 }
 0x886   :  { %2317 = vmatpush.msrb.mxu1 %v4876_v33 }
 0x887   :  { %2286 = vmatpush.msra.mxu0 %v5182_v10  ;;  %2337 = vmatpush.msra.mxu2 %v5033_v29 }
 0x888   :  { %2318 = vmatpush.msrb.mxu1 %v4884_v16 }
 0x889   :  { %2338 = vmatpush.msra.mxu2 %v5040_v32 }
 0x8dd   :  { %v2440_v14 = vpop.xlane.xlu1 %2439 }
 0x8de   :  { %v2456_v61 = vadd.f32 %v5483_v4, %v2440_v14 }
 0x8e0   :  { %2465 = vst.msk [vmem:[%s5319_s16 + $0x18] sm:$0xff] %vm2461_vm10, %v2456_v61 }
 0x8e5   :  { %v1984_v33 = vpop.f32.mrf.mxu0  ;;  %v2004_v12 = vpop.f32.mrf.mxu1 }
 0x8e6   :  { %v1985_v16 = vadd.f32 %v1984_v33, %v5488_v34  ;;  %v2005_v63 = vadd.f32 %v2004_v12, %v5489_v51 }
 0x8e8   :  { %v2007_v35 = vadd.f32 %v1985_v16, %v1341_v27  ;;  %v2027_v41 = vadd.f32 %v2005_v63, %v1382_v19 }
 0x8ea   :  { %v2533_v18 = vmul.f32 -1.442695, %v2007_v35  ;;  %v2534_v37 = vmul.f32 -1.442695, %v2027_v41 }
 0x8ec   :  { %2665 = vpow2.f32 %v2533_v18  ;;  %v2064_v7 = vpop.f32.mrf.mxu2 }
 0x8ed   :  { %2667 = vpow2.f32 %v2534_v37  ;;  %v2065_v48 = vadd.f32 %v4647_v6, %v2064_v7  ;;  %v5499_v7 = vld [vmem:[#allocation23_spill] sm:$0xff] }
 0x8f2   :  { %v2666_v56 = vpop.eup %2665 }
 0x8f3   :  { %v2668_v8 = vpop.eup %2667  ;;  %v2011_v20 = vadd.f32 1.0, %v2666_v56 }
 0x8f4   :  { %v2031_v29 = vadd.f32 1.0, %v2668_v8 }
 0x8f5   :  { %2669 = vrcp.f32 %v2011_v20  ;;  %v2023_v57 = vand.u32 2147483648, %v2011_v20  ;;  %v2021_v5 = vand.u32 2147483647, %v2011_v20  ;;  %vm2017_vm5 = vweird.f32 %v2011_v20 }
 0x8f6   :  { %2671 = vrcp.f32 %v2031_v29  ;;  %v2043_v28 = vand.u32 2147483648, %v2031_v29  ;;  %vm2037_vm9 = vweird.f32 %v2031_v29  ;;  %v2041_v14 = vand.u32 2147483647, %v2031_v29 }
 0x8f7   :  { %v2024_v9 = vor.u32 1.1754944e-38, %v2023_v57  ;;  %vm2022_vm7 = vcmp.eq.f32.partialorder %v2021_v5, 8.507059e+37 }
 0x8f8   :  { %v2044_v12 = vor.u32 1.1754944e-38, %v2043_v28  ;;  %vm2042_vm12 = vcmp.eq.f32.partialorder %v2041_v14, 8.507059e+37 }
 0x8fb   :  { %v2670_v32 = vpop.eup %2669 }
 0x8fc   :  { %v2672_v45 = vpop.eup %2671  ;;  %v2013_v54 = vmul.f32 %v2670_v32, %v2011_v20  ;;  %vm2018_vm4 = vweird.f32 %v2670_v32 }
 0x8fd   :  { %v2033_v26 = vmul.f32 %v2672_v45, %v2031_v29  ;;  %vm2019_vm6 = vmor %vm2017_vm5, %vm2018_vm4  ;;  %vm2038_vm8 = vweird.f32 %v2672_v45 }
 0x8fe   :  { %v2014_v53 = vsub.f32 1.0, %v2013_v54  ;;  %vm2039_vm11 = vmor %vm2037_vm9, %vm2038_vm8 }
 0x8ff   :  { %v2034_v40 = vsub.f32 1.0, %v2033_v26 }
 0x900   :  { %v2015_v1 = vmul.f32 %v2670_v32, %v2014_v53 }
 0x901   :  { %v2035_v44 = vmul.f32 %v2672_v45, %v2034_v40  ;;  %v5240_v40 = vld [vmem:[%s5314_s13] ss:$0 sm:$0xff] }
 0x902   :  { %v2016_v50 = vadd.f32 %v2670_v32, %v2015_v1 }
 0x903   :  { %v2036_v31 = vadd.f32 %v2672_v45, %v2035_v44 }
 0x904   :  { %v2020_v38 = vsel %vm2019_vm6, %v2670_v32, %v2016_v50  ;;  %v1426_v50 = vadd.f32 %v5499_v7, %v4649_v24 }
 0x905   :  { %v2025_v22 = vsel %vm2022_vm7, %v2024_v9, %v2020_v38  ;;  %v2040_v33 = vsel %vm2039_vm11, %v2672_v45, %v2036_v31 }
 0x906   :  { %v2067_v15 = vmul.f32 %v2065_v48, %v2025_v22  ;;  %v2045_v55 = vsel %vm2042_vm12, %v2044_v12, %v2040_v33  ;;  %v5253_v12 = vld [vmem:[%s5315_s14] ss:$0 sm:$0xff] }
 0x907   :  { %v2070_v27 = vsub.f32 1.0, %v2045_v55  ;;  %v2072_v19 = vmul.f32 %v2045_v55, %v5058_v2 }
 0x908   :  { %v2068_v61 = vadd.f32 %v2067_v15, %v1423_v30 }
 0x90a   :  { %2673 = vtanh.f32 %v2068_v61 }
 0x910   :  { %v2674_v36 = vpop.eup %2673 }
 0x911   :  { %v2071_v6 = vmul.f32 %v2674_v36, %v2070_v27 }
 0x913   :  { %v5203_v16 = vadd.f32 %v2072_v19, %v2071_v6 }
 0x915   :  { %2095 = vmatmul.f32.vlgmr.msrb.gmra.mxu3 %v5203_v16  ;;  %2115 = vmatmul.f32.vlgmr.msrb.gmra.mxu0 %v5203_v16  ;;  %v2429_v63 = vmul.f32 %v4657_v39, %v5203_v16 }
 0x916   :  { %2175 = vmatmul.f32.vlgmr.msra.gmra.mxu1 %v5203_v16  ;;  %2383 = vmatpush.msrb.mxu3 %v4913_v62 }
 0x917   :  { %2441 = vadd.xlane.f32.xlu2 %v2429_v63 }
 0x918   :  { %2384 = vmatpush.msrb.mxu3 %v5070_v0  ;;  %v5497_v0 = vld [vmem:[#allocation34_spill] sm:$0xff] }
 0x91a   :  { %2385 = vmatpush.msrb.mxu3 %v5078_v58  ;;  %v1385_v58 = vadd.f32 %v5497_v0, %v5486_v25 }
 0x91c   :  { %2386 = vmatpush.msrb.mxu3 %v5086_v3 }
 0x91e   :  { %2387 = vmatpush.msrb.mxu3 %v5094_v60 }
 0x920   :  { %2388 = vmatpush.msrb.mxu3 %v5102_v23 }
 0x922   :  { %2389 = vmatpush.msrb.mxu3 %v5110_v59 }
 0x924   :  { %2390 = vmatpush.msrb.mxu3 %v5118_v43  ;;  %v5498_v43 = vld [vmem:[#allocation27_spill] sm:$0xff] }
 0x926   :  { %2391 = vmatpush.msrb.mxu3 %v5126_v49  ;;  %v1344_v49 = vadd.f32 %v5498_v43, %v5484_v17 }
 0x928   :  { %2392 = vmatpush.msrb.mxu3 %v5134_v52 }
 0x92a   :  { %2393 = vmatpush.msrb.mxu3 %v5142_v11 }
 0x92c   :  { %2394 = vmatpush.msrb.mxu3 %v5150_v47 }
 0x92e   :  { %2395 = vmatpush.msrb.mxu3 %v5158_v42 }
 0x930   :  { %2396 = vmatpush.msrb.mxu3 %v5166_v46 }
 0x932   :  { %2397 = vmatpush.msrb.mxu3 %v5174_v13 }
 0x934   :  { %2398 = vmatpush.msrb.mxu3 %v5182_v10 }
 0x98a   :  { %v2442_v39 = vpop.xlane.xlu2 %2441 }
 0x98b   :  { %v2457_v62 = vadd.f32 %v5483_v4, %v2442_v39  ;;  %v5501_v39 = vld [vmem:[#allocation36_spill] sm:$0xff] }
 0x98d   :  { %2466 = vst.msk [vmem:[%s5319_s16 + $0x20] sm:$0xff] %vm2461_vm10, %v2457_v62  ;;  %v1388_v62 = vadd.f32 %v5501_v39, %v5486_v25 }
 0x992   :  { %v2116_v2 = vpop.f32.mrf.mxu0 }
 0x993   :  { %v2117_v3 = vadd.f32 %v2116_v2, %v5489_v51  ;;  %v2176_v54 = vpop.f32.mrf.mxu1 }
 0x994   :  { %v2177_v57 = vadd.f32 %v5240_v40, %v2176_v54  ;;  %v5502_v54 = vld [vmem:[#allocation24_spill] sm:$0xff] }
 0x995   :  { %v2139_v60 = vadd.f32 %v2117_v3, %v1385_v58 }
 0x997   :  { %v2536_v23 = vmul.f32 -1.442695, %v2139_v60 }
 0x998   :  { %v2096_v59 = vpop.f32.mrf.mxu3 }
 0x999   :  { %2675 = vpow2.f32 %v2536_v23  ;;  %v2097_v52 = vadd.f32 %v2096_v59, %v5488_v34 }
 0x99b   :  { %v2119_v11 = vadd.f32 %v2097_v52, %v1344_v49 }
 0x99d   :  { %v2535_v47 = vmul.f32 -1.442695, %v2119_v11 }
 0x99f   :  { %v2676_v42 = vpop.eup %2675  ;;  %2677 = vpow2.f32 %v2535_v47 }
 0x9a0   :  { %v2143_v46 = vadd.f32 1.0, %v2676_v42 }
 0x9a2   :  { %2679 = vrcp.f32 %v2143_v46  ;;  %v2155_v9 = vand.u32 2147483648, %v2143_v46  ;;  %vm2149_vm2 = vweird.f32 %v2143_v46  ;;  %v2153_v48 = vand.u32 2147483647, %v2143_v46 }
 0x9a4   :  { %v2156_v21 = vor.u32 1.1754944e-38, %v2155_v9  ;;  %vm2154_vm4 = vcmp.eq.f32.partialorder %v2153_v48, 8.507059e+37 }
 0x9a5   :  { %v2678_v13 = vpop.eup %2677 }
 0x9a6   :  { %v2123_v10 = vadd.f32 1.0, %v2678_v13 }
 0x9a8   :  { %2681 = vrcp.f32 %v2123_v10  ;;  %v2680_v35 = vpop.eup %2679  ;;  %v2135_v20 = vand.u32 2147483648, %v2123_v10  ;;  %v2133_v32 = vand.u32 2147483647, %v2123_v10  ;;  %vm2129_vm14 = vweird.f32 %v2123_v10 }
 0x9a9   :  { %v2145_v41 = vmul.f32 %v2680_v35, %v2143_v46  ;;  %vm2150_vm1 = vweird.f32 %v2680_v35 }
 0x9aa   :  { %v2136_v53 = vor.u32 1.1754944e-38, %v2135_v20  ;;  %vm2134_vm0 = vcmp.eq.f32.partialorder %v2133_v32, 8.507059e+37  ;;  %vm2151_vm3 = vmor %vm2149_vm2, %vm2150_vm1 }
 0x9ab   :  { %v2146_v56 = vsub.f32 1.0, %v2145_v41 }
 0x9ad   :  { %v2147_v45 = vmul.f32 %v2680_v35, %v2146_v56 }
 0x9ae   :  { %v2682_v18 = vpop.eup %2681 }
 0x9af   :  { %v2125_v37 = vmul.f32 %v2682_v18, %v2123_v10  ;;  %vm2130_vm13 = vweird.f32 %v2682_v18  ;;  %v2148_v44 = vadd.f32 %v2680_v35, %v2147_v45 }
 0x9b0   :  { %vm2131_vm15 = vmor %vm2129_vm14, %vm2130_vm13 }
 0x9b1   :  { %v2126_v8 = vsub.f32 1.0, %v2125_v37  ;;  %v2152_v31 = vsel %vm2151_vm3, %v2680_v35, %v2148_v44 }
 0x9b2   :  { %v2157_v30 = vsel %vm2154_vm4, %v2156_v21, %v2152_v31 }
 0x9b3   :  { %v2127_v29 = vmul.f32 %v2682_v18, %v2126_v8  ;;  %v2182_v28 = vsub.f32 1.0, %v2157_v30  ;;  %v2184_v61 = vmul.f32 %v2157_v30, %v5203_v16  ;;  %v5500_v16 = vld [vmem:[#allocation29_spill] sm:$0xff] }
 0x9b4   :  { %v1347_v63 = vadd.f32 %v5500_v16, %v5484_v17 }
 0x9b5   :  { %v2128_v26 = vadd.f32 %v2682_v18, %v2127_v29 }
 0x9b7   :  { %v2132_v1 = vsel %vm2131_vm15, %v2682_v18, %v2128_v26  ;;  %v1429_v26 = vadd.f32 %v5502_v54, %v4649_v24 }
 0x9b8   :  { %v2137_v5 = vsel %vm2134_vm0, %v2136_v53, %v2132_v1 }
 0x9b9   :  { %v2179_v38 = vmul.f32 %v2177_v57, %v2137_v5 }
 0x9bb   :  { %v2180_v22 = vadd.f32 %v2179_v38, %v1426_v50 }
 0x9bd   :  { %2683 = vtanh.f32 %v2180_v22 }
 0x9c3   :  { %v2684_v15 = vpop.eup %2683 }
 0x9c4   :  { %v2183_v14 = vmul.f32 %v2684_v15, %v2182_v28  ;;  %v5280_v28 = vld [vmem:[#allocation7] ss:$0 sm:$0xff] }
 0x9c6   :  { %v5246_v33 = vadd.f32 %v2184_v61, %v2183_v14  ;;  %v5503_v61 = vld [vmem:[#allocation22_spill] sm:$0xff] }
 0x9c8   :  { %2207 = vmatmul.f32.vlgmr.msrb.gmra.mxu2 %v5246_v33  ;;  %2227 = vmatmul.f32.vlgmr.msra.gmra.mxu3 %v5246_v33  ;;  %v2430_v55 = vmul.f32 %v5253_v12, %v5246_v33 }
 0x9c9   :  { %2287 = vmatmul.f32.vlgmr.msra.gmra.mxu0 %v5246_v33 }
 0x9ca   :  { %2443 = vadd.xlane.f32.xlu2 %v2430_v55 }
 0xa3d   :  { %v2444_v27 = vpop.xlane.xlu2 %2443 }
 0xa3e   :  { %v2458_v36 = vadd.f32 %v5483_v4, %v2444_v27 }
 0xa40   :  { %2467 = vst.msk [vmem:[%s5319_s16 + $0x28] sm:$0xff] %vm2461_vm10, %v2458_v36 }
 0xa46   :  { %v2288_v18 = vpop.f32.mrf.mxu0 }
 0xa47   :  { %v2289_v20 = vadd.f32 %v5240_v40, %v2288_v18 }
 0xa4b   :  { %v2208_v6 = vpop.f32.mrf.mxu2  ;;  %v2228_v19 = vpop.f32.mrf.mxu3 }
 0xa4c   :  { %v2209_v2 = vadd.f32 %v2208_v6, %v5488_v34  ;;  %v2229_v0 = vadd.f32 %v2228_v19, %v5489_v51  ;;  %v5504_v19 = vld [vmem:[#allocation25_spill] sm:$0xff] }
 0xa4d   :  { %v1391_v16 = vadd.f32 %v5504_v19, %v5486_v25 }
 0xa4e   :  { %v2231_v58 = vadd.f32 %v2209_v2, %v1347_v63  ;;  %v2251_v3 = vadd.f32 %v2229_v0, %v1388_v62 }
 0xa50   :  { %v2537_v4 = vmul.f32 -1.442695, %v2231_v58  ;;  %v2538_v60 = vmul.f32 -1.442695, %v2251_v3 }
 0xa52   :  { %2685 = vpow2.f32 %v2537_v4 }
 0xa53   :  { %2687 = vpow2.f32 %v2538_v60 }
 0xa58   :  { %v2686_v23 = vpop.eup %2685 }
 0xa59   :  { %v2688_v59 = vpop.eup %2687  ;;  %v2235_v43 = vadd.f32 1.0, %v2686_v23 }
 0xa5a   :  { %v2255_v49 = vadd.f32 1.0, %v2688_v59 }
 0xa5b   :  { %2689 = vrcp.f32 %v2235_v43  ;;  %v2247_v13 = vand.u32 2147483648, %v2235_v43  ;;  %v2245_v41 = vand.u32 2147483647, %v2235_v43  ;;  %vm2241_vm6 = vweird.f32 %v2235_v43 }
 0xa5c   :  { %2691 = vrcp.f32 %v2255_v49  ;;  %v2267_v57 = vand.u32 2147483648, %v2255_v49  ;;  %vm2261_vm11 = vweird.f32 %v2255_v49  ;;  %v2265_v1 = vand.u32 2147483647, %v2255_v49 }
 0xa5d   :  { %v2248_v8 = vor.u32 1.1754944e-38, %v2247_v13  ;;  %vm2246_vm8 = vcmp.eq.f32.partialorder %v2245_v41, 8.507059e+37 }
 0xa5e   :  { %v2268_v7 = vor.u32 1.1754944e-38, %v2267_v57  ;;  %vm2266_vm13 = vcmp.eq.f32.partialorder %v2265_v1, 8.507059e+37 }
 0xa61   :  { %v2690_v52 = vpop.eup %2689 }
 0xa62   :  { %v2692_v11 = vpop.eup %2691  ;;  %v2237_v47 = vmul.f32 %v2690_v52, %v2235_v43  ;;  %vm2242_vm5 = vweird.f32 %v2690_v52 }
 0xa63   :  { %v2257_v42 = vmul.f32 %v2692_v11, %v2255_v49  ;;  %vm2243_vm7 = vmor %vm2241_vm6, %vm2242_vm5  ;;  %vm2262_vm9 = vweird.f32 %v2692_v11 }
 0xa64   :  { %v2238_v46 = vsub.f32 1.0, %v2237_v47  ;;  %vm2263_vm12 = vmor %vm2261_vm11, %vm2262_vm9 }
 0xa65   :  { %v2258_v10 = vsub.f32 1.0, %v2257_v42 }
 0xa66   :  { %v2239_v35 = vmul.f32 %v2690_v52, %v2238_v46  ;;  %v5505_v46 = vld [vmem:[#allocation37_spill] sm:$0xff] }
 0xa67   :  { %v2259_v37 = vmul.f32 %v2692_v11, %v2258_v10  ;;  %v1432_v13 = vadd.f32 %v5505_v46, %v4649_v24 }
 0xa68   :  { %v2240_v56 = vadd.f32 %v2690_v52, %v2239_v35 }
 0xa69   :  { %v2260_v45 = vadd.f32 %v2692_v11, %v2259_v37 }
 0xa6a   :  { %v2244_v29 = vsel %vm2243_vm7, %v2690_v52, %v2240_v56 }
 0xa6b   :  { %v2249_v32 = vsel %vm2246_vm8, %v2248_v8, %v2244_v29  ;;  %v2264_v44 = vsel %vm2263_vm12, %v2692_v11, %v2260_v45 }
 0xa6c   :  { %v2291_v53 = vmul.f32 %v2289_v20, %v2249_v32  ;;  %v2269_v50 = vsel %vm2266_vm13, %v2268_v7, %v2264_v44 }
 0xa6d   :  { %v2294_v9 = vsub.f32 1.0, %v2269_v50  ;;  %v2296_v22 = vmul.f32 %v2269_v50, %v5246_v33  ;;  %v1350_v33 = vadd.f32 %v5503_v61, %v5484_v17 }
 0xa6e   :  { %v2292_v5 = vadd.f32 %v2291_v53, %v1429_v26 }
 0xa70   :  { %2693 = vtanh.f32 %v2292_v5 }
 0xa76   :  { %v2694_v38 = vpop.eup %2693 }
 0xa77   :  { %v2295_v48 = vmul.f32 %v2694_v38, %v2294_v9 }
 0xa79   :  { %v5273_v31 = vadd.f32 %v2296_v22, %v2295_v48 }
 0xa7b   :  { %2319 = vmatmul.f32.vlgmr.msrb.gmra.mxu1 %v5273_v31  ;;  %2339 = vmatmul.f32.vlgmr.msra.gmra.mxu2 %v5273_v31  ;;  %v2431_v21 = vmul.f32 %v5253_v12, %v5273_v31 }
 0xa7c   :  { %2399 = vmatmul.f32.vlgmr.msrb.gmra.mxu3 %v5273_v31 }
 0xa7d   :  { %2445 = vadd.xlane.f32.xlu0 %v2431_v21 }
 0xaf0   :  { %v2446_v30 = vpop.xlane.xlu0 %2445 }
 0xaf1   :  { %v2459_v15 = vadd.f32 %v5280_v28, %v2446_v30 }
 0xaf3   :  { %2468 = vst.msk [vmem:[%s5319_s16 + $0x30] sm:$0xff] %vm2461_vm10, %v2459_v15 }
 0xaf8   :  { %v2320_v14 = vpop.f32.mrf.mxu1 }
 0xaf9   :  { %v2321_v55 = vadd.f32 %v2320_v14, %v5488_v34 }
 0xafb   :  { %v2343_v27 = vadd.f32 %v2321_v55, %v1350_v33 }
 0xafd   :  { %v2539_v36 = vmul.f32 -1.442695, %v2343_v27 }
 0xafe   :  { %v2340_v6 = vpop.f32.mrf.mxu2 }
 0xaff   :  { %2695 = vpow2.f32 %v2539_v36  ;;  %v2341_v63 = vadd.f32 %v2340_v6, %v5489_v51  ;;  %v2400_v43 = vpop.f32.mrf.mxu3 }
 0xb00   :  { %v2401_v47 = vadd.f32 %v5240_v40, %v2400_v43 }
 0xb01   :  { %v2363_v39 = vadd.f32 %v2341_v63, %v1391_v16 }
 0xb03   :  { %v2540_v62 = vmul.f32 -1.442695, %v2363_v39 }
 0xb05   :  { %v2696_v2 = vpop.eup %2695  ;;  %2697 = vpow2.f32 %v2540_v62 }
 0xb06   :  { %v2347_v0 = vadd.f32 1.0, %v2696_v2 }
 0xb08   :  { %2699 = vrcp.f32 %v2347_v0  ;;  %v2359_v60 = vand.u32 2147483648, %v2347_v0  ;;  %v2357_v59 = vand.u32 2147483647, %v2347_v0  ;;  %vm2353_vm15 = vweird.f32 %v2347_v0 }
 0xb0a   :  { %v2360_v52 = vor.u32 1.1754944e-38, %v2359_v60  ;;  %vm2358_vm1 = vcmp.eq.f32.partialorder %v2357_v59, 8.507059e+37 }
 0xb0b   :  { %v2698_v58 = vpop.eup %2697 }
 0xb0c   :  { %v2367_v3 = vadd.f32 1.0, %v2698_v58 }
 0xb0e   :  { %v2700_v17 = vpop.eup %2699  ;;  %2701 = vrcp.f32 %v2367_v3  ;;  %v2379_v18 = vand.u32 2147483648, %v2367_v3  ;;  %v2377_v37 = vand.u32 2147483647, %v2367_v3  ;;  %vm2373_vm3 = vweird.f32 %v2367_v3 }
 0xb0f   :  { %v2349_v34 = vmul.f32 %v2700_v17, %v2347_v0  ;;  %vm2354_vm14 = vweird.f32 %v2700_v17 }
 0xb10   :  { %vm2355_vm0 = vmor %vm2353_vm15, %vm2354_vm14  ;;  %v2380_v29 = vor.u32 1.1754944e-38, %v2379_v18  ;;  %vm2378_vm5 = vcmp.eq.f32.partialorder %v2377_v37, 8.507059e+37 }
 0xb11   :  { %v2350_v4 = vsub.f32 1.0, %v2349_v34 }
 0xb13   :  { %v2351_v23 = vmul.f32 %v2700_v17, %v2350_v4 }
 0xb14   :  { %v2702_v25 = vpop.eup %2701 }
 0xb15   :  { %v2352_v49 = vadd.f32 %v2700_v17, %v2351_v23  ;;  %v2369_v51 = vmul.f32 %v2702_v25, %v2367_v3  ;;  %vm2374_vm2 = vweird.f32 %v2702_v25 }
 0xb16   :  { %vm2375_vm4 = vmor %vm2373_vm3, %vm2374_vm2 }
 0xb17   :  { %v2356_v11 = vsel %vm2355_vm0, %v2700_v17, %v2352_v49  ;;  %v2370_v42 = vsub.f32 1.0, %v2369_v51 }
 0xb18   :  { %v2361_v10 = vsel %vm2358_vm1, %v2360_v52, %v2356_v11 }
 0xb19   :  { %v2403_v35 = vmul.f32 %v2401_v47, %v2361_v10  ;;  %v2371_v41 = vmul.f32 %v2702_v25, %v2370_v42 }
 0xb1b   :  { %v2404_v56 = vadd.f32 %v2403_v35, %v1432_v13  ;;  %v2372_v8 = vadd.f32 %v2702_v25, %v2371_v41 }
 0xb1d   :  { %2703 = vtanh.f32 %v2404_v56  ;;  %v2376_v20 = vsel %vm2375_vm4, %v2702_v25, %v2372_v8 }
 0xb1e   :  { %v2381_v32 = vsel %vm2378_vm5, %v2380_v29, %v2376_v20 }
 0xb1f   :  { %v2406_v40 = vsub.f32 1.0, %v2381_v32  ;;  %v2408_v24 = vmul.f32 %v2381_v32, %v5273_v31 }
 0xb23   :  { %v2704_v45 = vpop.eup %2703 }
 0xb24   :  { %v2407_v54 = vmul.f32 %v2704_v45, %v2406_v40 }
 0xb26   :  { %v2409_v26 = vadd.f32 %v2408_v24, %v2407_v54 }
 0xb28   :  { %v2432_v53 = vmul.f32 %v5253_v12, %v2409_v26 }
 0xb2a   :  { %2447 = vadd.xlane.f32.xlu1 %v2432_v53 }
 0xb9d   :  { %v2448_v57 = vpop.xlane.xlu1 %2447 }
 0xb9e   :  { %v2460_v1 = vadd.f32 %v5280_v28, %v2448_v57 }
 0xba0   :  { %2469 = vst.msk [vmem:[%s5319_s16 + $0x38] sm:$0xff] %vm2461_vm10, %v2460_v1 }

</bundles_post_ra>
